<compile_context>
chip_gen: v7x
topology: tpu7x:2x2x1
jax: 0.10.0
libtpu: 0.0.40
codegen_flags: <defaults>
</compile_context>

<pallas_src>
import functools

import jax
import jax.numpy as jnp
from jax import lax
from jax.experimental import pallas as pl
from jax.experimental.pallas import tpu as pltpu

BN_EPS = 1e-5


def _round_up(v, m):
    return (v + m - 1) // m * m


def _bn_fold(bn):
    scale = bn["gamma"] / jnp.sqrt(bn["var"] + BN_EPS)
    shift = bn["beta"] - bn["mean"] * scale
    return scale.astype(jnp.float32), shift.astype(jnp.float32)


def _vmem_limit_bytes():
    """Generation-aware VMEM request: <= 3/4 of physical, capped at 64 MiB (v7x-safe)."""
    phys = 128 * 1024 * 1024
    try:
        phys = int(getattr(pltpu.get_tpu_info(), "vmem_capacity_bytes", phys))
    except Exception:
        pass
    return int(min(64 * 1024 * 1024, (phys * 3) // 4))


def _pick_tile(hw, requested):
    """Largest row tile <= requested (whole image when small).  Extra grid steps are a
    serial loop (~0.35us each) on a single TensorCore, so prefer big tiles; megacore
    parallelism still comes from the batch grid axis."""
    if hw <= requested:
        return max(8, _round_up(hw, 8))
    return max(128, (min(requested, hw) // 128) * 128)


# ------------------------------------------------------------------ kernels ---
def _stats_kernel(p_ref, wf_ref, b1_ref, sal_ref, *, c, kk, cp):
    """generate-conv features (BN1 folded + ReLU) -> per-pixel channel max / mean."""
    p = p_ref[0]                                                        # (TP, Cp) bf16
    feat = jnp.dot(p, wf_ref[...], preferred_element_type=jnp.float32)  # MXU
    feat = jnp.maximum(feat + b1_ref[...], 0.0)                         # BN1 shift + ReLU

    # channel reduction as a log2(c) tree of XLU lane rolls (offsets multiple of kk).
    steps = (c - 1).bit_length()                     # ceil(log2(c)); 0 when c == 1
    span = kk << steps
    if span > cp:                                    # keep the roll tree wrap-free
        width = _round_up(span, 128)
        feat = jnp.pad(feat, ((0, 0), (0, width - cp)))
    else:
        width = cp
    mx = feat
    sm = feat
    for j in range(steps):
        sh = (width - (kk << j)) % width             # pull data from lane i + kk*2^j
        mx = jnp.maximum(mx, pltpu.roll(mx, shift=sh, axis=1))
        sm = sm + pltpu.roll(sm, shift=sh, axis=1)

    # single lane-concatenated store of [max | mean], exactly 2*kk lanes, bf16.
    stats = jnp.concatenate([mx[:, :kk], sm[:, :kk] * (1.0 / c)], axis=-1)
    sal_ref[0] = stats.astype(sal_ref.dtype)


def _rfcbam_kernel(p_ref, rfa_ref, bkca_ref, wf_ref, b1_ref, wc_ref, b2_ref, o_ref):
    """attention re-weighting + final k x k / stride-k conv + BN2 + SiLU."""
    p = p_ref[0]                                                        # (TP, Cp) bf16
    feat = jnp.dot(p, wf_ref[...], preferred_element_type=jnp.float32)
    feat = jnp.maximum(feat + b1_ref[...], 0.0)                         # BN1 + ReLU

    # receptive-field attention (kk lanes) broadcast to the Cp feature lanes with a bf16
    # matmul; the SE channel attention is pre-folded into bkca, so no extra multiply.
    att = jnp.dot(rfa_ref[0], bkca_ref[0], preferred_element_type=jnp.float32)
    conv_data = (feat * att).astype(jnp.bfloat16)

    o = jnp.dot(conv_data, wc_ref[...], preferred_element_type=jnp.float32) + b2_ref[...]
    o_ref[0] = (o * jax.nn.sigmoid(o)).astype(o_ref.dtype)              # BN2 + SiLU, bf16


# ----------------------------------------------------------------- wrapper ---
def rfcbam_forward(x, params, kernel_size, stride=1, tile_p=1024):
    """x: (B, C_in, H, W) float32 NCHW.  Returns (B, C_out, H_out, W_out) float32."""
    b, c, H, W = x.shape
    k = kernel_size
    kk = k * k
    pd = k // 2
    s = stride
    h = (H + 2 * pd - k) // s + 1
    w = (W + 2 * pd - k) // s + 1
    hw = h * w
    C = c * kk
    Cp = _round_up(C, 128)                       # lane-align the contraction axis
    out_c = params["conv_w"].shape[0]
    OCl = out_c if out_c < 128 else _round_up(out_c, 128)   # no 128-padding for tiny out_c

    # ---- glue: im2col patches (bf16), shared by both kernels ----
    # TODO(synk): the kk-fold im2col expansion is still materialized in HBM; eliminating it
    # needs a manual halo-DMA kernel (x in pl.ANY + make_async_copy + in-VMEM assembly).
    xpad = jnp.pad(x, ((0, 0), (0, 0), (pd, pd), (pd, pd)))
    cols = []
    for dy in range(k):
        for dx in range(k):
            cols.append(xpad[:, :, dy:dy + (h - 1) * s + 1:s, dx:dx + (w - 1) * s + 1:s])
    patches = jnp.stack(cols, axis=2)                                  # (b, c, kk, h, w)
    patches = patches.transpose(0, 3, 4, 1, 2).reshape(b, hw, C)
    patches = jnp.pad(patches, ((0, 0), (0, 0), (0, Cp - C))).astype(jnp.bfloat16)

    # ---- glue: fold module weights into bf16 matmul operands ----
    s1, b1 = _bn_fold(params["bn1"])
    w2 = params["w2"].reshape(c, kk, kk).astype(jnp.float32)           # (c, n, m)
    Wf = jnp.einsum("cd,cnm->cmdn", jnp.eye(c, dtype=jnp.float32), w2).reshape(C, C)
    Wf = Wf * s1[None, :]                                              # BN1 scale folded
    Wf = jnp.pad(Wf, ((0, Cp - C), (0, Cp - C))).astype(jnp.bfloat16)
    b1p = jnp.pad(b1, (0, Cp - C)).reshape(1, Cp)

    s2, b2 = _bn_fold(params["bn2"])
    Wc = params["conv_w"].reshape(out_c, C).T.astype(jnp.float32) * s2[None, :]
    Wc = jnp.pad(Wc, ((0, Cp - C), (0, OCl - out_c))).astype(jnp.bfloat16)
    b2p = jnp.pad(b2, (0, OCl - out_c)).reshape(1, OCl)

    vmem_limit = _vmem_limit_bytes()
    TP = _pick_tile(hw, tile_p)
    # keep the streamed (double-buffered) blocks well inside the per-core VMEM budget
    while TP > 128 and 2 * TP * (Cp * 2 + 2 * kk * 2 + kk * 2 + OCl * 2) > vmem_limit // 3:
        TP //= 2
    grid = (b, pl.cdiv(hw, TP))
    cparams = pltpu.CompilerParams(dimension_semantics=("parallel", "parallel"),
                                   vmem_limit_bytes=vmem_limit)

    # ---- kernel A: features + channel max / mean (bf16, exactly 2*kk lanes) ----
    sal = pl.pallas_call(
        functools.partial(_stats_kernel, c=c, kk=kk, cp=Cp),
        out_shape=jax.ShapeDtypeStruct((b, hw, 2 * kk), jnp.bfloat16),
        grid_spec=pltpu.PrefetchScalarGridSpec(
            num_scalar_prefetch=0,
            grid=grid,
            in_specs=[
                pl.BlockSpec((1, TP, Cp), lambda bi, pi: (bi, pi, 0)),   # patches
                pl.BlockSpec((Cp, Cp), lambda bi, pi: (0, 0)),           # W_feat (BN1 folded)
                pl.BlockSpec((1, Cp), lambda bi, pi: (0, 0)),            # bn1 shift
            ],
            out_specs=pl.BlockSpec((1, TP, 2 * kk), lambda bi, pi: (bi, pi, 0)),
        ),
        compiler_params=cparams,
    )(patches, Wf, b1p)

    # ---- glue: receptive-field attention (tiny 2->1 3x3 conv on the k-expanded map) ----
    def expand(v):                                                     # (b, hw, kk) -> (b, hk, wk)
        return v.reshape(b, h, w, k, k).transpose(0, 1, 3, 2, 4).reshape(b, h * k, w * k)

    salf = sal.astype(jnp.float32)
    sal_exp = jnp.stack([expand(salf[..., 0:kk]), expand(salf[..., kk:2 * kk])], axis=1)
    rfa = jax.nn.sigmoid(lax.conv_general_dilated(
        sal_exp, params["gw_w"].astype(jnp.float32), (1, 1), [(1, 1), (1, 1)],
        dimension_numbers=("NCHW", "OIHW", "NCHW")))                   # (b, 1, hk, wk)
    rfa_rows = (rfa[:, 0].reshape(b, h, k, w, k).transpose(0, 1, 3, 2, 4)
                .reshape(b, hw, kk)).astype(jnp.bfloat16)

    # ---- glue: SE channel attention (global pool + tiny MLP) folded into the kk->Cp
    #      broadcast matrix, per batch ----
    gap = x.mean(axis=(2, 3))
    y = jnp.maximum(gap @ params["se_w1"].T, 0.0)
    ca = jax.nn.sigmoid(y @ params["se_w2"].T)                         # (b, c)
    caC = jnp.pad(jnp.repeat(ca, kk, axis=1), ((0, 0), (0, Cp - C)))   # (b, Cp)
    Bk = jnp.pad(jnp.tile(jnp.eye(kk, dtype=jnp.float32), (1, c)), ((0, 0), (0, Cp - C)))
    BkCa = (Bk[None, :, :] * caC[:, None, :]).astype(jnp.bfloat16)     # (b, kk, Cp)

    # ---- kernel B: re-weighting + final conv + BN2 + SiLU (bf16, out_c lanes) ----
    out = pl.pallas_call(
        _rfcbam_kernel,
        out_shape=jax.ShapeDtypeStruct((b, hw, OCl), jnp.bfloat16),
        grid_spec=pltpu.PrefetchScalarGridSpec(
            num_scalar_prefetch=0,
            grid=grid,
            in_specs=[
                pl.BlockSpec((1, TP, Cp), lambda bi, pi: (bi, pi, 0)),   # patches
                pl.BlockSpec((1, TP, kk), lambda bi, pi: (bi, pi, 0)),   # rf-attention rows
                pl.BlockSpec((1, kk, Cp), lambda bi, pi: (bi, 0, 0)),    # kk->Cp bcast * SE
                pl.BlockSpec((Cp, Cp), lambda bi, pi: (0, 0)),           # W_feat (BN1 folded)
                pl.BlockSpec((1, Cp), lambda bi, pi: (0, 0)),            # bn1 shift
                pl.BlockSpec((Cp, OCl), lambda bi, pi: (0, 0)),          # W_conv (BN2 folded)
                pl.BlockSpec((1, OCl), lambda bi, pi: (0, 0)),           # bn2 shift
            ],
            out_specs=pl.BlockSpec((1, TP, OCl), lambda bi, pi: (bi, pi, 0)),
        ),
        compiler_params=cparams,
    )(patches, rfa_rows, BkCa, Wf, b1p, Wc, b2p)

    out = out[:, :, :out_c].astype(jnp.float32).reshape(b, h, w, out_c)
    return jnp.transpose(out, (0, 3, 1, 2))                            # back to NCHW


# --------------------------------------------------------- pure-JAX reference ---
def rfcbam_reference(x, params, kernel_size, stride=1):
    b, c, H, W = x.shape
    k = kernel_size
    kk = k * k
    pd = k // 2
    s = stride

    # SE channel attention
    gap = x.mean(axis=(2, 3))
    y = jnp.maximum(gap @ params["se_w1"].T, 0.0)
    ca = jax.nn.sigmoid(y @ params["se_w2"].T)[:, :, None, None]       # (b, c, 1, 1)

    # generate: depthwise conv (channel multiplier kk) + BN + ReLU
    feat = lax.conv_general_dilated(x, params["w2"], (s, s), [(pd, pd), (pd, pd)],
                                    dimension_numbers=("NCHW", "OIHW", "NCHW"),
                                    feature_group_count=c)
    s1, b1 = _bn_fold(params["bn1"])
    feat = jnp.maximum(feat * s1[None, :, None, None] + b1[None, :, None, None], 0.0)
    h, w = feat.shape[2:]

    # rearrange 'b c (n1 n2) h w -> b c (h n1) (w n2)'
    g = feat.reshape(b, c, k, k, h, w).transpose(0, 1, 4, 2, 5, 3).reshape(b, c, h * k, w * k)
    unfold = g * ca
    mx = g.max(axis=1, keepdims=True)
    mn = g.mean(axis=1, keepdims=True)
    rfa = jax.nn.sigmoid(lax.conv_general_dilated(
        jnp.concatenate([mx, mn], axis=1), params["gw_w"], (1, 1), [(1, 1), (1, 1)],
        dimension_numbers=("NCHW", "OIHW", "NCHW")))
    conv_data = unfold * rfa

    out = lax.conv_general_dilated(conv_data, params["conv_w"], (k, k), "VALID",
                                   dimension_numbers=("NCHW", "OIHW", "NCHW"))
    s2, b2 = _bn_fold(params["bn2"])
    out = out * s2[None, :, None, None] + b2[None, :, None, None]
    return out * jax.nn.sigmoid(out)


# -------------------------------------------------------------------- main ---
if __name__ == "__main__":
    B, C_IN, C_OUT, H, W, K, S = 2, 4, 8, 16, 16, 3, 1
    KK = K * K
    RATIO = 16

    key = jax.random.PRNGKey(0)
    ks = jax.random.split(key, 16)
    # Deterministic synthetic parameters (inference-mode BatchNorm: running stats folded).
    params = {
        "w2": jax.random.normal(ks[0], (C_IN * KK, 1, K, K), jnp.float32) * 0.3,
        "bn1": {
            "gamma": 1.0 + 0.1 * jax.random.normal(ks[1], (C_IN * KK,), jnp.float32),
            "beta": 0.1 * jax.random.normal(ks[2], (C_IN * KK,), jnp.float32),
            "mean": 0.1 * jax.random.normal(ks[3], (C_IN * KK,), jnp.float32),
            "var": jax.random.uniform(ks[4], (C_IN * KK,), jnp.float32, 0.5, 1.5),
        },
        "gw_w": jax.random.normal(ks[5], (1, 2, 3, 3), jnp.float32) * 0.3,
        "se_w1": jax.random.normal(ks[6], (RATIO, C_IN), jnp.float32) * 0.3,
        "se_w2": jax.random.normal(ks[7], (C_IN, RATIO), jnp.float32) * 0.3,
        "conv_w": jax.random.normal(ks[8], (C_OUT, C_IN, K, K), jnp.float32) * 0.2,
        "bn2": {
            "gamma": 1.0 + 0.1 * jax.random.normal(ks[9], (C_OUT,), jnp.float32),
            "beta": 0.1 * jax.random.normal(ks[10], (C_OUT,), jnp.float32),
            "mean": 0.1 * jax.random.normal(ks[11], (C_OUT,), jnp.float32),
            "var": jax.random.uniform(ks[12], (C_OUT,), jnp.float32, 0.5, 1.5),
        },
    }
    x = jax.random.normal(ks[13], (B, C_IN, H, W), jnp.float32)

    fwd = jax.jit(functools.partial(rfcbam_forward, kernel_size=K, stride=S))
    out = fwd(x, params)
    jax.block_until_ready(out)

    ref = rfcbam_reference(x, params, K, S)
    assert out.shape == ref.shape, (out.shape, ref.shape)
    err = float(jnp.max(jnp.abs(out - ref)))
    scale = float(jnp.max(jnp.abs(ref)))
    assert err <= 3e-2 * max(scale, 1.0), f"max abs error too large: {err} (ref scale {scale})"
    print("KERNEL_OK")
</pallas_src>

<mosaic_0001>
module attributes {stable_mosaic.version = 11 : i64} {
  func.func @_stats_kernel(%arg0: i32, %arg1: i32, %arg2: memref<1x256x128xbf16, #tpu.memory_space<vmem>>, %arg3: memref<128x128xbf16, #tpu.memory_space<vmem>>, %arg4: memref<1x128xf32, #tpu.memory_space<vmem>>, %arg5: memref<1x256x18xbf16, #tpu.memory_space<vmem>>) attributes {dimension_semantics = [#tpu.dimension_semantics<parallel>, #tpu.dimension_semantics<parallel>], iteration_bounds = array<i64: 2, 1>, scalar_prefetch = 0 : i64, scratch_operands = 0 : i64, tpu.core_type = #tpu.core_type<tc>, window_params = [{transform_indices = @transform_0, window_bounds = array<i64: 1, 256, 128>}, {pipeline_mode = #tpu.pipeline_mode<synchronous>, transform_indices = @transform_1, window_bounds = array<i64: 128, 128>}, {pipeline_mode = #tpu.pipeline_mode<synchronous>, transform_indices = @transform_2, window_bounds = array<i64: 1, 128>}, {transform_indices = @transform_3, window_bounds = array<i64: 1, 256, 18>}]} {
    %c0 = arith.constant 0 : index
    %c0_0 = arith.constant 0 : index
    %c0_1 = arith.constant 0 : index
    %0 = vector.load %arg2[%c0, %c0_0, %c0_1] : memref<1x256x128xbf16, #tpu.memory_space<vmem>>, vector<1x256x128xbf16>
    %1 = vector.shape_cast %0 : vector<1x256x128xbf16> to vector<256x128xbf16>
    %c0_2 = arith.constant 0 : index
    %c0_3 = arith.constant 0 : index
    %2 = vector.load %arg3[%c0_2, %c0_3] : memref<128x128xbf16, #tpu.memory_space<vmem>>, vector<128x128xbf16>
    %cst = arith.constant dense<0.000000e+00> : vector<256x128xf32>
    %3 = tpu.matmul %1, %2, %cst {dimension_numbers = #tpu.dot_dimension_numbers<[1], [0], [0], [1], [0, 0, 1, 1], [], []>} : vector<256x128xbf16>, vector<128x128xbf16>, vector<256x128xf32> -> vector<256x128xf32>
    %c0_4 = arith.constant 0 : index
    %c0_5 = arith.constant 0 : index
    %4 = vector.load %arg4[%c0_4, %c0_5] : memref<1x128xf32, #tpu.memory_space<vmem>>, vector<1x128xf32>
    %5 = vector.broadcast %4 : vector<1x128xf32> to vector<256x128xf32>
    %6 = arith.addf %3, %5 : vector<256x128xf32>
    %cst_6 = arith.constant 0.000000e+00 : f32
    %7 = vector.broadcast %cst_6 : f32 to vector<256x128xf32>
    %8 = arith.maximumf %6, %7 : vector<256x128xf32>
    %c119_i32 = arith.constant 119 : i32
    %9 = tpu.dynamic_rotate %8 by %c119_i32 dim 1 : vector<256x128xf32>, i32 -> vector<256x128xf32>
    %10 = arith.maximumf %8, %9 : vector<256x128xf32>
    %c119_i32_7 = arith.constant 119 : i32
    %11 = tpu.dynamic_rotate %8 by %c119_i32_7 dim 1 : vector<256x128xf32>, i32 -> vector<256x128xf32>
    %12 = arith.addf %8, %11 : vector<256x128xf32>
    %c110_i32 = arith.constant 110 : i32
    %13 = tpu.dynamic_rotate %10 by %c110_i32 dim 1 : vector<256x128xf32>, i32 -> vector<256x128xf32>
    %14 = arith.maximumf %10, %13 : vector<256x128xf32>
    %c110_i32_8 = arith.constant 110 : i32
    %15 = tpu.dynamic_rotate %12 by %c110_i32_8 dim 1 : vector<256x128xf32>, i32 -> vector<256x128xf32>
    %16 = arith.addf %12, %15 : vector<256x128xf32>
    %17 = vector.extract_strided_slice %14 {offsets = [0, 0], sizes = [256, 9], strides = [1, 1]} : vector<256x128xf32> to vector<256x9xf32>
    %18 = vector.extract_strided_slice %16 {offsets = [0, 0], sizes = [256, 9], strides = [1, 1]} : vector<256x128xf32> to vector<256x9xf32>
    %cst_9 = arith.constant 2.500000e-01 : f32
    %19 = vector.broadcast %cst_9 : f32 to vector<256x9xf32>
    %20 = arith.mulf %18, %19 : vector<256x9xf32>
    %21 = tpu.concatenate %17, %20 in 1 : vector<256x9xf32>, vector<256x9xf32> -> vector<256x18xf32>
    %22 = arith.truncf %21 : vector<256x18xf32> to vector<256x18xbf16>
    %c0_10 = arith.constant 0 : index
    %c0_11 = arith.constant 0 : index
    %c0_12 = arith.constant 0 : index
    %23 = vector.load %arg5[%c0_10, %c0_11, %c0_12] : memref<1x256x18xbf16, #tpu.memory_space<vmem>>, vector<1x256x18xbf16>
    %24 = vector.shape_cast %23 : vector<1x256x18xbf16> to vector<256x18xbf16>
    %25 = vector.shape_cast %22 : vector<256x18xbf16> to vector<1x256x18xbf16>
    tpu.vector_store %arg5[%c0_10, %c0_11, %c0_12], %25 {strides = array<i32>} : memref<1x256x18xbf16, #tpu.memory_space<vmem>>, vector<1x256x18xbf16>,
    return
  }
  func.func @transform_0(%arg0: i32, %arg1: i32) -> (i32, i32, i32) {
    %c0_i32 = arith.constant 0 : i32
    %c0_i32_0 = arith.constant 0 : i32
    return %arg0, %arg1, %c0_i32 : i32, i32, i32
  }
  func.func @transform_1(%arg0: i32, %arg1: i32) -> (i32, i32) {
    %c0_i32 = arith.constant 0 : i32
    %c0_i32_0 = arith.constant 0 : i32
    %c0_i32_1 = arith.constant 0 : i32
    return %c0_i32, %c0_i32_0 : i32, i32
  }
  func.func @transform_2(%arg0: i32, %arg1: i32) -> (i32, i32) {
    %c0_i32 = arith.constant 0 : i32
    %c0_i32_0 = arith.constant 0 : i32
    %c0_i32_1 = arith.constant 0 : i32
    return %c0_i32, %c0_i32_0 : i32, i32
  }
  func.func @transform_3(%arg0: i32, %arg1: i32) -> (i32, i32, i32) {
    %c0_i32 = arith.constant 0 : i32
    %c0_i32_0 = arith.constant 0 : i32
    return %arg0, %arg1, %c0_i32 : i32, i32, i32
  }
}

module attributes {stable_mosaic.version = 11 : i64} {
  func.func @_rfcbam_kernel(%arg0: i32, %arg1: i32, %arg2: memref<1x256x128xbf16, #tpu.memory_space<vmem>>, %arg3: memref<1x256x9xbf16, #tpu.memory_space<vmem>>, %arg4: memref<1x9x128xbf16, #tpu.memory_space<vmem>>, %arg5: memref<128x128xbf16, #tpu.memory_space<vmem>>, %arg6: memref<1x128xf32, #tpu.memory_space<vmem>>, %arg7: memref<128x8xbf16, #tpu.memory_space<vmem>>, %arg8: memref<1x8xf32, #tpu.memory_space<vmem>>, %arg9: memref<1x256x8xbf16, #tpu.memory_space<vmem>>) attributes {dimension_semantics = [#tpu.dimension_semantics<parallel>, #tpu.dimension_semantics<parallel>], iteration_bounds = array<i64: 2, 1>, scalar_prefetch = 0 : i64, scratch_operands = 0 : i64, tpu.core_type = #tpu.core_type<tc>, window_params = [{transform_indices = @transform_0, window_bounds = array<i64: 1, 256, 128>}, {transform_indices = @transform_1, window_bounds = array<i64: 1, 256, 9>}, {transform_indices = @transform_2, window_bounds = array<i64: 1, 9, 128>}, {pipeline_mode = #tpu.pipeline_mode<synchronous>, transform_indices = @transform_3, window_bounds = array<i64: 128, 128>}, {pipeline_mode = #tpu.pipeline_mode<synchronous>, transform_indices = @transform_4, window_bounds = array<i64: 1, 128>}, {pipeline_mode = #tpu.pipeline_mode<synchronous>, transform_indices = @transform_5, window_bounds = array<i64: 128, 8>}, {pipeline_mode = #tpu.pipeline_mode<synchronous>, transform_indices = @transform_6, window_bounds = array<i64: 1, 8>}, {transform_indices = @transform_7, window_bounds = array<i64: 1, 256, 8>}]} {
    %c0 = arith.constant 0 : index
    %c0_0 = arith.constant 0 : index
    %c0_1 = arith.constant 0 : index
    %0 = vector.load %arg2[%c0, %c0_0, %c0_1] : memref<1x256x128xbf16, #tpu.memory_space<vmem>>, vector<1x256x128xbf16>
    %1 = vector.shape_cast %0 : vector<1x256x128xbf16> to vector<256x128xbf16>
    %c0_2 = arith.constant 0 : index
    %c0_3 = arith.constant 0 : index
    %2 = vector.load %arg5[%c0_2, %c0_3] : memref<128x128xbf16, #tpu.memory_space<vmem>>, vector<128x128xbf16>
    %cst = arith.constant dense<0.000000e+00> : vector<256x128xf32>
    %3 = tpu.matmul %1, %2, %cst {dimension_numbers = #tpu.dot_dimension_numbers<[1], [0], [0], [1], [0, 0, 1, 1], [], []>} : vector<256x128xbf16>, vector<128x128xbf16>, vector<256x128xf32> -> vector<256x128xf32>
    %c0_4 = arith.constant 0 : index
    %c0_5 = arith.constant 0 : index
    %4 = vector.load %arg6[%c0_4, %c0_5] : memref<1x128xf32, #tpu.memory_space<vmem>>, vector<1x128xf32>
    %5 = vector.broadcast %4 : vector<1x128xf32> to vector<256x128xf32>
    %6 = arith.addf %3, %5 : vector<256x128xf32>
    %cst_6 = arith.constant 0.000000e+00 : f32
    %7 = vector.broadcast %cst_6 : f32 to vector<256x128xf32>
    %8 = arith.maximumf %6, %7 : vector<256x128xf32>
    %c0_7 = arith.constant 0 : index
    %c0_8 = arith.constant 0 : index
    %c0_9 = arith.constant 0 : index
    %9 = vector.load %arg3[%c0_7, %c0_8, %c0_9] : memref<1x256x9xbf16, #tpu.memory_space<vmem>>, vector<1x256x9xbf16>
    %10 = vector.shape_cast %9 : vector<1x256x9xbf16> to vector<256x9xbf16>
    %c0_10 = arith.constant 0 : index
    %c0_11 = arith.constant 0 : index
    %c0_12 = arith.constant 0 : index
    %11 = vector.load %arg4[%c0_10, %c0_11, %c0_12] : memref<1x9x128xbf16, #tpu.memory_space<vmem>>, vector<1x9x128xbf16>
    %12 = vector.shape_cast %11 : vector<1x9x128xbf16> to vector<9x128xbf16>
    %cst_13 = arith.constant dense<0.000000e+00> : vector<256x128xf32>
    %13 = tpu.matmul %10, %12, %cst_13 {dimension_numbers = #tpu.dot_dimension_numbers<[1], [0], [0], [1], [0, 0, 1, 1], [], []>} : vector<256x9xbf16>, vector<9x128xbf16>, vector<256x128xf32> -> vector<256x128xf32>
    %14 = arith.mulf %8, %13 : vector<256x128xf32>
    %15 = arith.truncf %14 : vector<256x128xf32> to vector<256x128xbf16>
    %c0_14 = arith.constant 0 : index
    %c0_15 = arith.constant 0 : index
    %16 = vector.load %arg7[%c0_14, %c0_15] : memref<128x8xbf16, #tpu.memory_space<vmem>>, vector<128x8xbf16>
    %cst_16 = arith.constant dense<0.000000e+00> : vector<256x8xf32>
    %17 = tpu.matmul %15, %16, %cst_16 {dimension_numbers = #tpu.dot_dimension_numbers<[1], [0], [0], [1], [0, 0, 1, 1], [], []>} : vector<256x128xbf16>, vector<128x8xbf16>, vector<256x8xf32> -> vector<256x8xf32>
    %c0_17 = arith.constant 0 : index
    %c0_18 = arith.constant 0 : index
    %18 = vector.load %arg8[%c0_17, %c0_18] : memref<1x8xf32, #tpu.memory_space<vmem>>, vector<1x8xf32>
    %19 = vector.broadcast %18 : vector<1x8xf32> to vector<256x8xf32>
    %20 = arith.addf %17, %19 : vector<256x8xf32>
    %21 = arith.negf %20 : vector<256x8xf32>
    %22 = math.exp %21 : vector<256x8xf32>
    %cst_19 = arith.constant 1.000000e+00 : f32
    %23 = vector.broadcast %cst_19 : f32 to vector<256x8xf32>
    %24 = arith.addf %23, %22 : vector<256x8xf32>
    %25 = arith.divf %23, %24 : vector<256x8xf32>
    %26 = arith.mulf %20, %25 : vector<256x8xf32>
    %27 = arith.truncf %26 : vector<256x8xf32> to vector<256x8xbf16>
    %c0_20 = arith.constant 0 : index
    %c0_21 = arith.constant 0 : index
    %c0_22 = arith.constant 0 : index
    %28 = vector.load %arg9[%c0_20, %c0_21, %c0_22] : memref<1x256x8xbf16, #tpu.memory_space<vmem>>, vector<1x256x8xbf16>
    %29 = vector.shape_cast %28 : vector<1x256x8xbf16> to vector<256x8xbf16>
    %30 = vector.shape_cast %27 : vector<256x8xbf16> to vector<1x256x8xbf16>
    tpu.vector_store %arg9[%c0_20, %c0_21, %c0_22], %30 {strides = array<i32>} : memref<1x256x8xbf16, #tpu.memory_space<vmem>>, vector<1x256x8xbf16>,
    return
  }
  func.func @transform_0(%arg0: i32, %arg1: i32) -> (i32, i32, i32) {
    %c0_i32 = arith.constant 0 : i32
    %c0_i32_0 = arith.constant 0 : i32
    return %arg0, %arg1, %c0_i32 : i32, i32, i32
  }
  func.func @transform_1(%arg0: i32, %arg1: i32) -> (i32, i32, i32) {
    %c0_i32 = arith.constant 0 : i32
    %c0_i32_0 = arith.constant 0 : i32
    return %arg0, %arg1, %c0_i32 : i32, i32, i32
  }
  func.func @transform_2(%arg0: i32, %arg1: i32) -> (i32, i32, i32) {
    %c0_i32 = arith.constant 0 : i32
    %c0_i32_0 = arith.constant 0 : i32
    %c0_i32_1 = arith.constant 0 : i32
    return %arg0, %c0_i32, %c0_i32_0 : i32, i32, i32
  }
  func.func @transform_3(%arg0: i32, %arg1: i32) -> (i32, i32) {
    %c0_i32 = arith.constant 0 : i32
    %c0_i32_0 = arith.constant 0 : i32
    %c0_i32_1 = arith.constant 0 : i32
    return %c0_i32, %c0_i32_0 : i32, i32
  }
  func.func @transform_4(%arg0: i32, %arg1: i32) -> (i32, i32) {
    %c0_i32 = arith.constant 0 : i32
    %c0_i32_0 = arith.constant 0 : i32
    %c0_i32_1 = arith.constant 0 : i32
    return %c0_i32, %c0_i32_0 : i32, i32
  }
  func.func @transform_5(%arg0: i32, %arg1: i32) -> (i32, i32) {
    %c0_i32 = arith.constant 0 : i32
    %c0_i32_0 = arith.constant 0 : i32
    %c0_i32_1 = arith.constant 0 : i32
    return %c0_i32, %c0_i32_0 : i32, i32
  }
  func.func @transform_6(%arg0: i32, %arg1: i32) -> (i32, i32) {
    %c0_i32 = arith.constant 0 : i32
    %c0_i32_0 = arith.constant 0 : i32
    %c0_i32_1 = arith.constant 0 : i32
    return %c0_i32, %c0_i32_0 : i32, i32
  }
  func.func @transform_7(%arg0: i32, %arg1: i32) -> (i32, i32, i32) {
    %c0_i32 = arith.constant 0 : i32
    %c0_i32_0 = arith.constant 0 : i32
    return %arg0, %arg1, %c0_i32 : i32, i32, i32
  }
}

</mosaic_0001>

<bundles_post_ra>
// kernel: rfcbam_forward.2
= control target key start
LH: loop header
LB: loop body
LE: loop exit
PB: predicated region body
PF: predicated region fallthrough
CT: control target
= control target key end

     0   :  { %8 = vsyncpa [#allocation3], 0  ;;  %s3095_s0 = inlined_call_operand.hbm [shape: bf16[2,256,128], index: 0, kind: input, shape index: {}]   ;;  %s3096_s1 = inlined_call_operand.hbm [shape: bf16[128,128], index: 1, kind: input, shape index: {}]   ;;  %s3097_s2 = inlined_call_operand.hbm [shape: f32[1,128], index: 2, kind: input, shape index: {}]   ;;  %s3098_s3 = inlined_call_operand.hbm [shape: bf16[2,256,18], index: 3, kind: output, shape index: {}]  }
   0x1   :  { %10 = vsyncpa [#allocation3 + $0x1], 0 }
   0x2   :  { %11 = vsyncpa [#allocation6], 0 }
   0x3   :  { %12 = vsyncpa [#allocation4], 0 }
   0x4   :  { %14 = vsyncpa [#allocation4 + $0x1], 0  ;;  %s2102_s12 = smov 0   ;;  %s2104_s13 = smov 0  }
   0x5   :  { %s2106_s14 = smov 0   ;;  %s2108_s15 = smov 0  }
   0x6   :  { %s2110_s16 = smov 0   ;;  %s2112_s17 = smov 0  }
   0x7 LB: > { %s1425_s18 = sadd.s32 4294967295, %s2069_s17   ;;  %s1426_s19 = sadd.s32 4294967294, %s2069_s17   ;;  %s2069_s17 = sphi %s2112_s17, %s20_s17   ;;  %s2065_s16 = sphi %s2110_s16, %s3180_s16   ;;  %s2061_s15 = sphi %s2108_s15, %s3179_s15   ;;  %s2057_s14 = sphi %s2106_s14, %s3178_s14   ;;  %s2053_s13 = sphi %s2104_s13, %s3177_s13   ;;  %s2049_s12 = sphi %s2102_s12, %s3176_s12  }
   0x8   : > { %p54_p0 = scmp.ne.s32.totalorder %s2053_s13, %s2049_s12  ;;  %p2136_p1 = scmp.eq.s32.totalorder %s1425_s18, 0 }
   0x9   : > { %p2140_p2 = scmp.eq.s32.totalorder %s1425_s18, 1  ;;  %p128_p3 = scmp.eq.s32.totalorder %s1426_s19, 1 }
   0xa   : > { %s3123_s20 = scalar_select %p2136_p1, 1, 0 }
   0xb   : > { %p2146_p4 = por %p2136_p1, %p54_p0  ;;  %p1427_p5 = scmp.ge.s32.totalorder %s2069_s17, 1 }
   0xc   : > { %p2151_p6 = por %p128_p3, %p54_p0  ;;  %p135_p7 = scmp.lt.s32.totalorder %s2069_s17, 3 }
   0xd   : > { %s3125_s22 = scalar_select %p2146_p4, 1, 0 }
   0xe   : > { %s3126_s23 = scalar_select %p2151_p6, 1, 0 }
   0xf   : > { %p2156_p8 = pnand %p1427_p5, %p135_p7  ;;  %s2071_s25 = smov [#allocation5]  }
  0x10   : > { %s147_s26 = sshll.u32 %s2071_s25, 4  ;;  %s2072_s28 = smov [#allocation7]   ;;  %s2160_s26 = int_to_ptr.vmem [resolvable:$true] %s147_s26 }
  0x11   : > { %p1635_p9 = pneg %p2156_p8  ;;  %s161_s29 = sshll.u32 %s2072_s28, 4  ;;  %s2171_s29 = int_to_ptr.vmem [resolvable:$true] %s161_s29 }
  0x12   : > { %s1897_s5 = scalar_lea.hbm %s3096_s1, 1024 }
  0x13   : > { %p2167_p11 = pnand %p1635_p9, %p2136_p1  ;;  %p1898_p12 = scmp.ne.s32.totalorder %s3096_s1, %s1897_s5 }
  0x14   : > { %p1904_p5 = scmp.lt.u32.totalorder %s1897_s5, %s3096_s1 }
  0x15   : > { %p1899_p13 = pneg %p2167_p11 }
  0x17   : > { %p1900_p0 = pnand %p1899_p13, %p1898_p12 }
  0x19   : > { %p1901_p3 = pneg %p1900_p0 }
  0x1b   : > { %p1906_p7 = pnand %p1904_p5, %p1901_p3 }
  0x1d   : > { %1909 = shalt.err (!%p1906_p7)
}
  0x1e   : > { %s1910_s10 = scalar_lea.vmem %s2160_s26, 1024  ;;  %p1918_p1 = scmp.lt.s32.totalorder %s2160_s26, %s2160_s26 }
  0x1f   : > { %p1911_p9 = scmp.ne.s32.totalorder %s2160_s26, %s1910_s10  ;;  %p1919_p12 = scmp.lt.s32.totalorder %s1910_s10, %s1910_s10 }
  0x21   : > { %p1913_p10 = pnand %p1911_p9, %p1899_p13  ;;  %p1920_p0 = por %p1919_p12, %p1918_p1 }
  0x23   : > { %p1914_p6 = pneg %p1913_p10 }
  0x25   : > { %p1921_p4 = pnand %p1920_p0, %p1914_p6 }
  0x27   : > { %1924 = shalt.err (!%p1921_p4)
}
  0x28   : > { %s2073_s11 = smov 64   ;;  %s2074_s18 = smov 4  }
  0x29   : > { %1638 = dma.hbm_to_vmem [thread:$0]  (!%p2167_p11), %s3096_s1, 1024, %s2160_s26, [#allocation6], %s2073_s11, %s2073_s11, %s2074_s18  }
  0x2a   : > { %s1925_s4 = scalar_lea.hbm %s3097_s2, 16 }
  0x2b   : > { %p1926_p1 = scmp.ne.s32.totalorder %s3097_s2, %s1925_s4  ;;  %p1932_p10 = scmp.lt.u32.totalorder %s1925_s4, %s3097_s2 }
  0x2d   : > { %p1928_p4 = pnand %p1926_p1, %p1899_p13 }
  0x2f   : > { %p1929_p6 = pneg %p1928_p4 }
  0x31   : > { %p1934_p3 = pnand %p1932_p10, %p1929_p6 }
  0x33   : > { %1937 = shalt.err (!%p1934_p3)
}
  0x34   : > { %s1938_s26 = scalar_lea.vmem %s2171_s29, 16  ;;  %s1945_s9 = scalar_lea.vmem %s2171_s29, 32 }
  0x35   : > { %p1939_p5 = scmp.ne.s32.totalorder %s2171_s29, %s1938_s26  ;;  %p1946_p12 = scmp.lt.s32.totalorder %s2171_s29, %s2171_s29 }
  0x36   : > { %p1947_p0 = scmp.lt.s32.totalorder %s1945_s9, %s1938_s26 }
  0x37   : > { %p1941_p7 = pnand %p1939_p5, %p1899_p13 }
  0x38   : > { %p1948_p1 = por %p1947_p0, %p1946_p12 }
  0x39   : > { %p1942_p9 = pneg %p1941_p7 }
  0x3b   : > { %p1949_p4 = pnand %p1948_p1, %p1942_p9 }
  0x3d   : > { %1952 = shalt.err (!%p1949_p4)
}
  0x3e   : > { %1641 = dma.hbm_to_vmem [thread:$0]  (!%p2167_p11), %s3097_s2, 16, %s2171_s29, [#allocation6]  }
  0x3f   : > { %s32_s25 = sadd.s32 1, %s2065_s16  ;;  %s41_s28 = sadd.s32 1, %s2057_s14 }
  0x40   : > { %p34_p13 = scmp.ge.s32.totalorder %s32_s25, 2  ;;  %p48_p6 = scmp.ne.s32.totalorder %s2057_s14, %s2053_s13 }
  0x41   : > { %p49_p10 = scmp.eq.s32.totalorder %s2069_s17, 0  ;;  %p1652_p3 = scmp.lt.s32.totalorder %s2069_s17, 2 }
  0x42   : > { %s3182_s25 = smov (%p34_p13, %s32_s25), 0  ;;  %p2239_p7 = por %p2140_p2, %p48_p6 }
  0x43   : > { %p50_p5 = por %p49_p10, %p48_p6  ;;  %s36_s30 = ssub.s32 %s2065_s16, %s3182_s25 }
  0x44   : > { %s3129_s27 = scalar_select %p2239_p7, 1, 0 }
  0x45   : > { %s172_s4 = sand.u32 1, %s2057_s14   ;;  %p39_p9 = scmp.eq.s32.totalorder %s36_s30, 0 }
  0x46   : > { %s1431_s29 = sshll.u32 %s172_s4, 7  ;;  %s1501_s5 = sshll.u32 %s2065_s16, 11 }
  0x47   : > { %s2248_s6 = scalar_select %p39_p9, %s2057_s14, %s41_s28  }
  0x48   : > { %s2253_s26 = scalar_lea.hbm %s3095_s0, %s1501_s5  ;;  %s176_s21 = scalar_lea.vmem [#allocation2], %s1431_s29 }
  0x49   : > { %s185_s9 = sshll.u32 %s176_s21, 4  ;;  %p2257_p2 = pnand %p1652_p3, %p50_p5  ;;  %s2261_s9 = int_to_ptr.vmem [resolvable:$true] %s185_s9 }
  0x4a   : > { %s2263_s19 = scalar_lea.sflag [#allocation3], %s172_s4  ;;  %s1953_s28 = scalar_lea.hbm %s2253_s26, 2048 }
  0x4b   : > { %p1954_p11 = scmp.ne.s32.totalorder %s2253_s26, %s1953_s28  ;;  %p1955_p12 = pneg %p2257_p2 }
  0x4c   : > { %s1958_s5 = scalar_lea.hbm %s3095_s0, 4096  ;;  %p1959_p4 = scmp.lt.u32.totalorder %s2253_s26, %s3095_s0 }
  0x4d   : > { %p1956_p0 = pnand %p1955_p12, %p1954_p11  ;;  %p1960_p13 = scmp.lt.u32.totalorder %s1958_s5, %s1953_s28 }
  0x4e   : > { %p1962_p10 = scmp.lt.u32.totalorder %s1953_s28, %s2253_s26 }
  0x4f   : > { %p1957_p1 = pneg %p1956_p0  ;;  %p1961_p6 = por %p1960_p13, %p1959_p4 }
  0x51   : > { %p1963_p3 = por %p1962_p10, %p1961_p6 }
  0x53   : > { %p1964_p5 = pnand %p1963_p3, %p1957_p1 }
  0x55   : > { %1967 = shalt.err (!%p1964_p5)
}
  0x56   : > { %s1968_s4 = scalar_lea.vmem %s2261_s9, 2048  ;;  %s2075_s21 = smov [#allocation2]  }
  0x57   : > { %p1969_p9 = scmp.ne.s32.totalorder %s2261_s9, %s1968_s4  ;;  %s1973_s30 = sshll.u32 %s2075_s21, 4  ;;  %s1974_s30 = int_to_ptr.vmem [resolvable:$false] %s1973_s30 }
  0x58   : > { %s1975_s29 = scalar_lea.vmem %s1974_s30, 4096  ;;  %p1976_p7 = scmp.lt.s32.totalorder %s2261_s9, %s1974_s30 }
  0x59   : > { %p1971_p11 = pnand %p1969_p9, %p1955_p12  ;;  %p1977_p4 = scmp.lt.s32.totalorder %s1975_s29, %s1968_s4 }
  0x5b   : > { %p1972_p0 = pneg %p1971_p11  ;;  %p1978_p13 = por %p1977_p4, %p1976_p7 }
  0x5d   : > { %p1979_p6 = pnand %p1978_p13, %p1972_p0 }
  0x5f   : > { %1982 = shalt.err (!%p1979_p6)
}
  0x60   : > { %1645 = dma.hbm_to_vmem [thread:$0]  (!%p2257_p2), %s2253_s26, 2048, %s2261_s9, %s2263_s19, %s2073_s11, %s2073_s11, %s2074_s18  }
  0x61   : > { %197 = sbr.rel (%p2156_p8) target bundleno = 831 (0x33f), region = 32 }
  0x68   : > { %s2297_s28 = sand.u32 1, %s2053_s13   ;;  %p3131_p7 = scmp.ne.s32.totalorder %s3125_s22, 0 }
  0x69   : > { %s1435_s5 = sshll.u32 %s2297_s28, 7  ;;  %s200_s7 = scalar_lea.sflag [#allocation3], %s2297_s28 }
  0x6a   : > { %s2303_s10 = scalar_lea.vmem [#allocation2], %s1435_s5 }
  0x6b   : > { %2036 = dma.done.wait (%p3131_p7), %s200_s7, 2048  }
  0x6c   : > { %2038 = vsyncadd (%p3131_p7), %s200_s7, 4294965248  ;;  %p3132_p2 = scmp.ne.s32.totalorder %s3123_s20, 0 }
  0x6e   : > { %2040 = dma.done.wait (%p3132_p2), [#allocation6], 1040  }
  0x6f   : > { %2042 = vsyncadd (%p3132_p2), [#allocation6], 4294966256  ;;  %v1873_v0 = vld [vmem:[#allocation5] sm:$0xff]   ;;  %v1874_v1 = vld [vmem:[#allocation5 + $0x8] sm:$0xff]   ;;  %s2076_s20 = smov 119   ;;  %s2077_s22 = smov 110  }
  0x70   : > { %1559 = vmatprep.subr.bf16.mxu0 %v1873_v0  ;;  %1607 = vmatprep.subr.bf16.mxu1 %v1873_v0  ;;  %v1875_v2 = vld [vmem:[#allocation5 + $0x10] sm:$0xff]   ;;  %v1876_v3 = vld [vmem:[#allocation5 + $0x18] sm:$0xff]   ;;  %v1881_v4 = vld [vmem:[%s2303_s10] sm:$0xff]   ;;  %s2078_s24 = smov 9   ;;  %vm1109_vm0 = vcmask 72704   ;;  %vm1270_vm1 = vcmask 142336  }
  0x71   : > { %1560 = vmatpush3.bf16.msra.mxu0 %v1873_v0  ;;  %1615 = vmatpush3.bf16.msra.mxu1 %v1873_v0  ;;  %v1882_v5 = vld [vmem:[%s2303_s10 + $0x40] sm:$0xff]   ;;  %v1878_v7 = vld [vmem:[#allocation5 + $0x28] sm:$0xff]   ;;  %v1879_v8 = vld [vmem:[#allocation5 + $0x30] sm:$0xff]   ;;  %s2889_s11 = scalar_lea.vmem [#allocation8], %s1435_s5  ;;  %s1534_s18 = sshll.u32 %s2061_s15, 11 }
  0x72   : > { %1561 = vmatprep.subr.bf16.mxu0 %v1874_v1  ;;  %1608 = vmatprep.subr.bf16.mxu1 %v1874_v1  ;;  %v1877_v6 = vld [vmem:[#allocation5 + $0x20] sm:$0xff]   ;;  %v1880_v9 = vld [vmem:[#allocation5 + $0x38] sm:$0xff]   ;;  %v1883_v10 = vld [vmem:[%s2303_s10 + $0x8] sm:$0xff]   ;;  %s1319_s26 = sshll.u32 %s2889_s11, 4  ;;  %s3040_s15 = scalar_lea.hbm %s3098_s3, %s1534_s18  ;;  %s3042_s26 = int_to_ptr.vmem [resolvable:$true] %s1319_s26 }
  0x73   : > { %1575 = vmatprep.mubr.bf16.mxu0 %v1881_v4  ;;  %1591 = vmatprep.mubr.bf16.mxu1 %v1882_v5  ;;  %v1884_v11 = vld [vmem:[%s2303_s10 + $0x48] sm:$0xff]   ;;  %v1885_v12 = vld [vmem:[%s2303_s10 + $0x10] sm:$0xff]   ;;  %v1886_v14 = vld [vmem:[%s2303_s10 + $0x18] sm:$0xff]   ;;  %s1304_s8 = scalar_lea.sflag [#allocation4], %s2297_s28  ;;  %s1983_s4 = scalar_lea.vmem %s3042_s26, 2048 }
  0x74   : > { %v1887_v13 = vld [vmem:[%s2303_s10 + $0x50] sm:$0xff]   ;;  %v1888_v15 = vld [vmem:[%s2303_s10 + $0x58] sm:$0xff]   ;;  %v1889_v16 = vld [vmem:[%s2303_s10 + $0x20] sm:$0xff]   ;;  %p1984_p8 = scmp.ne.s32.totalorder %s3042_s26, %s1983_s4  ;;  %p3173_p12 = scmp.ne.s32.totalorder %s3129_s27, 0 }
  0x75   : > { %1562 = vmatpush3.bf16.msra.mxu0 %v1874_v1  ;;  %1616 = vmatpush3.bf16.msra.mxu1 %v1874_v1  ;;  %v1891_v17 = vld [vmem:[%s2303_s10 + $0x60] sm:$0xff]   ;;  %v1890_v18 = vld [vmem:[%s2303_s10 + $0x28] sm:$0xff]   ;;  %v1893_v20 = vld [vmem:[%s2303_s10 + $0x30] sm:$0xff]   ;;  %s2079_s21 = smov [#allocation8]  }
  0x76   : > { %1563 = vmatprep.subr.bf16.mxu0 %v1875_v2  ;;  %1609 = vmatprep.subr.bf16.mxu1 %v1875_v2  ;;  %v1892_v19 = vld [vmem:[%s2303_s10 + $0x68] sm:$0xff]   ;;  %v1895_v21 = vld [vmem:[%s2303_s10 + $0x70] sm:$0xff]   ;;  %v1894_v22 = vld [vmem:[%s2303_s10 + $0x38] sm:$0xff]   ;;  %p1985_p1 = pnand %p1984_p8, %p3173_p12  ;;  %s1987_s30 = sshll.u32 %s2079_s21, 4  ;;  %s1988_s30 = int_to_ptr.vmem [resolvable:$false] %s1987_s30 }
  0x77   : > { %v1896_v23 = vld [vmem:[%s2303_s10 + $0x78] sm:$0xff]   ;;  %v2329_v24 = vld [vmem:[#allocation7] ss:$0 sm:$0xff]  ;;  %s1989_s29 = scalar_lea.vmem %s1988_s30, 4096  ;;  %p1990_p3 = scmp.lt.s32.totalorder %s3042_s26, %s1988_s30 }
  0x78   : > { %p1986_p10 = pneg %p1985_p1  ;;  %p1991_p5 = scmp.lt.s32.totalorder %s1989_s29, %s1983_s4 }
  0x79   : > { %1564 = vmatpush3.bf16.msra.mxu0 %v1875_v2  ;;  %1617 = vmatpush3.bf16.msra.mxu1 %v1875_v2 }
  0x7a   : > { %1565 = vmatprep.subr.bf16.mxu0 %v1876_v3  ;;  %1610 = vmatprep.subr.bf16.mxu1 %v1876_v3  ;;  %p1992_p9 = por %p1991_p5, %p1990_p3 }
  0x7c   : > { %p1993_p11 = pnand %p1992_p9, %p1986_p10 }
  0x7d   : > { %1566 = vmatpush3.bf16.msra.mxu0 %v1876_v3  ;;  %1618 = vmatpush3.bf16.msra.mxu1 %v1876_v3 }
  0x7e   : > { %1567 = vmatprep.subr.bf16.mxu0 %v1877_v6  ;;  %1611 = vmatprep.subr.bf16.mxu1 %v1877_v6 }
  0x81   : > { %1568 = vmatpush3.bf16.msra.mxu0 %v1877_v6  ;;  %1619 = vmatpush3.bf16.msra.mxu1 %v1877_v6 }
  0x82   : > { %1569 = vmatprep.subr.bf16.mxu0 %v1878_v7  ;;  %1612 = vmatprep.subr.bf16.mxu1 %v1878_v7 }
  0x85   : > { %1570 = vmatpush3.bf16.msra.mxu0 %v1878_v7  ;;  %1620 = vmatpush3.bf16.msra.mxu1 %v1878_v7 }
  0x86   : > { %1571 = vmatprep.subr.bf16.mxu0 %v1879_v8  ;;  %1613 = vmatprep.subr.bf16.mxu1 %v1879_v8 }
  0x89   : > { %1572 = vmatpush3.bf16.msra.mxu0 %v1879_v8  ;;  %1621 = vmatpush3.bf16.msra.mxu1 %v1879_v8 }
  0x8a   : > { %1573 = vmatprep.subr.bf16.mxu0 %v1880_v9  ;;  %1614 = vmatprep.subr.bf16.mxu1 %v1880_v9 }
  0x8d   : > { %1574 = vmatpush3.bf16.msra.mxu0 %v1880_v9  ;;  %1622 = vmatpush3.bf16.msra.mxu1 %v1880_v9 }
  0x90   : > { %1576 = vmatmul.mubr.bf16.vlgmr.msra.gmra.mrb[0].mxu0 %v1883_v10  ;;  %1592 = vmatmul.mubr.bf16.vlgmr.msra.gmra.mrb[0].mxu1 %v1884_v11 }
  0x91   : > { %1579 = vmatprep.mubr.bf16.mxu0 %v1885_v12  ;;  %1595 = vmatprep.mubr.bf16.mxu1 %v1887_v13 }
  0x98   : > { %1580 = vmatmul.mubr.bf16.gmra.mrb[4].mxu0 %v1886_v14  ;;  %1596 = vmatmul.mubr.bf16.gmra.mrb[4].mxu1 %v1888_v15 }
  0x99   : > { %1583 = vmatprep.mubr.bf16.mxu0 %v1889_v16  ;;  %1599 = vmatprep.mubr.bf16.mxu1 %v1891_v17 }
  0xa0   : > { %1584 = vmatmul.mubr.bf16.gmra.mrb[8].mxu0 %v1890_v18  ;;  %1600 = vmatmul.mubr.bf16.gmra.mrb[8].mxu1 %v1892_v19 }
  0xa1   : > { %1587 = vmatprep.mubr.bf16.mxu0 %v1893_v20  ;;  %1603 = vmatprep.mubr.bf16.mxu1 %v1895_v21 }
  0xa8   : > { %1588 = vmatmul.mubr.bf16.gmra.mrb[12].mxu0 %v1894_v22  ;;  %1604 = vmatmul.mubr.bf16.gmra.mrb[12].mxu1 %v1896_v23 }
 0x163   : > { %v1577_v25 = vpop.f32.mrb[0].mxu0  ;;  %v1593_v26 = vpop.f32.mrb[0].mxu1 }
 0x164   : > { %v479_v27 = vadd.f32 %v1577_v25, %v2329_v24  ;;  %v543_v28 = vadd.f32 %v1593_v26, %v2329_v24  ;;  %v470_v29 = vpop.f32.mrb[1].mxu0  ;;  %v534_v30 = vpop.f32.mrb[1].mxu1 }
 0x165   : > { %v1578_v31 = vpop.f32.mrb[2].mxu0  ;;  %v1594_v32 = vpop.f32.mrb[2].mxu1  ;;  %v471_v35 = vadd.f32 %v2329_v24, %v470_v29  ;;  %v535_v41 = vadd.f32 %v2329_v24, %v534_v30 }
 0x166   : > { %v2333_v33 = vmax.f32 %v479_v27, 0.0  ;;  %v2335_v34 = vmax.f32 %v543_v28, 0.0  ;;  %v482_v36 = vadd.f32 %v1578_v31, %v2329_v24  ;;  %v473_v37 = vpop.f32.mrb[3].mxu0  ;;  %v537_v38 = vpop.f32.mrb[3].mxu1  ;;  %v546_v42 = vadd.f32 %v1594_v32, %v2329_v24 }
 0x167   : > { %v2343_v39 = vmax.f32 %v471_v35, 0.0  ;;  %v474_v49 = vadd.f32 %v2329_v24, %v473_v37  ;;  %v2354_v50 = vmax.f32 %v535_v41, 0.0  ;;  %v538_v52 = vadd.f32 %v2329_v24, %v537_v38 }
 0x168   : > { %665 = vrot.lane.b32.xlu0 %v2335_v34, %s2076_s20  ;;  %633 = vrot.lane.b32.xlu1 %v2333_v33, %s2076_s20  ;;  %v2345_v40 = vmax.f32 %v482_v36, 0.0  ;;  %v2356_v51 = vmax.f32 %v546_v42, 0.0 }
 0x169   : > { %v2365_v57 = vmax.f32 %v474_v49, 0.0  ;;  %v2367_v58 = vmax.f32 %v538_v52, 0.0 }
 0x16b   : > { %v1581_v43 = vpop.f32.mrb[4].mxu0  ;;  %v1597_v44 = vpop.f32.mrb[4].mxu1 }
 0x16c   : > { %635 = vrot.lane.b32.xlu1 %v2345_v40, %s2076_s20  ;;  %629 = vrot.lane.b32.xlu0 %v2343_v39, %s2076_s20  ;;  %v486_v45 = vpop.f32.mrb[5].mxu0  ;;  %v550_v46 = vpop.f32.mrb[5].mxu1  ;;  %v495_v55 = vadd.f32 %v1581_v43, %v2329_v24  ;;  %v559_v63 = vadd.f32 %v1597_v44, %v2329_v24 }
 0x16d   : > { %v1582_v47 = vpop.f32.mrb[6].mxu0  ;;  %v1598_v48 = vpop.f32.mrb[6].mxu1  ;;  %v487_v7 = vadd.f32 %v2329_v24, %v486_v45  ;;  %v551_v14 = vadd.f32 %v2329_v24, %v550_v46 }
 0x16e   : > { %v489_v53 = vpop.f32.mrb[7].mxu0  ;;  %v553_v54 = vpop.f32.mrb[7].mxu1  ;;  %v498_v56 = vadd.f32 %v1582_v47, %v2329_v24  ;;  %v2369_v61 = vmax.f32 %v495_v55, 0.0  ;;  %v562_v0 = vadd.f32 %v1598_v48, %v2329_v24  ;;  %v2380_v8 = vmax.f32 %v559_v63, 0.0 }
 0x16f   : > { %v490_v10 = vadd.f32 %v2329_v24, %v489_v53  ;;  %v2389_v13 = vmax.f32 %v487_v7, 0.0  ;;  %v554_v16 = vadd.f32 %v2329_v24, %v553_v54  ;;  %v2399_v23 = vmax.f32 %v551_v14, 0.0 }
 0x170   : > { %667 = vrot.lane.b32.xlu1 %v2356_v51, %s2076_s20  ;;  %661 = vrot.lane.b32.xlu0 %v2354_v50, %s2076_s20  ;;  %v2371_v62 = vmax.f32 %v498_v56, 0.0  ;;  %v2382_v9 = vmax.f32 %v562_v0, 0.0 }
 0x171   : > { %v2392_v15 = vmax.f32 %v490_v10, 0.0  ;;  %v2401_v25 = vmax.f32 %v554_v16, 0.0 }
 0x173   : > { %v1585_v59 = vpop.f32.mrb[8].mxu0  ;;  %v1601_v60 = vpop.f32.mrb[8].mxu1 }
 0x174   : > { %663 = vrot.lane.b32.xlu1 %v2367_v58, %s2076_s20  ;;  %631 = vrot.lane.b32.xlu0 %v2365_v57, %s2076_s20  ;;  %v502_v1 = vpop.f32.mrb[9].mxu0  ;;  %v566_v2 = vpop.f32.mrb[9].mxu1  ;;  %v511_v26 = vadd.f32 %v1585_v59, %v2329_v24  ;;  %v575_v30 = vadd.f32 %v1601_v60, %v2329_v24 }
 0x175   : > { %v1586_v3 = vpop.f32.mrb[10].mxu0  ;;  %v1602_v4 = vpop.f32.mrb[10].mxu1  ;;  %v503_v32 = vadd.f32 %v2329_v24, %v502_v1  ;;  %v567_v41 = vadd.f32 %v2329_v24, %v566_v2 }
 0x176   : > { %v505_v5 = vpop.f32.mrb[11].mxu0  ;;  %v569_v6 = vpop.f32.mrb[11].mxu1  ;;  %v514_v27 = vadd.f32 %v1586_v3, %v2329_v24  ;;  %v2409_v28 = vmax.f32 %v511_v26, 0.0  ;;  %v578_v31 = vadd.f32 %v1602_v4, %v2329_v24  ;;  %v2420_v35 = vmax.f32 %v575_v30, 0.0 }
 0x177   : > { %v506_v37 = vadd.f32 %v2329_v24, %v505_v5  ;;  %v2429_v38 = vmax.f32 %v503_v32, 0.0  ;;  %v570_v43 = vadd.f32 %v2329_v24, %v569_v6  ;;  %v2439_v44 = vmax.f32 %v567_v41, 0.0 }
 0x178   : > { %643 = vrot.lane.b32.xlu1 %v2371_v62, %s2076_s20  ;;  %641 = vrot.lane.b32.xlu0 %v2369_v61, %s2076_s20  ;;  %v2411_v29 = vmax.f32 %v514_v27, 0.0  ;;  %v2422_v36 = vmax.f32 %v578_v31, 0.0 }
 0x179   : > { %v2432_v42 = vmax.f32 %v506_v37, 0.0  ;;  %v2441_v45 = vmax.f32 %v570_v43, 0.0 }
 0x17b   : > { %v1589_v11 = vpop.f32.mrb[12].mxu0  ;;  %v1605_v12 = vpop.f32.mrb[12].mxu1 }
 0x17c   : > { %675 = vrot.lane.b32.xlu1 %v2382_v9, %s2076_s20  ;;  %673 = vrot.lane.b32.xlu0 %v2380_v8, %s2076_s20  ;;  %v518_v17 = vpop.f32.mrb[13].mxu0  ;;  %v582_v18 = vpop.f32.mrb[13].mxu1  ;;  %v527_v46 = vadd.f32 %v1589_v11, %v2329_v24  ;;  %v591_v52 = vadd.f32 %v1605_v12, %v2329_v24 }
 0x17d   : > { %v1590_v19 = vpop.f32.mrb[14].mxu0  ;;  %v1606_v20 = vpop.f32.mrb[14].mxu1  ;;  %v519_v54 = vadd.f32 %v2329_v24, %v518_v17  ;;  %v583_v63 = vadd.f32 %v2329_v24, %v582_v18 }
 0x17e   : > { %v521_v21 = vpop.f32.mrb[15].mxu0  ;;  %v585_v22 = vpop.f32.mrb[15].mxu1  ;;  %v530_v47 = vadd.f32 %v1590_v19, %v2329_v24  ;;  %v2449_v48 = vmax.f32 %v527_v46, 0.0  ;;  %v594_v53 = vadd.f32 %v1606_v20, %v2329_v24  ;;  %v2460_v55 = vmax.f32 %v591_v52, 0.0 }
 0x17f   : > { %v522_v59 = vadd.f32 %v2329_v24, %v521_v21  ;;  %v2469_v60 = vmax.f32 %v519_v54, 0.0  ;;  %v586_v1 = vadd.f32 %v2329_v24, %v585_v22  ;;  %v2479_v2 = vmax.f32 %v583_v63, 0.0 }
 0x180   : > { %639 = vrot.lane.b32.xlu1 %v2392_v15, %s2076_s20  ;;  %637 = vrot.lane.b32.xlu0 %v2389_v13, %s2076_s20  ;;  %v2451_v49 = vmax.f32 %v530_v47, 0.0  ;;  %v2462_v56 = vmax.f32 %v594_v53, 0.0 }
 0x181   : > { %v2472_v0 = vmax.f32 %v522_v59, 0.0  ;;  %v2481_v3 = vmax.f32 %v586_v1, 0.0 }
 0x184   : > { %671 = vrot.lane.b32.xlu1 %v2401_v25, %s2076_s20  ;;  %669 = vrot.lane.b32.xlu0 %v2399_v23, %s2076_s20 }
 0x188   : > { %651 = vrot.lane.b32.xlu1 %v2411_v29, %s2076_s20  ;;  %649 = vrot.lane.b32.xlu0 %v2409_v28, %s2076_s20 }
 0x18c   : > { %683 = vrot.lane.b32.xlu1 %v2422_v36, %s2076_s20  ;;  %681 = vrot.lane.b32.xlu0 %v2420_v35, %s2076_s20 }
 0x190   : > { %647 = vrot.lane.b32.xlu1 %v2432_v42, %s2076_s20  ;;  %645 = vrot.lane.b32.xlu0 %v2429_v38, %s2076_s20 }
 0x194   : > { %679 = vrot.lane.b32.xlu1 %v2441_v45, %s2076_s20  ;;  %677 = vrot.lane.b32.xlu0 %v2439_v44, %s2076_s20 }
 0x198   : > { %659 = vrot.lane.b32.xlu1 %v2451_v49, %s2076_s20  ;;  %657 = vrot.lane.b32.xlu0 %v2449_v48, %s2076_s20 }
 0x19c   : > { %691 = vrot.lane.b32.xlu1 %v2462_v56, %s2076_s20  ;;  %689 = vrot.lane.b32.xlu0 %v2460_v55, %s2076_s20 }
 0x1a0   : > { %655 = vrot.lane.b32.xlu1 %v2472_v0, %s2076_s20  ;;  %653 = vrot.lane.b32.xlu0 %v2469_v60, %s2076_s20 }
 0x1a4   : > { %687 = vrot.lane.b32.xlu1 %v2481_v3, %s2076_s20  ;;  %685 = vrot.lane.b32.xlu0 %v2479_v2, %s2076_s20 }
 0x1da   : > { %v666_v4 = vpop.permute.xlu0 %665  ;;  %v634_v5 = vpop.permute.xlu1 %633 }
 0x1db   : > { %v2492_v24 = vadd.f32 %v634_v5, %v2333_v33  ;;  %v2497_v10 = vadd.f32 %v666_v4, %v2335_v34  ;;  %v2500_v11 = vmax.f32 %v2333_v33, %v634_v5  ;;  %v2510_v18 = vmax.f32 %v2335_v34, %v666_v4 }
 0x1dd   : > { %857 = vrot.lane.b32.xlu0 %v2492_v24, %s2077_s22 }
 0x1de   : > { %v636_v6 = vpop.permute.xlu1 %635  ;;  %v630_v7 = vpop.permute.xlu0 %629 }
 0x1df   : > { %v2503_v12 = vmax.f32 %v2345_v40, %v636_v6  ;;  %v2513_v19 = vadd.f32 %v630_v7, %v2343_v39  ;;  %v2531_v27 = vadd.f32 %v636_v6, %v2345_v40  ;;  %v2534_v30 = vmax.f32 %v2343_v39, %v630_v7 }
 0x1e1   : > { %v1713_v14 = vpack.i.bf16 %v2503_v12, %v2500_v11  ;;  %889 = vrot.lane.b32.xlu0 %v2497_v10, %s2077_s22 }
 0x1e2   : > { %v668_v16 = vpop.permute.xlu1 %667  ;;  %v662_v17 = vpop.permute.xlu0 %661 }
 0x1e3   : > { %v2516_v33 = vmax.f32 %v2356_v51, %v668_v16  ;;  %1714 = vrot.lane.b32.xlu1 %v1713_v14, %s2077_s22  ;;  %v2524_v22 = vadd.f32 %v662_v17, %v2354_v50  ;;  %v2546_v41 = vadd.f32 %v668_v16, %v2356_v51  ;;  %v2549_v40 = vmax.f32 %v2354_v50, %v662_v17 }
 0x1e5   : > { %v1718_v20 = vpack.i.bf16 %v2516_v33, %v2510_v18  ;;  %853 = vrot.lane.b32.xlu0 %v2513_v19, %s2077_s22 }
 0x1e6   : > { %v632_v21 = vpop.permute.xlu0 %631  ;;  %v664_v26 = vpop.permute.xlu1 %663 }
 0x1e7   : > { %v2527_v34 = vmax.f32 %v2365_v57, %v632_v21  ;;  %1719 = vrot.lane.b32.xlu1 %v1718_v20, %s2077_s22  ;;  %v2539_v32 = vmax.f32 %v2367_v58, %v664_v26  ;;  %v2557_v47 = vadd.f32 %v632_v21, %v2365_v57  ;;  %v2566_v53 = vadd.f32 %v664_v26, %v2367_v58 }
 0x1e9   : > { %885 = vrot.lane.b32.xlu0 %v2524_v22, %s2077_s22  ;;  %v1723_v37 = vpack.i.bf16 %v2527_v34, %v2534_v30  ;;  %v1728_v46 = vpack.i.bf16 %v2539_v32, %v2549_v40 }
 0x1ea   : > { %v642_v31 = vpop.permute.xlu0 %641  ;;  %v644_v39 = vpop.permute.xlu1 %643 }
 0x1eb   : > { %859 = vrot.lane.b32.xlu1 %v2531_v27, %s2077_s22  ;;  %v2561_v52 = vadd.f32 %v642_v31, %v2369_v61  ;;  %v2569_v54 = vmax.f32 %v2371_v62, %v644_v39  ;;  %v2572_v59 = vmax.f32 %v2369_v61, %v642_v31  ;;  %v2610_v20 = vadd.f32 %v644_v39, %v2371_v62 }
 0x1ed   : > { %1724 = vrot.lane.b32.xlu0 %v1723_v37, %s2077_s22  ;;  %v1733_v58 = vpack.i.bf16 %v2569_v54, %v2572_v59 }
 0x1ee   : > { %v674_v43 = vpop.permute.xlu0 %673  ;;  %v676_v50 = vpop.permute.xlu1 %675 }
 0x1ef   : > { %891 = vrot.lane.b32.xlu1 %v2546_v41, %s2077_s22  ;;  %v2577_v57 = vadd.f32 %v674_v43, %v2380_v8  ;;  %v2584_v1 = vmax.f32 %v2382_v9, %v676_v50  ;;  %v2587_v4 = vmax.f32 %v2380_v8, %v674_v43  ;;  %v2625_v37 = vadd.f32 %v676_v50, %v2382_v9 }
 0x1f1   : > { %1729 = vrot.lane.b32.xlu0 %v1728_v46, %s2077_s22  ;;  %v1738_v6 = vpack.i.bf16 %v2584_v1, %v2587_v4 }
 0x1f2   : > { %v638_v51 = vpop.permute.xlu0 %637  ;;  %v640_v61 = vpop.permute.xlu1 %639 }
 0x1f3   : > { %855 = vrot.lane.b32.xlu1 %v2557_v47, %s2077_s22  ;;  %v2592_v5 = vadd.f32 %v638_v51, %v2389_v13  ;;  %v2600_v14 = vmax.f32 %v2392_v15, %v640_v61  ;;  %v2603_v8 = vmax.f32 %v2389_v13, %v638_v51  ;;  %v2633_v43 = vadd.f32 %v640_v61, %v2392_v15 }
 0x1f5   : > { %865 = vrot.lane.b32.xlu0 %v2561_v52, %s2077_s22  ;;  %3133 = vst [vmem:[#allocation12_spill] sm:$0xff] %v2600_v14  ;;  %3134 = vst [vmem:[#allocation13_spill] sm:$0xff] %v2603_v8  ;;  %v1743_v21 = vpack.i.bf16 %v2600_v14, %v2603_v8 }
 0x1f6   : > { %v670_v63 = vpop.permute.xlu0 %669  ;;  %v672_v17 = vpop.permute.xlu1 %671 }
 0x1f7   : > { %887 = vrot.lane.b32.xlu1 %v2566_v53, %s2077_s22  ;;  %v2606_v16 = vadd.f32 %v670_v63, %v2399_v23  ;;  %v2617_v26 = vmax.f32 %v2401_v25, %v672_v17  ;;  %v2620_v13 = vmax.f32 %v2399_v23, %v670_v63  ;;  %v2642_v51 = vadd.f32 %v672_v17, %v2401_v25 }
 0x1f9   : > { %897 = vrot.lane.b32.xlu0 %v2577_v57, %s2077_s22  ;;  %3135 = vst [vmem:[#allocation14_spill] sm:$0xff] %v2617_v26  ;;  %3136 = vst [vmem:[#allocation15_spill] sm:$0xff] %v2620_v13  ;;  %v1748_v39 = vpack.i.bf16 %v2617_v26, %v2620_v13 }
 0x1fa   : > { %v650_v7 = vpop.permute.xlu0 %649  ;;  %v652_v62 = vpop.permute.xlu1 %651 }
 0x1fb   : > { %1734 = vrot.lane.b32.xlu1 %v1733_v58, %s2077_s22  ;;  %v2637_v46 = vadd.f32 %v650_v7, %v2409_v28  ;;  %v2645_v50 = vmax.f32 %v2411_v29, %v652_v62  ;;  %v2648_v63 = vmax.f32 %v2409_v28, %v650_v7 }
 0x1fd   : > { %861 = vrot.lane.b32.xlu0 %v2592_v5, %s2077_s22  ;;  %3137 = vst [vmem:[#allocation16_spill] sm:$0xff] %v2645_v50  ;;  %3138 = vst [vmem:[#allocation17_spill] sm:$0xff] %v2648_v63  ;;  %v1753_v25 = vpack.i.bf16 %v2645_v50, %v2648_v63 }
 0x1fe   : > { %v682_v31 = vpop.permute.xlu0 %681  ;;  %v684_v9 = vpop.permute.xlu1 %683 }
 0x1ff   : > { %1739 = vrot.lane.b32.xlu1 %v1738_v6, %s2077_s22  ;;  %v2653_v15 = vadd.f32 %v682_v31, %v2420_v35  ;;  %v2660_v61 = vmax.f32 %v2422_v36, %v684_v9  ;;  %v2663_v6 = vmax.f32 %v2420_v35, %v682_v31 }
 0x201   : > { %893 = vrot.lane.b32.xlu0 %v2606_v16, %s2077_s22  ;;  %3139 = vst [vmem:[#allocation18_spill] sm:$0xff] %v2660_v61  ;;  %3140 = vst [vmem:[#allocation19_spill] sm:$0xff] %v2663_v6  ;;  %v1758_v17 = vpack.i.bf16 %v2660_v61, %v2663_v6 }
 0x202   : > { %v646_v23 = vpop.permute.xlu0 %645  ;;  %v648_v28 = vpop.permute.xlu1 %647 }
 0x203   : > { %867 = vrot.lane.b32.xlu1 %v2610_v20, %s2077_s22  ;;  %v2668_v7 = vadd.f32 %v646_v23, %v2429_v38  ;;  %v2679_v35 = vmax.f32 %v2429_v38, %v646_v23 }
 0x205   : > { %1744 = vrot.lane.b32.xlu0 %v1743_v21, %s2077_s22  ;;  %3142 = vst [vmem:[#allocation21_spill] sm:$0xff] %v2679_v35 }
 0x206   : > { %v678_v58 = vpop.permute.xlu0 %677  ;;  %v680_v63 = vpop.permute.xlu1 %679 }
 0x207   : > { %899 = vrot.lane.b32.xlu1 %v2625_v37, %s2077_s22  ;;  %v2682_v31 = vadd.f32 %v678_v58, %v2439_v44  ;;  %v2693_v61 = vmax.f32 %v2441_v45, %v680_v63  ;;  %v2696_v38 = vmax.f32 %v2439_v44, %v678_v58 }
 0x209   : > { %1749 = vrot.lane.b32.xlu0 %v1748_v39, %s2077_s22  ;;  %v2676_v39 = vmax.f32 %v2432_v42, %v648_v28  ;;  %3143 = vst [vmem:[#allocation22_spill] sm:$0xff] %v2693_v61  ;;  %3144 = vst [vmem:[#allocation23_spill] sm:$0xff] %v2696_v38 }
 0x20a   : > { %v658_v21 = vpop.permute.xlu0 %657 }
 0x20b   : > { %863 = vrot.lane.b32.xlu1 %v2633_v43, %s2077_s22  ;;  %3141 = vst [vmem:[#allocation20_spill] sm:$0xff] %v2676_v39  ;;  %v1763_v6 = vpack.i.bf16 %v2676_v39, %v2679_v35  ;;  %v2709_v35 = vadd.f32 %v648_v28, %v2432_v42  ;;  %v2713_v58 = vadd.f32 %v658_v21, %v2449_v48 }
 0x20d   : > { %873 = vrot.lane.b32.xlu0 %v2637_v46, %s2077_s22 }
 0x20e   : > { %v690_v23 = vpop.permute.xlu0 %689 }
 0x20f   : > { %895 = vrot.lane.b32.xlu1 %v2642_v51, %s2077_s22 }
 0x211   : > { %905 = vrot.lane.b32.xlu0 %v2653_v15, %s2077_s22 }
 0x212   : > { %v654_v44 = vpop.permute.xlu0 %653 }
 0x213   : > { %1754 = vrot.lane.b32.xlu1 %v1753_v25, %s2077_s22  ;;  %v2686_v25 = vadd.f32 %v652_v62, %v2411_v29  ;;  %v660_v29 = vpop.permute.xlu1 %659  ;;  %v1768_v62 = vpack.i.bf16 %v2693_v61, %v2696_v38  ;;  %v2724_v38 = vmax.f32 %v2449_v48, %v658_v21  ;;  %v2729_v42 = vadd.f32 %v654_v44, %v2469_v60 }
 0x214   : > { %v2758_v39 = vmax.f32 %v2469_v60, %v654_v44 }
 0x215   : > { %869 = vrot.lane.b32.xlu0 %v2668_v7, %s2077_s22  ;;  %3146 = vst [vmem:[#allocation25_spill] sm:$0xff] %v2724_v38 }
 0x216   : > { %v686_v28 = vpop.permute.xlu0 %685  ;;  %3150 = vst [vmem:[#allocation29_spill] sm:$0xff] %v2758_v39 }
 0x217   : > { %1759 = vrot.lane.b32.xlu1 %v1758_v17, %s2077_s22  ;;  %v2701_v17 = vadd.f32 %v684_v9, %v2422_v36  ;;  %v692_v36 = vpop.permute.xlu1 %691  ;;  %v2718_v9 = vadd.f32 %v680_v63, %v2441_v45  ;;  %v2744_v21 = vadd.f32 %v686_v28, %v2479_v2 }
 0x218   : > { %v2736_v63 = vmax.f32 %v2462_v56, %v692_v36 }
 0x219   : > { %901 = vrot.lane.b32.xlu0 %v2682_v31, %s2077_s22 }
 0x21a   : > { %3147 = vst [vmem:[#allocation26_spill] sm:$0xff] %v2736_v63 }
 0x21b   : > { %875 = vrot.lane.b32.xlu1 %v2686_v25, %s2077_s22  ;;  %v656_v48 = vpop.permute.xlu1 %655 }
 0x21c   : > { %v2777_v60 = vadd.f32 %v656_v48, %v2472_v0 }
 0x21d   : > { %1764 = vrot.lane.b32.xlu0 %v1763_v6, %s2077_s22  ;;  %v2721_v6 = vmax.f32 %v2451_v49, %v660_v29 }
 0x21f   : > { %907 = vrot.lane.b32.xlu1 %v2701_v17, %s2077_s22  ;;  %3145 = vst [vmem:[#allocation24_spill] sm:$0xff] %v2721_v6  ;;  %v1773_v45 = vpack.i.bf16 %v2721_v6, %v2724_v38  ;;  %v2752_v38 = vadd.f32 %v690_v23, %v2460_v55  ;;  %v2755_v6 = vmax.f32 %v2472_v0, %v656_v48  ;;  %v688_v50 = vpop.permute.xlu1 %687 }
 0x221   : > { %1769 = vrot.lane.b32.xlu0 %v1768_v62, %s2077_s22  ;;  %v2739_v62 = vmax.f32 %v2460_v55, %v690_v23  ;;  %3149 = vst [vmem:[#allocation28_spill] sm:$0xff] %v2755_v6  ;;  %v2769_v55 = vmax.f32 %v2481_v3, %v688_v50  ;;  %v2772_v23 = vmax.f32 %v2479_v2, %v686_v28 }
 0x222   : > { %v2791_v2 = vadd.f32 %v692_v36, %v2462_v56 }
 0x223   : > { %871 = vrot.lane.b32.xlu1 %v2709_v35, %s2077_s22  ;;  %3148 = vst [vmem:[#allocation27_spill] sm:$0xff] %v2739_v62  ;;  %v1778_v61 = vpack.i.bf16 %v2736_v63, %v2739_v62  ;;  %v1783_v62 = vpack.i.bf16 %v2755_v6, %v2758_v39  ;;  %3151 = vst [vmem:[#allocation30_spill] sm:$0xff] %v2769_v55 }
 0x224   : > { %3152 = vst [vmem:[#allocation31_spill] sm:$0xff] %v2772_v23 }
 0x225   : > { %881 = vrot.lane.b32.xlu0 %v2713_v58, %s2077_s22 }
 0x227   : > { %903 = vrot.lane.b32.xlu1 %v2718_v9, %s2077_s22 }
 0x229   : > { %877 = vrot.lane.b32.xlu0 %v2729_v42, %s2077_s22 }
 0x22b   : > { %1774 = vrot.lane.b32.xlu1 %v1773_v45, %s2077_s22  ;;  %v2762_v45 = vadd.f32 %v660_v29, %v2451_v49  ;;  %v1788_v49 = vpack.i.bf16 %v2769_v55, %v2772_v23 }
 0x22d   : > { %909 = vrot.lane.b32.xlu0 %v2744_v21, %s2077_s22 }
 0x22f   : > { %1779 = vrot.lane.b32.xlu1 %v1778_v61, %s2077_s22  ;;  %v2785_v61 = vadd.f32 %v688_v50, %v2481_v3 }
 0x231   : > { %913 = vrot.lane.b32.xlu0 %v2752_v38, %s2077_s22 }
 0x233   : > { %883 = vrot.lane.b32.xlu1 %v2762_v45, %s2077_s22 }
 0x235   : > { %1784 = vrot.lane.b32.xlu0 %v1783_v62, %s2077_s22 }
 0x237   : > { %879 = vrot.lane.b32.xlu1 %v2777_v60, %s2077_s22 }
 0x239   : > { %1789 = vrot.lane.b32.xlu0 %v1788_v49, %s2077_s22 }
 0x23b   : > { %911 = vrot.lane.b32.xlu1 %v2785_v61, %s2077_s22 }
 0x23f   : > { %915 = vrot.lane.b32.xlu1 %v2791_v2, %s2077_s22 }
 0x24f   : > { %v858_v0 = vpop.permute.xlu0 %857 }
 0x250   : > { %v919_v50 = vadd.f32 %v858_v0, %v2492_v24 }
 0x252   : > { %v951_v56 = vmul.f32 0.25, %v919_v50 }
 0x253   : > { %v890_v29 = vpop.permute.xlu0 %889 }
 0x254   : > { %v935_v36 = vadd.f32 %v890_v29, %v2497_v10 }
 0x255   : > { %v2795_v44 = vpop.permute.xlu1 %1714 }
 0x256   : > { %v967_v26 = vmul.f32 0.25, %v935_v36 }
 0x257   : > { %v854_v28 = vpop.permute.xlu0 %853 }
 0x258   : > { %v917_v8 = vadd.f32 %v854_v28, %v2513_v19 }
 0x259   : > { %v2797_v62 = vpop.permute.xlu1 %1719 }
 0x25a   : > { %v949_v10 = vmul.f32 0.25, %v917_v8 }
 0x25b   : > { %v886_v3 = vpop.permute.xlu0 %885 }
 0x25c   : > { %v933_v29 = vadd.f32 %v886_v3, %v2524_v22 }
 0x25d   : > { %v860_v48 = vpop.permute.xlu1 %859 }
 0x25e   : > { %v920_v49 = vadd.f32 %v860_v48, %v2531_v27 }
 0x25f   : > { %v2801_v63 = vpop.permute.xlu0 %1724 }
 0x260   : > { %v952_v23 = vmul.f32 0.25, %v920_v49 }
 0x261   : > { %v892_v55 = vpop.permute.xlu1 %891 }
 0x262   : > { %v1793_v39 = vpack.i.bf16 %v952_v23, %v951_v56  ;;  %v936_v6 = vadd.f32 %v892_v55, %v2546_v41 }
 0x263   : > { %v2805_v13 = vpop.permute.xlu0 %1729 }
 0x264   : > { %v968_v14 = vmul.f32 0.25, %v936_v6  ;;  %1794 = vrot.lane.b32.xlu1 %v1793_v39, %s2078_s24  ;;  %v965_v6 = vmul.f32 0.25, %v933_v29 }
 0x265   : > { %v856_v24 = vpop.permute.xlu1 %855 }
 0x266   : > { %v1798_v27 = vpack.i.bf16 %v968_v14, %v967_v26  ;;  %v918_v0 = vadd.f32 %v856_v24, %v2557_v47 }
 0x267   : > { %v866_v50 = vpop.permute.xlu0 %865 }
 0x268   : > { %v950_v23 = vmul.f32 0.25, %v918_v0  ;;  %1799 = vrot.lane.b32.xlu1 %v1798_v27, %s2078_s24  ;;  %v923_v26 = vadd.f32 %v866_v50, %v2561_v52 }
 0x269   : > { %v888_v41 = vpop.permute.xlu1 %887 }
 0x26a   : > { %v1803_v55 = vpack.i.bf16 %v950_v23, %v949_v10  ;;  %v934_v48 = vadd.f32 %v888_v41, %v2566_v53  ;;  %v955_v56 = vmul.f32 0.25, %v923_v26 }
 0x26b   : > { %v898_v19 = vpop.permute.xlu0 %897 }
 0x26c   : > { %v966_v28 = vmul.f32 0.25, %v934_v48  ;;  %1804 = vrot.lane.b32.xlu0 %v1803_v55, %s2078_s24  ;;  %v939_v36 = vadd.f32 %v898_v19, %v2577_v57 }
 0x26d   : > { %v2814_v39 = vpop.permute.xlu1 %1734 }
 0x26e   : > { %v1808_v14 = vpack.i.bf16 %v966_v28, %v965_v6  ;;  %v971_v23 = vmul.f32 0.25, %v939_v36 }
 0x26f   : > { %v862_v47 = vpop.permute.xlu0 %861 }
 0x270   : > { %1809 = vrot.lane.b32.xlu0 %v1808_v14, %s2078_s24  ;;  %v921_v41 = vadd.f32 %v862_v47, %v2592_v5 }
 0x271   : > { %v2817_v8 = vpop.permute.xlu1 %1739 }
 0x272   : > { %v953_v6 = vmul.f32 0.25, %v921_v41 }
 0x273   : > { %v894_v22 = vpop.permute.xlu0 %893 }
 0x274   : > { %v937_v57 = vadd.f32 %v894_v22, %v2606_v16 }
 0x275   : > { %v868_v3 = vpop.permute.xlu1 %867 }
 0x276   : > { %v924_v49 = vadd.f32 %v868_v3, %v2610_v20  ;;  %v969_v5 = vmul.f32 0.25, %v937_v57 }
 0x277   : > { %v2821_v53 = vpop.permute.xlu0 %1744 }
 0x278   : > { %v956_v24 = vmul.f32 0.25, %v924_v49 }
 0x279   : > { %v900_v27 = vpop.permute.xlu1 %899 }
 0x27a   : > { %v1813_v0 = vpack.i.bf16 %v956_v24, %v955_v56  ;;  %v940_v10 = vadd.f32 %v900_v27, %v2625_v37 }
 0x27b   : > { %v2825_v29 = vpop.permute.xlu0 %1749 }
 0x27c   : > { %v972_v55 = vmul.f32 0.25, %v940_v10  ;;  %1814 = vrot.lane.b32.xlu1 %v1813_v0, %s2078_s24 }
 0x27d   : > { %v864_v52 = vpop.permute.xlu1 %863 }
 0x27e   : > { %v1818_v20 = vpack.i.bf16 %v972_v55, %v971_v23  ;;  %v922_v50 = vadd.f32 %v864_v52, %v2633_v43 }
 0x27f   : > { %v874_v48 = vpop.permute.xlu0 %873 }
 0x280   : > { %v954_v19 = vmul.f32 0.25, %v922_v50  ;;  %1819 = vrot.lane.b32.xlu1 %v1818_v20, %s2078_s24  ;;  %v927_v22 = vadd.f32 %v874_v48, %v2637_v46 }
 0x281   : > { %v896_v37 = vpop.permute.xlu1 %895 }
 0x282   : > { %v1823_v28 = vpack.i.bf16 %v954_v19, %v953_v6  ;;  %v938_v14 = vadd.f32 %v896_v37, %v2642_v51  ;;  %v959_v27 = vmul.f32 0.25, %v927_v22 }
 0x283   : > { %v906_v26 = vpop.permute.xlu0 %905 }
 0x284   : > { %v970_v47 = vmul.f32 0.25, %v938_v14  ;;  %1824 = vrot.lane.b32.xlu0 %v1823_v28, %s2078_s24  ;;  %v943_v0 = vadd.f32 %v906_v26, %v2653_v15 }
 0x285   : > { %v2834_v3 = vpop.permute.xlu1 %1754 }
 0x286   : > { %v1828_v49 = vpack.i.bf16 %v970_v47, %v969_v5  ;;  %v975_v52 = vmul.f32 0.25, %v943_v0 }
 0x287   : > { %v870_v43 = vpop.permute.xlu0 %869 }
 0x288   : > { %1829 = vrot.lane.b32.xlu0 %v1828_v49, %s2078_s24  ;;  %v925_v20 = vadd.f32 %v870_v43, %v2668_v7 }
 0x289   : > { %v2837_v56 = vpop.permute.xlu1 %1759 }
 0x28a   : > { %v957_v57 = vmul.f32 0.25, %v925_v20 }
 0x28b   : > { %v902_v16 = vpop.permute.xlu0 %901 }
 0x28c   : > { %v941_v15 = vadd.f32 %v902_v16, %v2682_v31 }
 0x28d   : > { %v876_v36 = vpop.permute.xlu1 %875 }
 0x28e   : > { %v928_v24 = vadd.f32 %v876_v36, %v2686_v25  ;;  %v973_v14 = vmul.f32 0.25, %v941_v15 }
 0x28f   : > { %v2841_v51 = vpop.permute.xlu0 %1764 }
 0x290   : > { %v960_v10 = vmul.f32 0.25, %v928_v24 }
 0x291   : > { %v908_v23 = vpop.permute.xlu1 %907 }
 0x292   : > { %v1833_v41 = vpack.i.bf16 %v960_v10, %v959_v27  ;;  %v944_v55 = vadd.f32 %v908_v23, %v2701_v17 }
 0x293   : > { %v2847_v46 = vpop.permute.xlu0 %1769 }
 0x294   : > { %v976_v50 = vmul.f32 0.25, %v944_v55  ;;  %1834 = vrot.lane.b32.xlu1 %v1833_v41, %s2078_s24 }
 0x295   : > { %v872_v48 = vpop.permute.xlu1 %871 }
 0x296   : > { %v1838_v25 = vpack.i.bf16 %v976_v50, %v975_v52  ;;  %v926_v6 = vadd.f32 %v872_v48, %v2709_v35 }
 0x297   : > { %v882_v7 = vpop.permute.xlu0 %881 }
 0x298   : > { %v958_v19 = vmul.f32 0.25, %v926_v6  ;;  %1839 = vrot.lane.b32.xlu1 %v1838_v25, %s2078_s24  ;;  %v931_v31 = vadd.f32 %v882_v7, %v2713_v58  ;;  %v1721_v7 = vunpack.i.l.bf16 %v2797_v62 }
 0x299   : > { %v904_v37 = vpop.permute.xlu1 %903 }
 0x29a   : > { %v1843_v17 = vpack.i.bf16 %v958_v19, %v957_v57  ;;  %v942_v28 = vadd.f32 %v904_v37, %v2718_v9  ;;  %v963_v9 = vmul.f32 0.25, %v931_v31  ;;  %v1717_v19 = vunpack.i.h.bf16 %v2795_v44 }
 0x29b   : > { %v878_v35 = vpop.permute.xlu0 %877 }
 0x29c   : > { %v974_v26 = vmul.f32 0.25, %v942_v28  ;;  %1844 = vrot.lane.b32.xlu0 %v1843_v17, %s2078_s24  ;;  %v929_v36 = vadd.f32 %v878_v35, %v2729_v42  ;;  %v1727_v35 = vunpack.i.h.bf16 %v2801_v63 }
 0x29d   : > { %v2854_v5 = vpop.permute.xlu1 %1774 }
 0x29e   : > { %v1848_v47 = vpack.i.bf16 %v974_v26, %v973_v14  ;;  %v961_v23 = vmul.f32 0.25, %v929_v36 }
 0x29f   : > { %v910_v22 = vpop.permute.xlu0 %909 }
 0x2a0   : > { %1849 = vrot.lane.b32.xlu0 %v1848_v47, %s2078_s24  ;;  %v945_v41 = vadd.f32 %v910_v22, %v2744_v21 }
 0x2a1   : > { %v2857_v49 = vpop.permute.xlu1 %1779 }
 0x2a2   : > { %v977_v50 = vmul.f32 0.25, %v945_v41  ;;  %v1731_v41 = vunpack.i.l.bf16 %v2805_v13 }
 0x2a3   : > { %v914_v52 = vpop.permute.xlu0 %913 }
 0x2a4   : > { %v947_v48 = vadd.f32 %v914_v52, %v2752_v38  ;;  %v824_v38 = vmax.f32 %v2503_v12, %v1717_v19  ;;  %v1726_v12 = vunpack.i.l.bf16 %v2801_v63 }
 0x2a5   : > { %v884_v43 = vpop.permute.xlu1 %883 }
 0x2a6   : > { %v932_v16 = vadd.f32 %v884_v43, %v2762_v45  ;;  %v979_v57 = vmul.f32 0.25, %v947_v48  ;;  %v837_v48 = vmax.f32 %v2549_v40, %v1731_v41  ;;  %v1736_v40 = vunpack.i.l.bf16 %v2814_v39 }
 0x2a7   : > { %v2873_v37 = vpop.permute.xlu0 %1784 }
 0x2a8   : > { %v964_v24 = vmul.f32 0.25, %v932_v16 }
 0x2a9   : > { %v880_v27 = vpop.permute.xlu1 %879 }
 0x2aa   : > { %v1853_v0 = vpack.i.bf16 %v964_v24, %v963_v9  ;;  %v930_v10 = vadd.f32 %v880_v27, %v2777_v60 }
 0x2ab   : > { %v2883_v31 = vpop.permute.xlu0 %1789 }
 0x2ac   : > { %v962_v55 = vmul.f32 0.25, %v930_v10  ;;  %1854 = vrot.lane.b32.xlu1 %v1853_v0, %s2078_s24 }
 0x2ad   : > { %v912_v58 = vpop.permute.xlu1 %911 }
 0x2ae   : > { %v1858_v20 = vpack.i.bf16 %v962_v55, %v961_v23  ;;  %v946_v45 = vadd.f32 %v912_v58, %v2785_v61  ;;  %v1716_v61 = vunpack.i.l.bf16 %v2795_v44  ;;  %v1732_v23 = vunpack.i.h.bf16 %v2805_v13 }
 0x2b0   : > { %v978_v42 = vmul.f32 0.25, %v946_v45  ;;  %1859 = vrot.lane.b32.xlu0 %v1858_v20, %s2078_s24  ;;  %v823_v17 = vmax.f32 %v2500_v11, %v1716_v61  ;;  %v1742_v61 = vunpack.i.h.bf16 %v2817_v8 }
 0x2b1   : > { %v916_v25 = vpop.permute.xlu1 %915 }
 0x2b2   : > { %v1863_v6 = vpack.i.bf16 %v978_v42, %v977_v50  ;;  %v948_v60 = vadd.f32 %v916_v25, %v2791_v2  ;;  %v1722_v2 = vunpack.i.h.bf16 %v2797_v62  ;;  %v839_v62 = vmax.f32 %v2510_v18, %v1721_v7 }
 0x2b3   : > { %v821_v18 = vmax.f32 %v2534_v30, %v1726_v12  ;;  %v838_v50 = vmax.f32 %v2539_v32, %v1732_v23  ;;  %v1737_v32 = vunpack.i.h.bf16 %v2814_v39  ;;  %v1746_v39 = vunpack.i.l.bf16 %v2821_v53  ;;  %v3155_v23 = vld [vmem:[#allocation14_spill] sm:$0xff] }
 0x2b4   : > { %v980_v21 = vmul.f32 0.25, %v948_v60  ;;  %1864 = vrot.lane.b32.xlu0 %v1863_v6, %s2078_s24  ;;  %v840_v22 = vmax.f32 %v2516_v33, %v1722_v2  ;;  %v822_v33 = vmax.f32 %v2527_v34, %v1727_v35 }
 0x2b6   : > { %v1868_v15 = vpack.i.bf16 %v980_v21, %v979_v57  ;;  %v828_v21 = vmax.f32 %v2569_v54, %v1737_v32  ;;  %v1761_v32 = vunpack.i.l.bf16 %v2837_v56 }
 0x2b8   : > { %1869 = vrot.lane.b32.xlu1 %v1868_v15, %s2078_s24  ;;  %v827_v15 = vmax.f32 %v2572_v59, %v1736_v40 }
 0x2d6   : > { %v1795_v28 = vpop.permute.xlu1 %1794 }
 0x2d7   : > { %v1797_v14 = vunpack.i.h.bf16 %v1795_v28  ;;  %v1796_v26 = vunpack.i.l.bf16 %v1795_v28 }
 0x2d9   : > { %v1113_v47 = vsel %vm1109_vm0, %v824_v38, %v1797_v14  ;;  %v1112_v44 = vsel %vm1109_vm0, %v823_v17, %v1796_v26  ;;  %v1741_v38 = vunpack.i.l.bf16 %v2817_v8  ;;  %v1747_v14 = vunpack.i.h.bf16 %v2821_v53  ;;  %v3153_v53 = vld [vmem:[#allocation12_spill] sm:$0xff] }
 0x2da   : > { %v1505_v11 = vpack.c.bf16 %v1113_v47, %v1113_v47  ;;  %v1504_v43 = vpack.c.bf16 %v1112_v44, %v1112_v44  ;;  %v1800_v16 = vpop.permute.xlu1 %1799  ;;  %v844_v47 = vmax.f32 %v2584_v1, %v1742_v61  ;;  %v1767_v61 = vunpack.i.h.bf16 %v2841_v51 }
 0x2db   : > { %v1802_v9 = vunpack.i.h.bf16 %v1800_v16  ;;  %v1801_v36 = vunpack.i.l.bf16 %v1800_v16  ;;  %v843_v44 = vmax.f32 %v2587_v4, %v1741_v38  ;;  %v3154_v16 = vld [vmem:[#allocation13_spill] sm:$0xff]  ;;  %v1752_v4 = vunpack.i.h.bf16 %v2825_v29 }
 0x2dc   : > { %1274 = vst.msk [vmem:[%s2889_s11 + $0xc] sm:$0xf] %vm1270_vm1, %v1505_v11  ;;  %1273 = vst.msk [vmem:[%s2889_s11 + $0x8] sm:$0xf] %vm1270_vm1, %v1504_v43  ;;  %v826_v43 = vmax.f32 %v3153_v53, %v1747_v14  ;;  %v3160_v14 = vld [vmem:[#allocation19_spill] sm:$0xff]  ;;  %v1772_v53 = vunpack.i.h.bf16 %v2847_v46 }
 0x2dd   : > { %v1129_v63 = vsel %vm1109_vm0, %v840_v22, %v1802_v9  ;;  %v1128_v24 = vsel %vm1109_vm0, %v839_v62, %v1801_v36  ;;  %v825_v22 = vmax.f32 %v3154_v16, %v1746_v39  ;;  %v1751_v36 = vunpack.i.l.bf16 %v2825_v29 }
 0x2de   : > { %v1521_v27 = vpack.c.bf16 %v1129_v63, %v1129_v63  ;;  %v1520_v0 = vpack.c.bf16 %v1128_v24, %v1128_v24  ;;  %v1805_v10 = vpop.permute.xlu0 %1804  ;;  %v842_v41 = vmax.f32 %v3155_v23, %v1752_v4  ;;  %v847_v39 = vmax.f32 %v3160_v14, %v1761_v32  ;;  %v3169_v14 = vld [vmem:[#allocation30_spill] sm:$0xff] }
 0x2df   : > { %v1807_v55 = vunpack.i.h.bf16 %v1805_v10  ;;  %v1806_v52 = vunpack.i.l.bf16 %v1805_v10 }
 0x2e0   : > { %1290 = vst.msk [vmem:[%s2889_s11 + $0x4c] sm:$0xf] %vm1270_vm1, %v1521_v27  ;;  %1289 = vst.msk [vmem:[%s2889_s11 + $0x48] sm:$0xf] %vm1270_vm1, %v1520_v0 }
 0x2e1   : > { %v1110_v34 = vsel %vm1109_vm0, %v821_v18, %v1806_v52  ;;  %v1111_v30 = vsel %vm1109_vm0, %v822_v33, %v1807_v55  ;;  %v3156_v55 = vld [vmem:[#allocation15_spill] sm:$0xff] }
 0x2e2   : > { %v1502_v58 = vpack.c.bf16 %v1110_v34, %v1110_v34  ;;  %v1503_v20 = vpack.c.bf16 %v1111_v30, %v1111_v30  ;;  %v1810_v45 = vpop.permute.xlu0 %1809  ;;  %v841_v52 = vmax.f32 %v3156_v55, %v1751_v36  ;;  %v1777_v55 = vunpack.i.h.bf16 %v2854_v5 }
 0x2e3   : > { %v1812_v13 = vunpack.i.h.bf16 %v1810_v45  ;;  %v1811_v42 = vunpack.i.l.bf16 %v1810_v45 }
 0x2e4   : > { %1271 = vst.msk [vmem:[%s2889_s11] sm:$0xf] %vm1270_vm1, %v1502_v58  ;;  %1272 = vst.msk [vmem:[%s2889_s11 + $0x4] sm:$0xf] %vm1270_vm1, %v1503_v20 }
 0x2e5   : > { %v1126_v25 = vsel %vm1109_vm0, %v837_v48, %v1811_v42  ;;  %v1127_v6 = vsel %vm1109_vm0, %v838_v50, %v1812_v13  ;;  %v1757_v50 = vunpack.i.h.bf16 %v2834_v3  ;;  %v1756_v48 = vunpack.i.l.bf16 %v2834_v3  ;;  %v3157_v13 = vld [vmem:[#allocation16_spill] sm:$0xff] }
 0x2e6   : > { %v1518_v60 = vpack.c.bf16 %v1126_v25, %v1126_v25  ;;  %v1519_v57 = vpack.c.bf16 %v1127_v6, %v1127_v6  ;;  %v3158_v25 = vld [vmem:[#allocation17_spill] sm:$0xff]  ;;  %v1766_v3 = vunpack.i.l.bf16 %v2841_v51  ;;  %v3161_v51 = vld [vmem:[#allocation20_spill] sm:$0xff] }
 0x2e7   : > { %v832_v42 = vmax.f32 %v3157_v13, %v1757_v50  ;;  %v831_v6 = vmax.f32 %v3158_v25, %v1756_v48 }
 0x2e8   : > { %1287 = vst.msk [vmem:[%s2889_s11 + $0x40] sm:$0xf] %vm1270_vm1, %v1518_v60  ;;  %1288 = vst.msk [vmem:[%s2889_s11 + $0x44] sm:$0xf] %vm1270_vm1, %v1519_v57  ;;  %v1762_v57 = vunpack.i.h.bf16 %v2837_v56 }
 0x2ee   : > { %v1815_v19 = vpop.permute.xlu1 %1814 }
 0x2ef   : > { %v1817_v17 = vunpack.i.h.bf16 %v1815_v19  ;;  %v1816_v28 = vunpack.i.l.bf16 %v1815_v19 }
 0x2f1   : > { %v1117_v2 = vsel %vm1109_vm0, %v828_v21, %v1817_v17  ;;  %v1116_v7 = vsel %vm1109_vm0, %v827_v15, %v1816_v28 }
 0x2f2   : > { %v1509_v54 = vpack.c.bf16 %v1117_v2, %v1117_v2  ;;  %v1508_v26 = vpack.c.bf16 %v1116_v7, %v1116_v7  ;;  %v1820_v59 = vpop.permute.xlu1 %1819  ;;  %v3159_v2 = vld [vmem:[#allocation18_spill] sm:$0xff] }
 0x2f3   : > { %v1822_v35 = vunpack.i.h.bf16 %v1820_v59  ;;  %v1821_v8 = vunpack.i.l.bf16 %v1820_v59  ;;  %v848_v7 = vmax.f32 %v3159_v2, %v1762_v57 }
 0x2f4   : > { %1278 = vst.msk [vmem:[%s2889_s11 + $0x1c] sm:$0xf] %vm1270_vm1, %v1509_v54  ;;  %1277 = vst.msk [vmem:[%s2889_s11 + $0x18] sm:$0xf] %vm1270_vm1, %v1508_v26 }
 0x2f5   : > { %v1133_v12 = vsel %vm1109_vm0, %v844_v47, %v1822_v35  ;;  %v1132_v11 = vsel %vm1109_vm0, %v843_v44, %v1821_v8  ;;  %v830_v47 = vmax.f32 %v3161_v51, %v1767_v61  ;;  %v3162_v44 = vld [vmem:[#allocation21_spill] sm:$0xff] }
 0x2f6   : > { %v1525_v62 = vpack.c.bf16 %v1133_v12, %v1133_v12  ;;  %v1524_v1 = vpack.c.bf16 %v1132_v11, %v1132_v11  ;;  %v1825_v9 = vpop.permute.xlu0 %1824  ;;  %v829_v35 = vmax.f32 %v3162_v44, %v1766_v3 }
 0x2f7   : > { %v1827_v63 = vunpack.i.h.bf16 %v1825_v9  ;;  %v1826_v24 = vunpack.i.l.bf16 %v1825_v9 }
 0x2f8   : > { %1294 = vst.msk [vmem:[%s2889_s11 + $0x5c] sm:$0xf] %vm1270_vm1, %v1525_v62  ;;  %1293 = vst.msk [vmem:[%s2889_s11 + $0x58] sm:$0xf] %vm1270_vm1, %v1524_v1 }
 0x2f9   : > { %v1114_v33 = vsel %vm1109_vm0, %v825_v22, %v1826_v24  ;;  %v1115_v18 = vsel %vm1109_vm0, %v826_v43, %v1827_v63  ;;  %v1771_v43 = vunpack.i.l.bf16 %v2847_v46  ;;  %v3163_v63 = vld [vmem:[#allocation22_spill] sm:$0xff] }
 0x2fa   : > { %v1506_v27 = vpack.c.bf16 %v1114_v33, %v1114_v33  ;;  %v1507_v0 = vpack.c.bf16 %v1115_v18, %v1115_v18  ;;  %v1830_v10 = vpop.permute.xlu0 %1829  ;;  %v846_v24 = vmax.f32 %v3163_v63, %v1772_v53  ;;  %v3164_v33 = vld [vmem:[#allocation23_spill] sm:$0xff] }
 0x2fb   : > { %v1832_v29 = vunpack.i.h.bf16 %v1830_v10  ;;  %v1831_v34 = vunpack.i.l.bf16 %v1830_v10  ;;  %v845_v18 = vmax.f32 %v3164_v33, %v1771_v43 }
 0x2fc   : > { %1275 = vst.msk [vmem:[%s2889_s11 + $0x10] sm:$0xf] %vm1270_vm1, %v1506_v27  ;;  %1276 = vst.msk [vmem:[%s2889_s11 + $0x14] sm:$0xf] %vm1270_vm1, %v1507_v0 }
 0x2fd   : > { %v1130_v30 = vsel %vm1109_vm0, %v841_v52, %v1831_v34  ;;  %v1131_v58 = vsel %vm1109_vm0, %v842_v41, %v1832_v29  ;;  %v1776_v52 = vunpack.i.l.bf16 %v2854_v5  ;;  %v1787_v29 = vunpack.i.h.bf16 %v2873_v37  ;;  %v3168_v5 = vld [vmem:[#allocation29_spill] sm:$0xff] }
 0x2fe   : > { %v1522_v20 = vpack.c.bf16 %v1130_v30, %v1130_v30  ;;  %v1523_v45 = vpack.c.bf16 %v1131_v58, %v1131_v58  ;;  %v1786_v34 = vunpack.i.l.bf16 %v2873_v37  ;;  %v3165_v58 = vld [vmem:[#allocation24_spill] sm:$0xff] }
 0x300   : > { %1291 = vst.msk [vmem:[%s2889_s11 + $0x50] sm:$0xf] %vm1270_vm1, %v1522_v20  ;;  %1292 = vst.msk [vmem:[%s2889_s11 + $0x54] sm:$0xf] %vm1270_vm1, %v1523_v45  ;;  %v836_v20 = vmax.f32 %v3165_v58, %v1777_v55  ;;  %v3166_v45 = vld [vmem:[#allocation25_spill] sm:$0xff]  ;;  %v833_v57 = vmax.f32 %v3168_v5, %v1786_v34 }
 0x301   : > { %v835_v50 = vmax.f32 %v3166_v45, %v1776_v52 }
 0x306   : > { %v1835_v60 = vpop.permute.xlu1 %1834 }
 0x307   : > { %v1837_v40 = vunpack.i.h.bf16 %v1835_v60  ;;  %v1836_v21 = vunpack.i.l.bf16 %v1835_v60 }
 0x309   : > { %v1121_v15 = vsel %vm1109_vm0, %v832_v42, %v1837_v40  ;;  %v1120_v19 = vsel %vm1109_vm0, %v831_v6, %v1836_v21  ;;  %v3167_v6 = vld [vmem:[#allocation28_spill] sm:$0xff]  ;;  %v1792_v21 = vunpack.i.h.bf16 %v2883_v31 }
 0x30a   : > { %v1513_v38 = vpack.c.bf16 %v1121_v15, %v1121_v15  ;;  %v1512_v17 = vpack.c.bf16 %v1120_v19, %v1120_v19  ;;  %v1840_v28 = vpop.permute.xlu1 %1839  ;;  %v834_v60 = vmax.f32 %v3167_v6, %v1787_v29  ;;  %v1791_v15 = vunpack.i.l.bf16 %v2883_v31 }
 0x30b   : > { %v1842_v54 = vunpack.i.h.bf16 %v1840_v28  ;;  %v1841_v56 = vunpack.i.l.bf16 %v1840_v28  ;;  %v1781_v28 = vunpack.i.l.bf16 %v2857_v49 }
 0x30c   : > { %1282 = vst.msk [vmem:[%s2889_s11 + $0x2c] sm:$0xf] %vm1270_vm1, %v1513_v38  ;;  %1281 = vst.msk [vmem:[%s2889_s11 + $0x28] sm:$0xf] %vm1270_vm1, %v1512_v17  ;;  %v1782_v17 = vunpack.i.h.bf16 %v2857_v49 }
 0x30d   : > { %v1137_v26 = vsel %vm1109_vm0, %v848_v7, %v1842_v54  ;;  %v1136_v59 = vsel %vm1109_vm0, %v847_v39, %v1841_v56  ;;  %v850_v39 = vmax.f32 %v3169_v14, %v1792_v21  ;;  %v3170_v54 = vld [vmem:[#allocation31_spill] sm:$0xff] }
 0x30e   : > { %v1529_v8 = vpack.c.bf16 %v1137_v26, %v1137_v26  ;;  %v1528_v12 = vpack.c.bf16 %v1136_v59, %v1136_v59  ;;  %v1845_v11 = vpop.permute.xlu0 %1844  ;;  %v849_v56 = vmax.f32 %v3170_v54, %v1791_v15 }
 0x30f   : > { %v1847_v16 = vunpack.i.h.bf16 %v1845_v11  ;;  %v1846_v22 = vunpack.i.l.bf16 %v1845_v11  ;;  %v3172_v11 = vld [vmem:[#allocation27_spill] sm:$0xff] }
 0x310   : > { %1298 = vst.msk [vmem:[%s2889_s11 + $0x6c] sm:$0xf] %vm1270_vm1, %v1529_v8  ;;  %1297 = vst.msk [vmem:[%s2889_s11 + $0x68] sm:$0xf] %vm1270_vm1, %v1528_v12  ;;  %v3171_v8 = vld [vmem:[#allocation26_spill] sm:$0xff]  ;;  %v851_v53 = vmax.f32 %v3172_v11, %v1781_v28 }
 0x311   : > { %v1118_v62 = vsel %vm1109_vm0, %v829_v35, %v1846_v22  ;;  %v1119_v1 = vsel %vm1109_vm0, %v830_v47, %v1847_v16  ;;  %v852_v12 = vmax.f32 %v3171_v8, %v1782_v17 }
 0x312   : > { %v1510_v9 = vpack.c.bf16 %v1118_v62, %v1118_v62  ;;  %v1511_v4 = vpack.c.bf16 %v1119_v1, %v1119_v1  ;;  %v1850_v36 = vpop.permute.xlu0 %1849 }
 0x313   : > { %v1852_v46 = vunpack.i.h.bf16 %v1850_v36  ;;  %v1851_v27 = vunpack.i.l.bf16 %v1850_v36 }
 0x314   : > { %1279 = vst.msk [vmem:[%s2889_s11 + $0x20] sm:$0xf] %vm1270_vm1, %v1510_v9  ;;  %1280 = vst.msk [vmem:[%s2889_s11 + $0x24] sm:$0xf] %vm1270_vm1, %v1511_v4 }
 0x315   : > { %v1134_v0 = vsel %vm1109_vm0, %v845_v18, %v1851_v27  ;;  %v1135_v10 = vsel %vm1109_vm0, %v846_v24, %v1852_v46 }
 0x316   : > { %v1526_v23 = vpack.c.bf16 %v1134_v0, %v1134_v0  ;;  %v1527_v41 = vpack.c.bf16 %v1135_v10, %v1135_v10 }
 0x318   : > { %1295 = vst.msk [vmem:[%s2889_s11 + $0x60] sm:$0xf] %vm1270_vm1, %v1526_v23  ;;  %1296 = vst.msk [vmem:[%s2889_s11 + $0x64] sm:$0xf] %vm1270_vm1, %v1527_v41 }
 0x31e   : > { %v1855_v30 = vpop.permute.xlu1 %1854 }
 0x31f   : > { %v1857_v48 = vunpack.i.h.bf16 %v1855_v30  ;;  %v1856_v13 = vunpack.i.l.bf16 %v1855_v30 }
 0x321   : > { %v1125_v42 = vsel %vm1109_vm0, %v836_v20, %v1857_v48  ;;  %v1124_v25 = vsel %vm1109_vm0, %v835_v50, %v1856_v13 }
 0x322   : > { %v1517_v32 = vpack.c.bf16 %v1125_v42, %v1125_v42  ;;  %v1516_v40 = vpack.c.bf16 %v1124_v25, %v1124_v25  ;;  %v1860_v37 = vpop.permute.xlu0 %1859 }
 0x323   : > { %v1862_v19 = vunpack.i.h.bf16 %v1860_v37  ;;  %v1861_v61 = vunpack.i.l.bf16 %v1860_v37 }
 0x324   : > { %1286 = vst.msk [vmem:[%s2889_s11 + $0x3c] sm:$0xf] %vm1270_vm1, %v1517_v32  ;;  %1285 = vst.msk [vmem:[%s2889_s11 + $0x38] sm:$0xf] %vm1270_vm1, %v1516_v40 }
 0x325   : > { %v1122_v3 = vsel %vm1109_vm0, %v833_v57, %v1861_v61  ;;  %v1123_v38 = vsel %vm1109_vm0, %v834_v60, %v1862_v19 }
 0x326   : > { %v1514_v2 = vpack.c.bf16 %v1122_v3, %v1122_v3  ;;  %v1515_v31 = vpack.c.bf16 %v1123_v38, %v1123_v38  ;;  %v1865_v7 = vpop.permute.xlu0 %1864 }
 0x327   : > { %v1867_v26 = vunpack.i.h.bf16 %v1865_v7  ;;  %v1866_v59 = vunpack.i.l.bf16 %v1865_v7 }
 0x328   : > { %1283 = vst.msk [vmem:[%s2889_s11 + $0x30] sm:$0xf] %vm1270_vm1, %v1514_v2  ;;  %1284 = vst.msk [vmem:[%s2889_s11 + $0x34] sm:$0xf] %vm1270_vm1, %v1515_v31 }
 0x329   : > { %v1138_v51 = vsel %vm1109_vm0, %v849_v56, %v1866_v59  ;;  %v1139_v49 = vsel %vm1109_vm0, %v850_v39, %v1867_v26 }
 0x32a   : > { %v1530_v47 = vpack.c.bf16 %v1138_v51, %v1138_v51  ;;  %v1531_v44 = vpack.c.bf16 %v1139_v49, %v1139_v49  ;;  %v1870_v35 = vpop.permute.xlu1 %1869 }
 0x32b   : > { %v1872_v43 = vunpack.i.h.bf16 %v1870_v35  ;;  %v1871_v16 = vunpack.i.l.bf16 %v1870_v35 }
 0x32c   : > { %1299 = vst.msk [vmem:[%s2889_s11 + $0x70] sm:$0xf] %vm1270_vm1, %v1530_v47  ;;  %1300 = vst.msk [vmem:[%s2889_s11 + $0x74] sm:$0xf] %vm1270_vm1, %v1531_v44 }
 0x32d   : > { %v1141_v22 = vsel %vm1109_vm0, %v852_v12, %v1872_v43  ;;  %v1140_v62 = vsel %vm1109_vm0, %v851_v53, %v1871_v16 }
 0x32e   : > { %v1533_v1 = vpack.c.bf16 %v1141_v22, %v1141_v22  ;;  %v1532_v9 = vpack.c.bf16 %v1140_v62, %v1140_v62 }
 0x330   : > { %1302 = vst.msk [vmem:[%s2889_s11 + $0x7c] sm:$0xf] %vm1270_vm1, %v1533_v1  ;;  %1301 = vst.msk [vmem:[%s2889_s11 + $0x78] sm:$0xf] %vm1270_vm1, %v1532_v9 }
 0x331   : > { %1996 = shalt.err (!%p1993_p11)
}
 0x332   : > { %s1997_s5 = scalar_lea.hbm %s3040_s15, 2048  ;;  %s2001_s20 = scalar_lea.hbm %s3098_s3, 4096 }
 0x333   : > { %p1998_p0 = scmp.ne.s32.totalorder %s3040_s15, %s1997_s5  ;;  %p2002_p6 = scmp.lt.u32.totalorder %s3040_s15, %s3098_s3 }
 0x334   : > { %p2003_p7 = scmp.lt.u32.totalorder %s2001_s20, %s1997_s5  ;;  %p2005_p8 = scmp.lt.u32.totalorder %s1997_s5, %s3040_s15 }
 0x335   : > { %p1999_p4 = pnand %p1998_p0, %p3173_p12 }
 0x336   : > { %p2004_p2 = por %p2003_p7, %p2002_p6 }
 0x337   : > { %p2000_p13 = pneg %p1999_p4 }
 0x338   : > { %p2006_p1 = por %p2005_p8, %p2004_p2 }
 0x33a   : > { %p2007_p10 = pnand %p2006_p1, %p2000_p13 }
 0x33c   : > { %2010 = shalt.err (!%p2007_p10)
}
 0x33d   : > { %s2080_s11 = smov 64   ;;  %s2081_s18 = smov 4  }
 0x33e   : > { %1633 = dma.vmem_to_hbm [thread:$0]  (%p3173_p12), %s3042_s26, 2048, %s3040_s15, %s1304_s8, %s2080_s11, %s2080_s11, %s2081_s18  }
 0x33f PF: > { %s1334_s9 = sand.u32 1, %s2049_s12   ;;  %p3174_p3 = scmp.ne.s32.totalorder %s3126_s23, 0 }
 0x340   : > { %p3175_p5 = scmp.ge.s32.totalorder %s2069_s17, 2  ;;  %s1335_s19 = scalar_lea.sflag [#allocation4], %s1334_s9 }
 0x342   : > { %p1647_p9 = pnand %p3175_p5, %p3174_p3 }
 0x344   : > { %2044 = dma.done.wait (!%p1647_p9), %s1335_s19, 2048  }
 0x345   : > { %2046 = vsyncadd (!%p1647_p9), %s1335_s19, 4294965248  ;;  %s20_s17 = sadd.s32 1, %s2069_s17   ;;  %s3176_s12 = smov %s2053_s13 }
 0x346   : > { %p17_p11 = scmp.ge.s32.totalorder %s20_s17, 4   ;;  %s3177_s13 = smov %s2057_s14 }
 0x347   : > { %s3178_s14 = smov %s2248_s6  ;;  %s3179_s15 = smov %s2065_s16 }
 0x348   : > { %s3180_s16 = smov %s3182_s25  ;;  %19 = sbr.rel (!%p17_p11) target bundleno = 7 (0x7), region = 85 }
 0x34f   :  { %1340 = vsyncpa [#allocation3], 1 }
 0x350   :  { %1342 = vsyncpa [#allocation3 + $0x1], 1 }
 0x351   :  { %1343 = vsyncpa [#allocation6], 1 }
 0x352   :  { %1344 = vsyncpa [#allocation4], 1 }
 0x353   :  { %1346 = vsyncpa [#allocation4 + $0x1], 1 }

// kernel: tile.9
= control target key start
LH: loop header
LB: loop body
LE: loop exit
PB: predicated region body
PF: predicated region fallthrough
CT: control target
= control target key end

     0   :  { %vm47_vm0 = vcmask 1047556   ;;  %vm49_vm1 = vcmask 72704   ;;  %s130_s24 = smov 27   ;;  %s131_s29 = smov 9   ;;  %vm64_vm2 = vcmask 294104   ;;  %vm81_vm3 = vcmask 220304   ;;  %s199_s0 = inlined_call_operand.vmem [shape: f32[9,4,9], index: 0, kind: input, shape index: {}]   ;;  %s200_s1 = inlined_call_operand.vmem [shape: f32[9,36], index: 1, kind: output, shape index: {}]  }
   0x1   :  { %v114_v0 = vld [vmem:[%s199_s0 + $0x20] sm:$0xf]  ;;  %v115_v1 = vld [vmem:[%s199_s0 + $0x1c] sm:$0xf]  ;;  %v116_v2 = vld [vmem:[%s199_s0 + $0x18] sm:$0xf] }
   0x2   :  { %8 = vst [vmem:[#allocation0 + $0x40] sm:$0xf] %v114_v0  ;;  %13 = vst [vmem:[#allocation0 + $0x38] sm:$0xf] %v115_v1  ;;  %v117_v3 = vld [vmem:[%s199_s0 + $0x14] sm:$0xf] }
   0x3   :  { %v118_v4 = vld [vmem:[%s199_s0 + $0x10] sm:$0xf]  ;;  %18 = vst [vmem:[#allocation0 + $0x30] sm:$0xf] %v116_v2  ;;  %23 = vst [vmem:[#allocation0 + $0x28] sm:$0xf] %v117_v3 }
   0x4   :  { %28 = vst [vmem:[#allocation0 + $0x20] sm:$0xf] %v118_v4  ;;  %v119_v5 = vld [vmem:[%s199_s0 + $0xc] sm:$0xf]  ;;  %v120_v6 = vld [vmem:[%s199_s0 + $0x8] sm:$0xf] }
   0x5   :  { %v121_v7 = vld [vmem:[%s199_s0 + $0x4] sm:$0xf]  ;;  %33 = vst [vmem:[#allocation0 + $0x18] sm:$0xf] %v119_v5  ;;  %38 = vst [vmem:[#allocation0 + $0x10] sm:$0xf] %v120_v6 }
   0x6   :  { %42 = vst [vmem:[#allocation0 + $0x8] sm:$0xf] %v121_v7  ;;  %v43_v8 = vld [vmem:[%s199_s0] sm:$0xf]  ;;  %s129_s0 = smov 18   ;;  %vm98_vm4 = vcmask 146504  }
   0x7   :  { %44 = vst [vmem:[#allocation0] sm:$0xf] %v43_v8 }
   0x9   :  { %v84_v9 = vld [vmem:[#allocation0 + $0x42] sm:$0x1]   ;;  %v67_v10 = vld [vmem:[#allocation0 + $0x43] sm:$0x1]   ;;  %v52_v14 = vld [vmem:[#allocation0 + $0x40] sm:$0x1]  }
   0xa   :  { %85 = vrot.lane.b32.xlu1 %v84_v9, %s129_s0  ;;  %68 = vrot.lane.b32.xlu0 %v67_v10, %s130_s24  ;;  %122 = vst.msk [vmem:[%s200_s1 + $0x8] sm:$0x1] %vm49_vm1, %v52_v14   ;;  %v101_v22 = vld [vmem:[#allocation0 + $0x41] sm:$0x1]  }
   0xb   :  { %v76_v11 = vld [vmem:[#allocation0 + $0x2] ss:$8 sm:$0xf0]   ;;  %v59_v12 = vld [vmem:[#allocation0 + $0x3] ss:$8 sm:$0xf0]  }
   0xc   :  { %v93_v13 = vld [vmem:[#allocation0 + $0x1] ss:$8 sm:$0xf0]   ;;  %v46_v21 = vld [vmem:[#allocation0] ss:$8 sm:$0xf0]  }
   0xe   :  { %v74_v15 = vld [vmem:[#allocation0 + $0x2] ss:$8 sm:$0xf]   ;;  %v57_v16 = vld [vmem:[#allocation0 + $0x3] ss:$8 sm:$0xf]  }
   0xf   :  { %v78_v17 = vsel %vm47_vm0, %v76_v11, %v74_v15  ;;  %v61_v18 = vsel %vm47_vm0, %v59_v12, %v57_v16  ;;  %v91_v19 = vld [vmem:[#allocation0 + $0x1] ss:$8 sm:$0xf]   ;;  %v45_v20 = vld [vmem:[#allocation0] ss:$8 sm:$0xf]  }
  0x10   :  { %79 = vrot.lane.b32.xlu1 %v78_v17, %s129_s0  ;;  %62 = vrot.lane.b32.xlu0 %v61_v18, %s130_s24  ;;  %v95_v23 = vsel %vm47_vm0, %v93_v13, %v91_v19  ;;  %v48_v24 = vsel %vm47_vm0, %v46_v21, %v45_v20 }
  0x11   :  { %50 = vst.msk [vmem:[%s200_s1] sm:$0xff] %vm49_vm1, %v48_v24  }
  0x14   :  { %102 = vrot.lane.b32.xlu1 %v101_v22, %s131_s29  ;;  %96 = vrot.lane.b32.xlu0 %v95_v23, %s131_s29 }
  0x7c   :  { %v86_v25 = vpop.permute.xlu1 %85   ;;  %v69_v26 = vpop.permute.xlu0 %68  }
  0x7d   :  { %123 = vst.msk [vmem:[%s200_s1 + $0x8] sm:$0x1] %vm64_vm2, %v69_v26  }
  0x7e   :  { %124 = vst.msk [vmem:[%s200_s1 + $0x8] sm:$0x1] %vm81_vm3, %v86_v25  }
  0x82   :  { %v80_v27 = vpop.permute.xlu1 %79   ;;  %v63_v28 = vpop.permute.xlu0 %62  }
  0x83   :  { %65 = vst.msk [vmem:[%s200_s1] sm:$0xff] %vm64_vm2, %v63_v28  }
  0x84   :  { %82 = vst.msk [vmem:[%s200_s1] sm:$0xff] %vm81_vm3, %v80_v27  }
  0x86   :  { %v103_v29 = vpop.permute.xlu1 %102   ;;  %v97_v30 = vpop.permute.xlu0 %96  }
  0x87   :  { %125 = vst.msk [vmem:[%s200_s1 + $0x8] sm:$0x1] %vm98_vm4, %v103_v29   ;;  %99 = vst.msk [vmem:[%s200_s1] sm:$0xff] %vm98_vm4, %v97_v30  }

// kernel: rfcbam_forward.3
= control target key start
LH: loop header
LB: loop body
LE: loop exit
PB: predicated region body
PF: predicated region fallthrough
CT: control target
= control target key end

     0   :  { %s3945_s0 = inlined_call_operand.hbm [shape: bf16[2,256,128], index: 0, kind: input, shape index: {}]   ;;  %s3946_s1 = inlined_call_operand.hbm [shape: bf16[2,256,9], index: 1, kind: input, shape index: {}]   ;;  %s3947_s2 = inlined_call_operand.hbm [shape: bf16[2,9,128], index: 2, kind: input, shape index: {}]   ;;  %s3948_s3 = inlined_call_operand.hbm [shape: bf16[128,128], index: 3, kind: input, shape index: {}]   ;;  %s3949_s4 = inlined_call_operand.hbm [shape: f32[1,128], index: 4, kind: input, shape index: {}]   ;;  %s3950_s5 = inlined_call_operand.hbm [shape: bf16[128,8], index: 5, kind: input, shape index: {}]   ;;  %s3951_s6 = inlined_call_operand.hbm [shape: f32[1,8], index: 6, kind: input, shape index: {}]   ;;  %s3952_s7 = inlined_call_operand.hbm [shape: bf16[2,256,8], index: 7, kind: output, shape index: {}]  }
   0x1   :  { %3980 = sst [smem:[#allocation27_spill]] %s3946_s1 }
   0x2   :  { %3981 = sst [smem:[#allocation28_spill]] %s3948_s3 }
   0x3   :  { %3982 = sst [smem:[#allocation29_spill]] %s3950_s5 }
   0x4   :  { %3983 = sst [smem:[#allocation30_spill]] %s3952_s7 }
   0x5   :  { %12 = vsyncpa [#allocation3], 0 }
   0x6   :  { %14 = vsyncpa [#allocation3 + $0x1], 0 }
   0x7   :  { %15 = vsyncpa [#allocation6], 0 }
   0x8   :  { %17 = vsyncpa [#allocation6 + $0x1], 0 }
   0x9   :  { %18 = vsyncpa [#allocation9], 0 }
   0xa   :  { %19 = vsyncpa [#allocation12], 0 }
   0xb   :  { %20 = vsyncpa [#allocation4], 0 }
   0xc   :  { %22 = vsyncpa [#allocation4 + $0x1], 0  ;;  %s3075_s24 = smov 0   ;;  %s3077_s25 = smov 0  }
   0xd   :  { %s3079_s26 = smov 0   ;;  %s3081_s27 = smov 0  }
   0xe   :  { %s3083_s28 = smov 0   ;;  %s3085_s29 = smov 0  }
   0xf LB: > { %3984 = sst [smem:[#allocation20_spill]] %s3000_s24  ;;  %s3106_s30 = sadd.s32 4294967295, %s3020_s29   ;;  %s3020_s29 = sphi %s3085_s29, %s28_s29   ;;  %s3016_s28 = sphi %s3083_s28, %s4031_s28   ;;  %s3012_s27 = sphi %s3081_s27, %s4030_s27   ;;  %s3008_s26 = sphi %s3079_s26, %s4026_s26   ;;  %s3004_s25 = sphi %s3077_s25, %s4029_s25   ;;  %s3000_s24 = sphi %s3075_s24, %s4028_s24  }
  0x10   : > { %3985 = sst [smem:[#allocation21_spill]] %s3008_s26  ;;  %s2035_s8 = sadd.s32 4294967294, %s3020_s29  }
  0x11   : > { %3986 = sst [smem:[#allocation22_spill]] %s3020_s29  ;;  %p62_p0 = scmp.ne.s32.totalorder %s3004_s25, %s3000_s24 }
  0x12   : > { %p3953_p1 = scmp.eq.s32.totalorder %s3106_s30, 0  ;;  %p232_p3 = scmp.eq.s32.totalorder %s2035_s8, 1 }
  0x13   : > { %p2036_p5 = scmp.ge.s32.totalorder %s3020_s29, 1  ;;  %p239_p7 = scmp.lt.s32.totalorder %s3020_s29, 3 }
  0x14   : > { %p3115_p4 = por %p3953_p1, %p62_p0  ;;  %p3120_p6 = por %p232_p3, %p62_p0 }
  0x15   : > { %p3125_p8 = pnand %p2036_p5, %p239_p7  ;;  %s3022_s12 = smov [#allocation8]  }
  0x16   : > { %s3987_s9 = scalar_select %p3115_p4, 1, 0 }
  0x17   : > { %s3988_s10 = scalar_select %p3120_p6, 1, 0 }
  0x18   : > { %s3990_s11 = scalar_select %p3125_p8, 1, 0 }
  0x19   : > { %3989 = sst [smem:[#allocation23_spill]] %s3988_s10  ;;  %s251_s13 = sshll.u32 %s3022_s12, 4  ;;  %s3129_s13 = int_to_ptr.vmem [resolvable:$true] %s251_s13 }
  0x1a   : > { %p2453_p9 = pneg %p3125_p8  ;;  %s3023_s15 = smov [#allocation11]  }
  0x1b   : > { %s275_s16 = sshll.u32 %s3023_s15, 4  ;;  %s3992_s3 = sld [smem:[#allocation28_spill]]  ;;  %s3140_s16 = int_to_ptr.vmem [resolvable:$true] %s275_s16 }
  0x1c   : > { %p3136_p11 = pnand %p2453_p9, %p3953_p1 }
  0x1e   : > { %s3991_s14 = scalar_select %p3136_p11, 1, 0 }
  0x1f   : > { %p3150_p13 = pneg %p3136_p11 }
  0x21   : > { %s2724_s19 = scalar_lea.hbm %s3992_s3, 1024 }
  0x22   : > { %p2725_p12 = scmp.ne.s32.totalorder %s3992_s3, %s2724_s19  ;;  %p2731_p5 = scmp.lt.u32.totalorder %s2724_s19, %s3992_s3 }
  0x23   : > { %s3993_s22 = scalar_select %p3150_p13, 1, 0 }
  0x24   : > { %p2727_p0 = pnand %p3150_p13, %p2725_p12 }
  0x26   : > { %p2728_p3 = pneg %p2727_p0 }
  0x28   : > { %p2733_p7 = pnand %p2731_p5, %p2728_p3 }
  0x2a   : > { %2736 = shalt.err (!%p2733_p7)
}
  0x2b   : > { %s2737_s12 = scalar_lea.vmem %s3129_s13, 1024  ;;  %p2745_p2 = scmp.lt.s32.totalorder %s3129_s13, %s3129_s13 }
  0x2c   : > { %p2738_p9 = scmp.ne.s32.totalorder %s3129_s13, %s2737_s12  ;;  %p2746_p6 = scmp.lt.s32.totalorder %s2737_s12, %s2737_s12 }
  0x2e   : > { %p2740_p10 = pnand %p2738_p9, %p3150_p13  ;;  %p2747_p12 = por %p2746_p6, %p2745_p2 }
  0x30   : > { %p2741_p1 = pneg %p2740_p10 }
  0x32   : > { %p2748_p0 = pnand %p2747_p12, %p2741_p1 }
  0x34   : > { %2751 = shalt.err (!%p2748_p0)
}
  0x35   : > { %s3956_s15 = smov 64   ;;  %s3958_s17 = smov 4  }
  0x36   : > { %2456 = dma.hbm_to_vmem [thread:$0]  (!%p3136_p11), %s3992_s3, 1024, %s3129_s13, [#allocation9], %s3956_s15, %s3956_s15, %s3958_s17  }
  0x37   : > { %s3994_s5 = sld [smem:[#allocation29_spill]] }
  0x3d   : > { %s2752_s23 = scalar_lea.hbm %s3994_s5, 1024 }
  0x3e   : > { %p2753_p1 = scmp.ne.s32.totalorder %s3994_s5, %s2752_s23  ;;  %p2759_p10 = scmp.lt.u32.totalorder %s2752_s23, %s3994_s5 }
  0x40   : > { %p2755_p2 = pnand %p2753_p1, %p3150_p13 }
  0x42   : > { %p2756_p6 = pneg %p2755_p2 }
  0x44   : > { %p2761_p3 = pnand %p2759_p10, %p2756_p6 }
  0x46   : > { %2764 = shalt.err (!%p2761_p3)
}
  0x47   : > { %s2765_s13 = scalar_lea.vmem %s3140_s16, 1024  ;;  %p2773_p12 = scmp.lt.s32.totalorder %s3140_s16, %s3140_s16 }
  0x48   : > { %p2766_p5 = scmp.ne.s32.totalorder %s3140_s16, %s2765_s13  ;;  %p2774_p0 = scmp.lt.s32.totalorder %s2765_s13, %s2765_s13 }
  0x4a   : > { %p2768_p7 = pnand %p2766_p5, %p3150_p13  ;;  %p2775_p1 = por %p2774_p0, %p2773_p12 }
  0x4c   : > { %p2769_p9 = pneg %p2768_p7 }
  0x4e   : > { %p2776_p2 = pnand %p2775_p1, %p2769_p9 }
  0x50   : > { %2779 = shalt.err (!%p2776_p2)
}
  0x51   : > { %2462 = dma.hbm_to_vmem [thread:$0]  (!%p3136_p11), %s3994_s5, 1024, %s3140_s16, [#allocation12], %s3956_s15, %s3956_s15, %s3958_s17  }
  0x52   : > { %s40_s18 = sadd.s32 1, %s3016_s28  ;;  %s49_s19 = sadd.s32 1, %s3008_s26 }
  0x53   : > { %p42_p6 = scmp.ge.s32.totalorder %s40_s18, 2  ;;  %p56_p10 = scmp.ne.s32.totalorder %s3008_s26, %s3004_s25 }
  0x54   : > { %p57_p3 = scmp.eq.s32.totalorder %s3020_s29, 0  ;;  %p2484_p5 = scmp.lt.s32.totalorder %s3020_s29, 2 }
  0x55   : > { %s4033_s18 = smov (%p42_p6, %s40_s18), 0  ;;  %p3996_p9 = scmp.eq.s32.totalorder %s3106_s30, 1 }
  0x56   : > { %3995 = sst [smem:[#allocation24_spill]] %s4033_s18  ;;  %p58_p7 = por %p57_p3, %p56_p10 }
  0x57   : > { %p3210_p12 = por %p3996_p9, %p56_p10  ;;  %s44_s21 = ssub.s32 %s3016_s28, %s4033_s18 }
  0x58   : > { %s3217_s16 = sand.u32 1, %s3008_s26   ;;  %p47_p0 = scmp.eq.s32.totalorder %s44_s21, 0 }
  0x59   : > { %s3997_s20 = scalar_select %p3210_p12, 1, 0 }
  0x5a   : > { %s3961_s23 = sshll.u32 %s3217_s16, 7  ;;  %s3962_s8 = sshll.u32 %s3016_s28, 11 }
  0x5b   : > { %3998 = sst [smem:[#allocation25_spill]] %s3997_s20  ;;  %p3221_p1 = pnand %p2484_p5, %p58_p7 }
  0x5c   : > { %s3226_s13 = scalar_select %p47_p0, %s3008_s26, %s49_s19  }
  0x5d   : > { %s3999_s12 = scalar_select %p3221_p1, 1, 0 }
  0x5e   : > { %4000 = sst [smem:[#allocation26_spill]] %s3226_s13  ;;  %s323_s24 = sand.u32 1, %s3020_s29  }
  0x5f   : > { %s4001_s1 = sld [smem:[#allocation27_spill]]  ;;  %s327_s21 = scalar_lea.vmem [#allocation5], %s3961_s23 }
  0x60   : > { %s336_s3 = sshll.u32 %s327_s21, 4  ;;  %s3240_s5 = scalar_lea.sflag [#allocation6], %s323_s24  ;;  %s3238_s3 = int_to_ptr.vmem [resolvable:$true] %s336_s3 }
  0x61   : > { %p3246_p6 = pneg %p3221_p1 }
  0x63   : > { %s4002_s18 = scalar_select %p3246_p6, 1, 0 }
  0x65   : > { %s3234_s17 = scalar_lea.hbm %s4001_s1, %s3962_s8  ;;  %s2785_s23 = scalar_lea.hbm %s4001_s1, 4096 }
  0x66   : > { %s2780_s19 = scalar_lea.hbm %s3234_s17, 2048  ;;  %p2786_p5 = scmp.lt.u32.totalorder %s3234_s17, %s4001_s1 }
  0x67   : > { %p2781_p2 = scmp.ne.s32.totalorder %s3234_s17, %s2780_s19  ;;  %p2787_p7 = scmp.lt.u32.totalorder %s2785_s23, %s2780_s19 }
  0x68   : > { %p2789_p0 = scmp.lt.u32.totalorder %s2780_s19, %s3234_s17 }
  0x69   : > { %p2783_p10 = pnand %p3246_p6, %p2781_p2  ;;  %p2788_p9 = por %p2787_p7, %p2786_p5 }
  0x6b   : > { %p2784_p3 = pneg %p2783_p10  ;;  %p2790_p12 = por %p2789_p0, %p2788_p9 }
  0x6d   : > { %p2791_p4 = pnand %p2790_p12, %p2784_p3 }
  0x6f   : > { %2794 = shalt.err (!%p2791_p4)
}
  0x70   : > { %s2795_s24 = scalar_lea.vmem %s3238_s3, 2048  ;;  %s3026_s15 = smov [#allocation5]  }
  0x71   : > { %p2796_p2 = scmp.ne.s32.totalorder %s3238_s3, %s2795_s24  ;;  %s2800_s10 = sshll.u32 %s3026_s15, 4  ;;  %s2801_s10 = int_to_ptr.vmem [resolvable:$false] %s2800_s10 }
  0x72   : > { %s2802_s8 = scalar_lea.vmem %s2801_s10, 4096  ;;  %p2803_p11 = scmp.lt.s32.totalorder %s3238_s3, %s2801_s10 }
  0x73   : > { %p2798_p10 = pnand %p2796_p2, %p3246_p6  ;;  %p2804_p13 = scmp.lt.s32.totalorder %s2802_s8, %s2795_s24 }
  0x75   : > { %p2799_p8 = pneg %p2798_p10  ;;  %p2805_p5 = por %p2804_p13, %p2803_p11 }
  0x77   : > { %p2806_p7 = pnand %p2805_p5, %p2799_p8 }
  0x79   : > { %2809 = shalt.err (!%p2806_p7)
}
  0x7a   : > { %s4003_s23 = smov 4   ;;  %s4004_s19 = smov 64  }
  0x7b   : > { %2472 = dma.hbm_to_vmem [thread:$0]  (!%p3221_p1), %s3234_s17, 2048, %s3238_s3, %s3240_s5, %s4004_s19, %s4004_s19, %s4003_s23  }
  0x7c   : > { %s3027_s21 = smov [#allocation10]   ;;  %s3028_s15 = smov [#allocation13]  }
  0x7d   : > { %s265_s1 = sshll.u32 %s3027_s21, 4  ;;  %s289_s13 = sshll.u32 %s3028_s15, 4  ;;  %s266_s1 = int_to_ptr.vmem [resolvable:$true] %s265_s1  ;;  %s290_s13 = int_to_ptr.vmem [resolvable:$true] %s289_s13 }
  0x7e   : > { %s2810_s8 = scalar_lea.hbm %s3949_s4, 16  ;;  %p4005_p8 = scmp.ne.s32.totalorder %s3993_s22, 0 }
  0x7f   : > { %p2811_p4 = scmp.ne.s32.totalorder %s3949_s4, %s2810_s8  ;;  %p2817_p12 = scmp.lt.u32.totalorder %s2810_s8, %s3949_s4 }
  0x81   : > { %p2813_p11 = pnand %p2811_p4, %p4005_p8 }
  0x83   : > { %p2814_p13 = pneg %p2813_p11 }
  0x85   : > { %p2819_p3 = pnand %p2817_p12, %p2814_p13 }
  0x87   : > { %2822 = shalt.err (!%p2819_p3)
}
  0x88   : > { %s2823_s3 = scalar_lea.vmem %s266_s1, 16  ;;  %s2830_s17 = scalar_lea.vmem %s266_s1, 32 }
  0x89   : > { %p2824_p9 = scmp.ne.s32.totalorder %s266_s1, %s2823_s3  ;;  %p2831_p10 = scmp.lt.s32.totalorder %s266_s1, %s266_s1 }
  0x8a   : > { %p2832_p5 = scmp.lt.s32.totalorder %s2830_s17, %s2823_s3 }
  0x8b   : > { %p2826_p0 = pnand %p2824_p9, %p4005_p8 }
  0x8c   : > { %p2833_p7 = por %p2832_p5, %p2831_p10 }
  0x8d   : > { %p2827_p2 = pneg %p2826_p0 }
  0x8f   : > { %p2834_p1 = pnand %p2833_p7, %p2827_p2 }
  0x91   : > { %2837 = shalt.err (!%p2834_p1)
}
  0x92   : > { %p4006_p4 = scmp.ne.s32.totalorder %s3991_s14, 0  ;;  %s2838_s21 = scalar_lea.hbm %s3951_s6, 16 }
  0x93   : > { %p2839_p11 = scmp.ne.s32.totalorder %s3951_s6, %s2838_s21  ;;  %p2845_p1 = scmp.lt.u32.totalorder %s2838_s21, %s3951_s6 }
  0x94   : > { %2459 = dma.hbm_to_vmem [thread:$0]  (!%p4006_p4), %s3949_s4, 16, %s266_s1, [#allocation9]  }
  0x95   : > { %p2841_p13 = pnand %p2839_p11, %p4005_p8 }
  0x97   : > { %p2842_p12 = pneg %p2841_p13 }
  0x99   : > { %p2847_p3 = pnand %p2845_p1, %p2842_p12 }
  0x9b   : > { %2850 = shalt.err (!%p2847_p3)
}
  0x9c   : > { %s2851_s3 = scalar_lea.vmem %s290_s13, 16  ;;  %s2858_s1 = scalar_lea.vmem %s290_s13, 32 }
  0x9d   : > { %p2852_p9 = scmp.ne.s32.totalorder %s290_s13, %s2851_s3  ;;  %p2859_p10 = scmp.lt.s32.totalorder %s290_s13, %s290_s13 }
  0x9e   : > { %p2860_p5 = scmp.lt.s32.totalorder %s2858_s1, %s2851_s3 }
  0x9f   : > { %p2854_p0 = pnand %p2852_p9, %p4005_p8 }
  0xa0   : > { %p2861_p7 = por %p2860_p5, %p2859_p10 }
  0xa1   : > { %p2855_p2 = pneg %p2854_p0 }
  0xa3   : > { %p2862_p6 = pnand %p2861_p7, %p2855_p2 }
  0xa5   : > { %2865 = shalt.err (!%p2862_p6)
}
  0xa6   : > { %2465 = dma.hbm_to_vmem [thread:$0]  (!%p4006_p4), %s3951_s6, 16, %s290_s13, [#allocation12]  }
  0xa7   : > { %s4007_s22 = sshll.u32 %s3016_s28, 11  ;;  %s4008_s21 = sshll.u32 %s3217_s16, 7 }
  0xa8   : > { %s3314_s20 = scalar_lea.hbm %s3945_s0, %s4007_s22  ;;  %s304_s14 = scalar_lea.vmem [#allocation2], %s4008_s21 }
  0xa9   : > { %s313_s15 = sshll.u32 %s304_s14, 4  ;;  %s2048_s10 = sshll.u32 %s3217_s16, 3  ;;  %s3319_s15 = int_to_ptr.vmem [resolvable:$true] %s313_s15 }
  0xaa   : > { %s301_s24 = scalar_lea.sflag [#allocation3], %s3217_s16  ;;  %s2866_s8 = scalar_lea.hbm %s3314_s20, 2048 }
  0xab   : > { %p2867_p6 = scmp.ne.s32.totalorder %s3314_s20, %s2866_s8  ;;  %p4009_p8 = scmp.ne.s32.totalorder %s4002_s18, 0 }
  0xac   : > { %s2871_s1 = scalar_lea.hbm %s3945_s0, 4096  ;;  %p2872_p13 = scmp.lt.u32.totalorder %s3314_s20, %s3945_s0 }
  0xad   : > { %p2869_p4 = pnand %p2867_p6, %p4009_p8  ;;  %p2873_p12 = scmp.lt.u32.totalorder %s2871_s1, %s2866_s8 }
  0xae   : > { %p2875_p3 = scmp.lt.u32.totalorder %s2866_s8, %s3314_s20 }
  0xaf   : > { %p2870_p11 = pneg %p2869_p4  ;;  %p2874_p1 = por %p2873_p12, %p2872_p13 }
  0xb1   : > { %p2876_p9 = por %p2875_p3, %p2874_p1 }
  0xb3   : > { %p2877_p0 = pnand %p2876_p9, %p2870_p11 }
  0xb5   : > { %2880 = shalt.err (!%p2877_p0)
}
  0xb6   : > { %s2881_s22 = scalar_lea.vmem %s3319_s15, 2048  ;;  %s3029_s29 = smov [#allocation2]  }
  0xb7   : > { %p2882_p2 = scmp.ne.s32.totalorder %s3319_s15, %s2881_s22  ;;  %s2886_s7 = sshll.u32 %s3029_s29, 4  ;;  %s2887_s7 = int_to_ptr.vmem [resolvable:$false] %s2886_s7 }
  0xb8   : > { %s2888_s21 = scalar_lea.vmem %s2887_s7, 4096  ;;  %p2889_p7 = scmp.lt.s32.totalorder %s3319_s15, %s2887_s7 }
  0xb9   : > { %p2884_p10 = pnand %p2882_p2, %p4009_p8  ;;  %p2890_p6 = scmp.lt.s32.totalorder %s2888_s21, %s2881_s22 }
  0xbb   : > { %p2885_p5 = pneg %p2884_p10  ;;  %p2891_p4 = por %p2890_p6, %p2889_p7 }
  0xbd   : > { %p2892_p13 = pnand %p2891_p4, %p2885_p5 }
  0xbf   : > { %2895 = shalt.err (!%p2892_p13)
}
  0xc0   : > { %p4010_p11 = scmp.ne.s32.totalorder %s3999_s12, 0  ;;  %s2198_s14 = sshll.u32 %s3016_s28, 7 }
  0xc1   : > { %s350_s8 = scalar_lea.vmem [#allocation7], %s2048_s10  ;;  %s3354_s17 = scalar_lea.hbm %s3947_s2, %s2198_s14 }
  0xc2   : > { %2469 = dma.hbm_to_vmem [thread:$0]  (!%p4010_p11), %s3314_s20, 2048, %s3319_s15, %s301_s24, %s4004_s19, %s4004_s19, %s4003_s23  }
  0xc3   : > { %s357_s13 = sshll.u32 %s350_s8, 4  ;;  %s2896_s26 = scalar_lea.hbm %s3354_s17, 128  ;;  %s3356_s13 = int_to_ptr.vmem [resolvable:$true] %s357_s13 }
  0xc4   : > { %p2897_p12 = scmp.ne.s32.totalorder %s3354_s17, %s2896_s26  ;;  %s2901_s15 = scalar_lea.hbm %s3947_s2, 256 }
  0xc5   : > { %p2902_p9 = scmp.lt.u32.totalorder %s3354_s17, %s3947_s2  ;;  %p2903_p0 = scmp.lt.u32.totalorder %s2901_s15, %s2896_s26 }
  0xc6   : > { %p2899_p1 = pnand %p2897_p12, %p4009_p8  ;;  %p2905_p10 = scmp.lt.u32.totalorder %s2896_s26, %s3354_s17 }
  0xc7   : > { %p2904_p2 = por %p2903_p0, %p2902_p9 }
  0xc8   : > { %p2900_p3 = pneg %p2899_p1 }
  0xc9   : > { %p2906_p5 = por %p2905_p10, %p2904_p2 }
  0xcb   : > { %p2907_p7 = pnand %p2906_p5, %p2900_p3 }
  0xcd   : > { %2910 = shalt.err (!%p2907_p7)
}
  0xce   : > { %s2911_s22 = scalar_lea.vmem %s3356_s13, 128  ;;  %s3030_s29 = smov [#allocation7]  }
  0xcf   : > { %p2912_p6 = scmp.ne.s32.totalorder %s3356_s13, %s2911_s22  ;;  %s2916_s7 = sshll.u32 %s3030_s29, 4  ;;  %s2917_s7 = int_to_ptr.vmem [resolvable:$false] %s2916_s7 }
  0xd0   : > { %s2918_s21 = scalar_lea.vmem %s2917_s7, 256  ;;  %p2919_p12 = scmp.lt.s32.totalorder %s3356_s13, %s2917_s7 }
  0xd1   : > { %p2914_p4 = pnand %p2912_p6, %p4009_p8  ;;  %p2920_p1 = scmp.lt.s32.totalorder %s2918_s21, %s2911_s22 }
  0xd3   : > { %p2915_p13 = pneg %p2914_p4  ;;  %p2921_p9 = por %p2920_p1, %p2919_p12 }
  0xd5   : > { %p2922_p0 = pnand %p2921_p9, %p2915_p13 }
  0xd7   : > { %2925 = shalt.err (!%p2922_p0)
}
  0xd8   : > { %2475 = dma.hbm_to_vmem [thread:$0]  (!%p4010_p11), %s3354_s17, 128, %s3356_s13, %s3240_s5, %s4004_s19, %s4004_s19, %s4003_s23  }
  0xd9   : > { %p4011_p8 = scmp.ne.s32.totalorder %s3990_s11, 0 }
  0xda   : > { %s3386_s18 = sand.u32 (!%p4011_p8), 1, %s3004_s25   ;;  %p4012_p3 = scmp.ne.s32.totalorder (!%p4011_p8), %s3987_s9, 0 }
  0xdb   : > { %369 = sbr.rel (%p4011_p8) target bundleno = 875 (0x36b), region = 48  ;;  %s3389_s14 = sshll.u32 (!%p4011_p8), %s3386_s18, 7 }
  0xdc   : > { %s372_s12 = scalar_lea.sflag (!%p4011_p8), [#allocation3], %s3386_s18  ;;  %s3393_s8 = scalar_lea.vmem (!%p4011_p8), [#allocation2], %s3389_s14 }
  0xe2   : > { %2979 = dma.done.wait (%p4012_p3), %s372_s12, 2048  }
  0xe3   : > { %2981 = vsyncadd (%p4012_p3), %s372_s12, 4294965248  ;;  %s380_s5 = sand.u32 1, %s3106_s30   ;;  %s3401_s23 = scalar_lea.vmem [#allocation5], %s3389_s14 }
  0xe4   : > { %s381_s11 = scalar_lea.sflag [#allocation6], %s380_s5 }
  0xe5   : > { %2983 = dma.done.wait (%p4012_p3), %s381_s11, 2176  }
  0xe6   : > { %2985 = vsyncadd (%p4012_p3), %s381_s11, 4294965120  ;;  %s2054_s19 = sshll.u32 %s3386_s18, 3  ;;  %p4013_p11 = scmp.eq.s32.totalorder %s3106_s30, 0 }
  0xe7   : > { %s393_s13 = scalar_lea.vmem [#allocation7], %s2054_s19 }
  0xe8   : > { %2987 = dma.done.wait (%p4013_p11), [#allocation9], 1040   ;;  %p4014_p2 = pmov %p4013_p11 }
  0xea   : > { %2989 = vsyncadd (%p4014_p2), [#allocation9], 4294966256  ;;  %p4015_p10 = pmov %p4014_p2 }
  0xeb   : > { %p4016_p5 = pmov %p4014_p2 }
  0xec   : > { %2991 = dma.done.wait (%p4015_p10), [#allocation12], 1040  }
  0xed   : > { %2993 = vsyncadd (%p4016_p5), [#allocation12], 4294966256  ;;  %v2547_v0 = vld [vmem:[#allocation8] sm:$0xff]   ;;  %v2548_v1 = vld [vmem:[#allocation8 + $0x8] sm:$0xff]   ;;  %vm1014_vm0 = vcmask 1043456   ;;  %vm1015_vm1 = vcmask 1044480  }
  0xee   : > { %2297 = vmatprep.subr.bf16.mxu0 %v2547_v0  ;;  %v2549_v2 = vld [vmem:[#allocation8 + $0x10] sm:$0xff]   ;;  %v3031_v3 = vmov 65535   ;;  %v2550_v5 = vld [vmem:[#allocation8 + $0x18] sm:$0xff]   ;;  %v2551_v9 = vld [vmem:[#allocation8 + $0x20] sm:$0xff]   ;;  %vm965_vm2 = vcmask 72704   ;;  %vm1814_vm3 = vcmask 60416  }
  0xef   : > { %2298 = vmatpush3.bf16.msra.mxu0 %v2547_v0  ;;  %v1016_v4 = vsel %vm1014_vm0, 4294967295, %v3031_v3  ;;  %v2555_v6 = vld [vmem:[%s3393_s8] sm:$0xff]   ;;  %v2552_v11 = vld [vmem:[#allocation8 + $0x28] sm:$0xff]   ;;  %v2563_v13 = vld [vmem:[%s3401_s23 + $0x28] sm:$0xff]   ;;  %s3731_s30 = scalar_lea.vmem [#allocation14], %s3389_s14  ;;  %s2231_s9 = sshll.u32 %s3012_s27, 11 }
  0xf0   : > { %2299 = vmatprep.subr.bf16.mxu0 %v2548_v1  ;;  %v1017_v7 = vsel %vm1015_vm1, %v1016_v4, 0  ;;  %2313 = vmatprep.mubr.bf16.mxu0 %v2555_v6  ;;  %v2557_v8 = vld [vmem:[%s393_s13] sm:$0x1f]   ;;  %v2566_v14 = vld [vmem:[%s3401_s23 + $0x30] sm:$0xff]   ;;  %v2567_v16 = vld [vmem:[%s3401_s23 + $0x38] sm:$0xff]   ;;  %s1863_s3 = sshll.u32 %s3731_s30, 4  ;;  %s3890_s3 = int_to_ptr.vmem [resolvable:$true] %s1863_s3 }
  0xf1   : > { %v1019_v10 = vand.u32 %v2557_v8, %v1017_v7  ;;  %v2562_v12 = vld [vmem:[%s3401_s23 + $0x20] sm:$0xff]   ;;  %v2554_v18 = vld [vmem:[#allocation8 + $0x38] sm:$0xff]   ;;  %v2558_v21 = vld [vmem:[%s3393_s8 + $0x10] sm:$0xff]   ;;  %s4017_s1 = sld [smem:[#allocation25_spill]]  ;;  %s4018_s20 = sld [smem:[#allocation30_spill]] }
  0xf2   : > { %2355 = vmatprep.mubr.msk.bf16.mxu1 %vm965_vm2, %v2562_v12  ;;  %v2553_v15 = vld [vmem:[#allocation8 + $0x30] sm:$0xff]   ;;  %v2556_v19 = vld [vmem:[%s3393_s8 + $0x8] sm:$0xff]   ;;  %v2574_v22 = vld [vmem:[%s3401_s23 + $0x50] sm:$0xff]   ;;  %s1848_s27 = scalar_lea.sflag [#allocation4], %s3386_s18  ;;  %s2926_s15 = scalar_lea.vmem %s3890_s3, 2048 }
  0xf3   : > { %2300 = vmatpush3.bf16.msra.mxu0 %v2548_v1  ;;  %2427 = vmatprep.subr.bf16.mxu1 %v1019_v10  ;;  %v2570_v17 = vld [vmem:[%s3401_s23 + $0x40] sm:$0xff]   ;;  %v2571_v20 = vld [vmem:[%s3401_s23 + $0x48] sm:$0xff]   ;;  %v2559_v23 = vld [vmem:[%s3393_s8 + $0x18] sm:$0xff]   ;;  %p2927_p7 = scmp.ne.s32.totalorder %s3890_s3, %s2926_s15  ;;  %s3032_s10 = smov [#allocation14]  }
  0xf4   : > { %2301 = vmatprep.subr.bf16.mxu0 %v2549_v2  ;;  %2428 = vmatpush3.bf16.msra.mxu1 %v1019_v10  ;;  %v2560_v24 = vld [vmem:[%s3393_s8 + $0x20] sm:$0xff]   ;;  %v2575_v25 = vld [vmem:[%s3401_s23 + $0x58] sm:$0xff]   ;;  %v2561_v27 = vld [vmem:[%s3393_s8 + $0x28] sm:$0xff]   ;;  %s2930_s24 = sshll.u32 %s3032_s10, 4  ;;  %s2931_s24 = int_to_ptr.vmem [resolvable:$false] %s2930_s24 }
  0xf5   : > { %v2578_v26 = vld [vmem:[%s3401_s23 + $0x60] sm:$0xff]   ;;  %v2579_v28 = vld [vmem:[%s3401_s23 + $0x68] sm:$0xff]   ;;  %v2564_v29 = vld [vmem:[%s3393_s8 + $0x30] sm:$0xff]   ;;  %s2932_s22 = scalar_lea.vmem %s2931_s24, 4096  ;;  %p2933_p12 = scmp.lt.s32.totalorder %s3890_s3, %s2931_s24 }
  0xf6   : > { %v2582_v30 = vld [vmem:[%s3401_s23 + $0x70] sm:$0xff]   ;;  %v2565_v31 = vld [vmem:[%s3393_s8 + $0x38] sm:$0xff]   ;;  %v2568_v33 = vld [vmem:[%s3393_s8 + $0x40] sm:$0xff]   ;;  %p2934_p1 = scmp.lt.s32.totalorder %s2932_s22, %s2926_s15 }
  0xf7   : > { %2302 = vmatpush3.bf16.msra.mxu0 %v2549_v2  ;;  %2356 = vmatmul.mubr.msk.bf16.vlgmr.msra.gmra.mrb[0].mxu1 %vm965_vm2, %v2563_v13  ;;  %v2583_v32 = vld [vmem:[%s3401_s23 + $0x78] sm:$0xff]   ;;  %v2569_v34 = vld [vmem:[%s3393_s8 + $0x48] sm:$0xff]   ;;  %v2572_v35 = vld [vmem:[%s3393_s8 + $0x50] sm:$0xff]   ;;  %s3888_s16 = scalar_lea.hbm %s4018_s20, %s2231_s9  ;;  %p4019_p6 = scmp.ne.s32.totalorder %s4017_s1, 0 }
  0xf8   : > { %2303 = vmatprep.subr.bf16.mxu0 %v2550_v5  ;;  %2359 = vmatprep.mubr.msk.bf16.mxu1 %vm965_vm2, %v2566_v14  ;;  %v2573_v36 = vld [vmem:[%s3393_s8 + $0x58] sm:$0xff]   ;;  %v2576_v37 = vld [vmem:[%s3393_s8 + $0x60] sm:$0xff]   ;;  %v2577_v38 = vld [vmem:[%s3393_s8 + $0x68] sm:$0xff]   ;;  %p2935_p9 = por %p2934_p1, %p2933_p12 }
  0xf9   : > { %v2580_v39 = vld [vmem:[%s3393_s8 + $0x70] sm:$0xff]   ;;  %v2581_v40 = vld [vmem:[%s3393_s8 + $0x78] sm:$0xff]   ;;  %v2584_v41 = vld [vmem:[%s3401_s23] sm:$0xff]   ;;  %p2928_p4 = pnand %p2927_p7, %p4019_p6 }
  0xfa   : > { %v2585_v42 = vld [vmem:[%s3401_s23 + $0x8] sm:$0xff]   ;;  %v2586_v43 = vld [vmem:[%s3401_s23 + $0x10] sm:$0xff]   ;;  %v2587_v44 = vld [vmem:[%s3401_s23 + $0x18] sm:$0xff]  }
  0xfb   : > { %2304 = vmatpush3.bf16.msra.mxu0 %v2550_v5  ;;  %v2588_v45 = vld [vmem:[#allocation11] sm:$0xff]   ;;  %v2589_v46 = vld [vmem:[#allocation11 + $0x8] sm:$0xff]   ;;  %v2590_v47 = vld [vmem:[#allocation11 + $0x10] sm:$0xff]   ;;  %p2929_p13 = pneg %p2928_p4 }
  0xfc   : > { %2305 = vmatprep.subr.bf16.mxu0 %v2551_v9  ;;  %2379 = vmatprep.subr.bf16.mxu1 %v2588_v45  ;;  %v2591_v48 = vld [vmem:[#allocation11 + $0x18] sm:$0xff]   ;;  %v2592_v49 = vld [vmem:[#allocation11 + $0x20] sm:$0xff]   ;;  %v2593_v50 = vld [vmem:[#allocation11 + $0x28] sm:$0xff]  }
  0xfd   : > { %2380 = vmatpush3.bf16.msra.mxu1 %v2588_v45  ;;  %v2594_v51 = vld [vmem:[#allocation11 + $0x30] sm:$0xff]   ;;  %v2595_v52 = vld [vmem:[#allocation11 + $0x38] sm:$0xff]   ;;  %p2936_p0 = pnand %p2935_p9, %p2929_p13 }
  0xfe   : > { %2381 = vmatprep.subr.bf16.mxu1 %v2589_v46  ;;  %v3496_v13 = vld [vmem:[#allocation10] ss:$0 sm:$0xff] }
  0xff   : > { %2306 = vmatpush3.bf16.msra.mxu0 %v2551_v9  ;;  %2360 = vmatmul.mubr.msk.bf16.gmra.mrb[4].mxu1 %vm965_vm2, %v2567_v16 }
 0x100   : > { %2307 = vmatprep.subr.bf16.mxu0 %v2552_v11  ;;  %2363 = vmatprep.mubr.msk.bf16.mxu1 %vm965_vm2, %v2570_v17 }
 0x101   : > { %2382 = vmatpush3.bf16.msra.mxu1 %v2589_v46 }
 0x102   : > { %2383 = vmatprep.subr.bf16.mxu1 %v2590_v47 }
 0x103   : > { %2308 = vmatpush3.bf16.msra.mxu0 %v2552_v11 }
 0x104   : > { %2309 = vmatprep.subr.bf16.mxu0 %v2553_v15 }
 0x105   : > { %2384 = vmatpush3.bf16.msra.mxu1 %v2590_v47 }
 0x106   : > { %2385 = vmatprep.subr.bf16.mxu1 %v2591_v48 }
 0x107   : > { %2310 = vmatpush3.bf16.msra.mxu0 %v2553_v15  ;;  %2364 = vmatmul.mubr.msk.bf16.gmra.mrb[8].mxu1 %vm965_vm2, %v2571_v20 }
 0x108   : > { %2311 = vmatprep.subr.bf16.mxu0 %v2554_v18  ;;  %2367 = vmatprep.mubr.msk.bf16.mxu1 %vm965_vm2, %v2574_v22 }
 0x109   : > { %2386 = vmatpush3.bf16.msra.mxu1 %v2591_v48 }
 0x10a   : > { %2387 = vmatprep.subr.bf16.mxu1 %v2592_v49 }
 0x10b   : > { %2312 = vmatpush3.bf16.msra.mxu0 %v2554_v18 }
 0x10c   : > { %2345 = vmatprep.subr.bf16.mxu0 %v1019_v10 }
 0x10d   : > { %2388 = vmatpush3.bf16.msra.mxu1 %v2592_v49 }
 0x10e   : > { %2314 = vmatmul.mubr.bf16.vlgmr.msra.gmra.mrb[0].mxu0 %v2556_v19  ;;  %2389 = vmatprep.subr.bf16.mxu1 %v2593_v50 }
 0x10f   : > { %2346 = vmatpush3.bf16.msra.mxu0 %v1019_v10  ;;  %2317 = vmatprep.mubr.bf16.mxu0 %v2558_v21 }
 0x110   : > { %2368 = vmatmul.mubr.msk.bf16.gmra.mrb[12].mxu1 %vm965_vm2, %v2575_v25 }
 0x111   : > { %2371 = vmatprep.mubr.msk.bf16.mxu1 %vm965_vm2, %v2578_v26  ;;  %2390 = vmatpush3.bf16.msra.mxu1 %v2593_v50 }
 0x112   : > { %2391 = vmatprep.subr.bf16.mxu1 %v2594_v51 }
 0x115   : > { %2392 = vmatpush3.bf16.msra.mxu1 %v2594_v51 }
 0x116   : > { %2318 = vmatmul.mubr.bf16.gmra.mrb[4].mxu0 %v2559_v23  ;;  %2393 = vmatprep.subr.bf16.mxu1 %v2595_v52 }
 0x117   : > { %2321 = vmatprep.mubr.bf16.mxu0 %v2560_v24 }
 0x118   : > { %2372 = vmatmul.mubr.msk.bf16.gmra.mrb[16].mxu1 %vm965_vm2, %v2579_v28 }
 0x119   : > { %2375 = vmatprep.mubr.msk.bf16.mxu1 %vm965_vm2, %v2582_v30  ;;  %2394 = vmatpush3.bf16.msra.mxu1 %v2595_v52 }
 0x11e   : > { %2322 = vmatmul.mubr.bf16.gmra.mrb[8].mxu0 %v2561_v27 }
 0x11f   : > { %2325 = vmatprep.mubr.bf16.mxu0 %v2564_v29 }
 0x120   : > { %2376 = vmatmul.mubr.msk.bf16.gmra.mrb[20].mxu1 %vm965_vm2, %v2583_v32 }
 0x126   : > { %2326 = vmatmul.mubr.bf16.gmra.mrb[12].mxu0 %v2565_v31 }
 0x127   : > { %2329 = vmatprep.mubr.bf16.mxu0 %v2568_v33 }
 0x12e   : > { %2330 = vmatmul.mubr.bf16.gmra.mrb[16].mxu0 %v2569_v34 }
 0x12f   : > { %2333 = vmatprep.mubr.bf16.mxu0 %v2572_v35 }
 0x136   : > { %2334 = vmatmul.mubr.bf16.gmra.mrb[20].mxu0 %v2573_v36 }
 0x137   : > { %2337 = vmatprep.mubr.bf16.mxu0 %v2576_v37 }
 0x13e   : > { %2338 = vmatmul.mubr.bf16.gmra.mrb[24].mxu0 %v2577_v38 }
 0x13f   : > { %2341 = vmatprep.mubr.bf16.mxu0 %v2580_v39 }
 0x146   : > { %2342 = vmatmul.mubr.bf16.gmra.mrb[28].mxu0 %v2581_v40 }
 0x147   : > { %2347 = vmatprep.mubr.msk.bf16.mxu0 %vm965_vm2, %v2584_v41 }
 0x14e   : > { %2348 = vmatmul.mubr.msk.bf16.vlgmr.msra.gmra.mrb[32].mxu0 %vm965_vm2, %v2585_v42 }
 0x14f   : > { %2351 = vmatprep.mubr.msk.bf16.mxu0 %vm965_vm2, %v2586_v43 }
 0x156   : > { %2352 = vmatmul.mubr.msk.bf16.gmra.mrb[36].mxu0 %vm965_vm2, %v2587_v44 }
 0x1ca   : > { %v2357_v53 = vpop.f32.mrb[0].mxu1 }
 0x1cb   : > { %v1087_v54 = vpop.f32.mrb[1].mxu1 }
 0x1cc   : > { %v2358_v55 = vpop.f32.mrb[2].mxu1 }
 0x1cd   : > { %v1090_v56 = vpop.f32.mrb[3].mxu1 }
 0x1d2   : > { %v2361_v57 = vpop.f32.mrb[4].mxu1 }
 0x1d3   : > { %v1103_v58 = vpop.f32.mrb[5].mxu1 }
 0x1d4   : > { %v2362_v59 = vpop.f32.mrb[6].mxu1 }
 0x1d5   : > { %v1106_v60 = vpop.f32.mrb[7].mxu1 }
 0x1da   : > { %v3466_v62 = vpop.f32.mrb[8].mxu1 }
 0x1db   : > { %v3470_v0 = vpop.f32.mrb[9].mxu1 }
 0x1dc   : > { %v3474_v2 = vpop.f32.mrb[10].mxu1 }
 0x1dd   : > { %v3478_v4 = vpop.f32.mrb[11].mxu1 }
 0x1e1   : > { %v3464_v61 = vpop.f32.mrb[0].mxu0 }
 0x1e2   : > { %v3468_v63 = vpop.f32.mrb[1].mxu0 }
 0x1e3   : > { %v3472_v1 = vpop.f32.mrb[2].mxu0  ;;  %v3482_v6 = vpop.f32.mrb[12].mxu1 }
 0x1e4   : > { %v3476_v3 = vpop.f32.mrb[3].mxu0  ;;  %v3486_v8 = vpop.f32.mrb[13].mxu1 }
 0x1e5   : > { %v3490_v10 = vpop.f32.mrb[14].mxu1 }
 0x1e6   : > { %v3494_v12 = vpop.f32.mrb[15].mxu1 }
 0x1e9   : > { %v3480_v5 = vpop.f32.mrb[4].mxu0 }
 0x1ea   : > { %v3484_v7 = vpop.f32.mrb[5].mxu0 }
 0x1eb   : > { %v3488_v9 = vpop.f32.mrb[6].mxu0  ;;  %v3498_v15 = vpop.f32.mrb[16].mxu1 }
 0x1ec   : > { %v3492_v11 = vpop.f32.mrb[7].mxu0  ;;  %v3501_v18 = vpop.f32.mrb[17].mxu1 }
 0x1ed   : > { %v3504_v21 = vpop.f32.mrb[18].mxu1 }
 0x1ee   : > { %v3507_v25 = vpop.f32.mrb[19].mxu1 }
 0x1f1   : > { %v2323_v14 = vpop.f32.mrb[8].mxu0 }
 0x1f2   : > { %v728_v16 = vadd.f32 %v2323_v14, %v3496_v13  ;;  %v719_v17 = vpop.f32.mrb[9].mxu0 }
 0x1f3   : > { %v720_v19 = vadd.f32 %v3496_v13, %v719_v17  ;;  %v2324_v20 = vpop.f32.mrb[10].mxu0  ;;  %v3518_v35 = vpop.f32.mrb[20].mxu1 }
 0x1f4   : > { %v824_v22 = vmax.f32 %v728_v16, 0.0  ;;  %v731_v23 = vadd.f32 %v2324_v20, %v3496_v13  ;;  %v722_v24 = vpop.f32.mrb[11].mxu0  ;;  %v3523_v39 = vpop.f32.mrb[21].mxu1 }
 0x1f5   : > { %v822_v26 = vmax.f32 %v720_v19, 0.0  ;;  %v723_v27 = vadd.f32 %v3496_v13, %v722_v24  ;;  %v3528_v43 = vpop.f32.mrb[22].mxu1 }
 0x1f6   : > { %v825_v28 = vmax.f32 %v731_v23, 0.0  ;;  %v3510_v29 = vmul.f32 %v2357_v53, %v824_v22  ;;  %v3531_v47 = vpop.f32.mrb[23].mxu1 }
 0x1f7   : > { %v823_v30 = vmax.f32 %v723_v27, 0.0  ;;  %v3512_v31 = vmul.f32 %v1087_v54, %v822_v26 }
 0x1f8   : > { %v3514_v32 = vmul.f32 %v2358_v55, %v825_v28 }
 0x1f9   : > { %v3516_v33 = vmul.f32 %v1090_v56, %v823_v30  ;;  %v2327_v34 = vpop.f32.mrb[12].mxu0 }
 0x1fa   : > { %v1219_v36 = vpack.c.bf16 %v3514_v32, %v3510_v29  ;;  %v744_v37 = vadd.f32 %v2327_v34, %v3496_v13  ;;  %v735_v38 = vpop.f32.mrb[13].mxu0 }
 0x1fb   : > { %v1218_v40 = vpack.c.bf16 %v3516_v33, %v3512_v31  ;;  %v736_v41 = vadd.f32 %v3496_v13, %v735_v38  ;;  %v2328_v42 = vpop.f32.mrb[14].mxu0 }
 0x1fc   : > { %v828_v44 = vmax.f32 %v744_v37, 0.0  ;;  %v747_v45 = vadd.f32 %v2328_v42, %v3496_v13  ;;  %v738_v46 = vpop.f32.mrb[15].mxu0 }
 0x1fd   : > { %v826_v48 = vmax.f32 %v736_v41, 0.0  ;;  %v739_v49 = vadd.f32 %v3496_v13, %v738_v46 }
 0x1fe   : > { %v829_v50 = vmax.f32 %v747_v45, 0.0  ;;  %v3534_v51 = vmul.f32 %v2361_v57, %v828_v44 }
 0x1ff   : > { %v827_v52 = vmax.f32 %v739_v49, 0.0  ;;  %v3536_v53 = vmul.f32 %v1103_v58, %v826_v48 }
 0x200   : > { %v3538_v54 = vmul.f32 %v2362_v59, %v829_v50 }
 0x201   : > { %v3540_v55 = vmul.f32 %v1106_v60, %v827_v52  ;;  %v2331_v56 = vpop.f32.mrb[16].mxu0 }
 0x202   : > { %v1221_v14 = vpack.c.bf16 %v3538_v54, %v3534_v51  ;;  %v760_v16 = vadd.f32 %v2331_v56, %v3496_v13  ;;  %v751_v17 = vpop.f32.mrb[17].mxu0 }
 0x203   : > { %v1220_v19 = vpack.c.bf16 %v3540_v55, %v3536_v53  ;;  %v752_v57 = vadd.f32 %v3496_v13, %v751_v17  ;;  %v2332_v20 = vpop.f32.mrb[18].mxu0 }
 0x204   : > { %v832_v22 = vmax.f32 %v760_v16, 0.0  ;;  %v763_v58 = vadd.f32 %v2332_v20, %v3496_v13  ;;  %v754_v59 = vpop.f32.mrb[19].mxu0 }
 0x205   : > { %v830_v23 = vmax.f32 %v752_v57, 0.0  ;;  %v755_v60 = vadd.f32 %v3496_v13, %v754_v59 }
 0x206   : > { %v833_v24 = vmax.f32 %v763_v58, 0.0  ;;  %v3551_v26 = vmul.f32 %v3466_v62, %v832_v22 }
 0x207   : > { %v831_v27 = vmax.f32 %v755_v60, 0.0  ;;  %v3554_v28 = vmul.f32 %v3470_v0, %v830_v23 }
 0x208   : > { %v3557_v30 = vmul.f32 %v3474_v2, %v833_v24 }
 0x209   : > { %v3560_v34 = vmul.f32 %v3478_v4, %v831_v27  ;;  %v2335_v37 = vpop.f32.mrb[20].mxu0 }
 0x20a   : > { %v1223_v38 = vpack.c.bf16 %v3557_v30, %v3551_v26  ;;  %v776_v41 = vadd.f32 %v2335_v37, %v3496_v13  ;;  %v767_v42 = vpop.f32.mrb[21].mxu0 }
 0x20b   : > { %v1222_v62 = vpack.c.bf16 %v3560_v34, %v3554_v28  ;;  %v768_v44 = vadd.f32 %v3496_v13, %v767_v42  ;;  %v2336_v0 = vpop.f32.mrb[22].mxu0 }
 0x20c   : > { %v836_v45 = vmax.f32 %v776_v41, 0.0  ;;  %v779_v2 = vadd.f32 %v2336_v0, %v3496_v13  ;;  %v770_v46 = vpop.f32.mrb[23].mxu0 }
 0x20d   : > { %v834_v48 = vmax.f32 %v768_v44, 0.0  ;;  %v771_v4 = vadd.f32 %v3496_v13, %v770_v46 }
 0x20e   : > { %v837_v49 = vmax.f32 %v779_v2, 0.0  ;;  %v3571_v50 = vmul.f32 %v3482_v6, %v836_v45 }
 0x20f   : > { %v835_v52 = vmax.f32 %v771_v4, 0.0  ;;  %v3574_v56 = vmul.f32 %v3486_v8, %v834_v48 }
 0x210   : > { %v3577_v16 = vmul.f32 %v3490_v10, %v837_v49 }
 0x211   : > { %v3580_v17 = vmul.f32 %v3494_v12, %v835_v52  ;;  %v2339_v57 = vpop.f32.mrb[24].mxu0 }
 0x212   : > { %v1225_v20 = vpack.c.bf16 %v3577_v16, %v3571_v50  ;;  %v792_v22 = vadd.f32 %v2339_v57, %v3496_v13  ;;  %v783_v58 = vpop.f32.mrb[25].mxu0  ;;  %v688_v57 = vadd.f32 %v3496_v13, %v3468_v63 }
 0x213   : > { %v1224_v6 = vpack.c.bf16 %v3580_v17, %v3574_v56  ;;  %v784_v59 = vadd.f32 %v3496_v13, %v783_v58  ;;  %v2340_v8 = vpop.f32.mrb[26].mxu0 }
 0x214   : > { %v840_v23 = vmax.f32 %v792_v22, 0.0  ;;  %v795_v10 = vadd.f32 %v2340_v8, %v3496_v13  ;;  %v786_v60 = vpop.f32.mrb[27].mxu0 }
 0x215   : > { %v838_v24 = vmax.f32 %v784_v59, 0.0  ;;  %v787_v12 = vadd.f32 %v3496_v13, %v786_v60  ;;  %v699_v59 = vadd.f32 %v3472_v1, %v3496_v13 }
 0x216   : > { %v841_v27 = vmax.f32 %v795_v10, 0.0  ;;  %v3591_v37 = vmul.f32 %v3498_v15, %v840_v23  ;;  %v691_v10 = vadd.f32 %v3496_v13, %v3476_v3  ;;  %v712_v3 = vadd.f32 %v3480_v5, %v3496_v13 }
 0x217   : > { %v839_v41 = vmax.f32 %v787_v12, 0.0  ;;  %v3594_v42 = vmul.f32 %v3501_v18, %v838_v24 }
 0x218   : > { %v3597_v44 = vmul.f32 %v3504_v21, %v841_v27  ;;  %v696_v21 = vadd.f32 %v3464_v61, %v3496_v13  ;;  %v814_v27 = vmax.f32 %v688_v57, 0.0  ;;  %v707_v57 = vadd.f32 %v3496_v13, %v3492_v11  ;;  %v3660_v11 = vld [vmem:[#allocation13] ss:$0 sm:$0xff] }
 0x219   : > { %v3600_v0 = vmul.f32 %v3507_v25, %v839_v41  ;;  %v2343_v45 = vpop.f32.mrb[28].mxu0 }
 0x21a   : > { %v1227_v2 = vpack.c.bf16 %v3597_v44, %v3591_v37  ;;  %v808_v46 = vadd.f32 %v2343_v45, %v3496_v13  ;;  %v799_v48 = vpop.f32.mrb[29].mxu0  ;;  %v816_v24 = vmax.f32 %v696_v21, 0.0  ;;  %v817_v45 = vmax.f32 %v699_v59, 0.0 }
 0x21b   : > { %v1226_v15 = vpack.c.bf16 %v3600_v0, %v3594_v42  ;;  %v800_v4 = vadd.f32 %v3496_v13, %v799_v48  ;;  %v2344_v18 = vpop.f32.mrb[30].mxu0 }
 0x21c   : > { %v844_v49 = vmax.f32 %v808_v46, 0.0  ;;  %v811_v25 = vadd.f32 %v2344_v18, %v3496_v13  ;;  %v802_v52 = vpop.f32.mrb[31].mxu0 }
 0x21d   : > { %v842_v22 = vmax.f32 %v800_v4, 0.0  ;;  %v803_v58 = vadd.f32 %v3496_v13, %v802_v52  ;;  %v815_v4 = vmax.f32 %v691_v10, 0.0 }
 0x21e   : > { %v845_v8 = vmax.f32 %v811_v25, 0.0  ;;  %v1212_v23 = vmul.f32 %v3518_v35, %v844_v49 }
 0x21f   : > { %v843_v61 = vmax.f32 %v803_v58, 0.0  ;;  %v1210_v60 = vmul.f32 %v3523_v39, %v842_v22  ;;  %v820_v58 = vmax.f32 %v712_v3, 0.0 }
 0x220   : > { %v1213_v12 = vmul.f32 %v3528_v43, %v845_v8  ;;  %v704_v43 = vadd.f32 %v3496_v13, %v3484_v7 }
 0x221   : > { %v1211_v63 = vmul.f32 %v3531_v47, %v843_v61  ;;  %v2349_v41 = vpop.f32.mrb[32].mxu0  ;;  %v715_v47 = vadd.f32 %v3488_v9, %v3496_v13  ;;  %v819_v61 = vmax.f32 %v707_v57, 0.0 }
 0x222   : > { %v1229_v46 = vpack.c.bf16 %v1213_v12, %v1212_v23  ;;  %v1184_v48 = vmul.f32 %v2349_v41, %v816_v24  ;;  %v1055_v1 = vpop.f32.mrb[33].mxu0  ;;  %v818_v59 = vmax.f32 %v704_v43, 0.0 }
 0x223   : > { %v1228_v18 = vpack.c.bf16 %v1211_v63, %v1210_v60  ;;  %v1182_v35 = vmul.f32 %v1055_v1, %v814_v27  ;;  %v2350_v49 = vpop.f32.mrb[34].mxu0  ;;  %v821_v23 = vmax.f32 %v715_v47, 0.0 }
 0x224   : > { %v1185_v25 = vmul.f32 %v2350_v49, %v817_v45  ;;  %v1058_v39 = vpop.f32.mrb[35].mxu0 }
 0x225   : > { %v1183_v21 = vmul.f32 %v1058_v39, %v815_v4 }
 0x226   : > { %v1215_v52 = vpack.c.bf16 %v1185_v25, %v1184_v48 }
 0x227   : > { %v1214_v22 = vpack.c.bf16 %v1183_v21, %v1182_v35 }
 0x229   : > { %v2353_v8 = vpop.f32.mrb[36].mxu0  ;;  %2395 = vmatprep.mubr.bf16.mxu1 %v1214_v22 }
 0x22a   : > { %v1188_v5 = vmul.f32 %v2353_v8, %v820_v58  ;;  %v1071_v10 = vpop.f32.mrb[37].mxu0  ;;  %2396 = vmatmul.mubr.bf16.vlgmr.msra.gmra.mrb[24].mxu1 %v1215_v52 }
 0x22b   : > { %v1186_v60 = vmul.f32 %v1071_v10, %v818_v59  ;;  %v2354_v7 = vpop.f32.mrb[38].mxu0 }
 0x22c   : > { %v1189_v24 = vmul.f32 %v2354_v7, %v821_v23  ;;  %v1074_v12 = vpop.f32.mrb[39].mxu0 }
 0x22d   : > { %v1187_v27 = vmul.f32 %v1074_v12, %v819_v61 }
 0x22e   : > { %v1217_v9 = vpack.c.bf16 %v1189_v24, %v1188_v5 }
 0x22f   : > { %v1216_v63 = vpack.c.bf16 %v1187_v27, %v1186_v60 }
 0x231   : > { %2399 = vmatprep.mubr.bf16.mxu1 %v1216_v63 }
 0x232   : > { %2400 = vmatmul.mubr.bf16.gmra.mrb[28].mxu1 %v1217_v9 }
 0x233   : > { %2403 = vmatprep.mubr.bf16.mxu1 %v1218_v40 }
 0x23a   : > { %2404 = vmatmul.mubr.bf16.gmra.mrb[32].mxu1 %v1219_v36 }
 0x23b   : > { %2407 = vmatprep.mubr.bf16.mxu1 %v1220_v19 }
 0x242   : > { %2408 = vmatmul.mubr.bf16.gmra.mrb[36].mxu1 %v1221_v14 }
 0x243   : > { %2411 = vmatprep.mubr.bf16.mxu1 %v1222_v62 }
 0x24a   : > { %2412 = vmatmul.mubr.bf16.gmra.mrb[40].mxu1 %v1223_v38 }
 0x24b   : > { %2415 = vmatprep.mubr.bf16.mxu1 %v1224_v6 }
 0x252   : > { %2416 = vmatmul.mubr.bf16.gmra.mrb[44].mxu1 %v1225_v20 }
 0x253   : > { %2419 = vmatprep.mubr.bf16.mxu1 %v1226_v15 }
 0x25a   : > { %2420 = vmatmul.mubr.bf16.gmra.mrb[48].mxu1 %v1227_v2 }
 0x25b   : > { %2423 = vmatprep.mubr.bf16.mxu1 %v1228_v18 }
 0x262   : > { %2424 = vmatmul.mubr.bf16.gmra.mrb[52].mxu1 %v1229_v46 }
 0x2fd   : > { %v2397_v13 = vpop.f32.mrb[24].mxu1 }
 0x2fe   : > { %v3663_v29 = vadd.f32 %v2397_v13, %v3660_v11  ;;  %v1335_v31 = vpop.f32.mrb[25].mxu1 }
 0x2ff   : > { %v3666_v32 = vadd.f32 %v3660_v11, %v1335_v31  ;;  %v2398_v33 = vpop.f32.mrb[26].mxu1 }
 0x300   : > { %v2129_v36 = vmul.f32 -1.442695, %v3663_v29  ;;  %v3670_v40 = vadd.f32 %v2398_v33, %v3660_v11  ;;  %v1338_v51 = vpop.f32.mrb[27].mxu1 }
 0x301   : > { %v2127_v53 = vmul.f32 -1.442695, %v3666_v32  ;;  %v3674_v54 = vadd.f32 %v3660_v11, %v1338_v51 }
 0x302   : > { %2596 = vpow2.f32 %v2129_v36  ;;  %v2130_v55 = vmul.f32 -1.442695, %v3670_v40 }
 0x303   : > { %2598 = vpow2.f32 %v2127_v53  ;;  %v2128_v14 = vmul.f32 -1.442695, %v3674_v54 }
 0x304   : > { %2600 = vpow2.f32 %v2130_v55 }
 0x305   : > { %2602 = vpow2.f32 %v2128_v14  ;;  %v2401_v19 = vpop.f32.mrb[28].mxu1 }
 0x306   : > { %v3679_v26 = vadd.f32 %v2401_v19, %v3660_v11  ;;  %v1351_v28 = vpop.f32.mrb[29].mxu1 }
 0x307   : > { %v3682_v30 = vadd.f32 %v3660_v11, %v1351_v28  ;;  %v2402_v34 = vpop.f32.mrb[30].mxu1 }
 0x308   : > { %v2133_v38 = vmul.f32 -1.442695, %v3679_v26  ;;  %v3686_v62 = vadd.f32 %v2402_v34, %v3660_v11  ;;  %v1354_v50 = vpop.f32.mrb[31].mxu1 }
 0x309   : > { %v2131_v56 = vmul.f32 -1.442695, %v3682_v30  ;;  %v3690_v16 = vadd.f32 %v3660_v11, %v1354_v50 }
 0x30a   : > { %2604 = vpow2.f32 %v2133_v38  ;;  %v2134_v17 = vmul.f32 -1.442695, %v3686_v62 }
 0x30b   : > { %2606 = vpow2.f32 %v2131_v56  ;;  %v2132_v20 = vmul.f32 -1.442695, %v3690_v16 }
 0x30c   : > { %v2597_v6 = vpop.eup %2596  ;;  %2608 = vpow2.f32 %v2134_v17 }
 0x30d   : > { %v2599_v37 = vpop.eup %2598  ;;  %v1560_v42 = vadd.f32 1.0, %v2597_v6  ;;  %2610 = vpow2.f32 %v2132_v20  ;;  %v2405_v44 = vpop.f32.mrb[32].mxu1 }
 0x30e   : > { %v2601_v0 = vpop.eup %2600  ;;  %v1558_v2 = vadd.f32 1.0, %v2599_v37  ;;  %v3695_v15 = vadd.f32 %v2405_v44, %v3660_v11  ;;  %v1367_v41 = vpop.f32.mrb[33].mxu1 }
 0x30f   : > { %v2603_v45 = vpop.eup %2602  ;;  %2612 = vrcp.f32 %v1560_v42  ;;  %v1561_v46 = vadd.f32 1.0, %v2601_v0  ;;  %v3698_v48 = vadd.f32 %v3660_v11, %v1367_v41  ;;  %v2406_v1 = vpop.f32.mrb[34].mxu1 }
 0x310   : > { %2614 = vrcp.f32 %v1558_v2  ;;  %v1559_v4 = vadd.f32 1.0, %v2603_v45  ;;  %v2137_v18 = vmul.f32 -1.442695, %v3695_v15  ;;  %v3702_v35 = vadd.f32 %v2406_v1, %v3660_v11  ;;  %v1370_v49 = vpop.f32.mrb[35].mxu1 }
 0x311   : > { %2616 = vrcp.f32 %v1561_v46  ;;  %v2135_v3 = vmul.f32 -1.442695, %v3698_v48  ;;  %v3706_v25 = vadd.f32 %v3660_v11, %v1370_v49 }
 0x312   : > { %2618 = vrcp.f32 %v1559_v4  ;;  %v2138_v39 = vmul.f32 -1.442695, %v3702_v35 }
 0x313   : > { %2620 = vpow2.f32 %v2137_v18  ;;  %v2136_v43 = vmul.f32 -1.442695, %v3706_v25 }
 0x314   : > { %v2605_v21 = vpop.eup %2604  ;;  %2622 = vpow2.f32 %v2135_v3 }
 0x315   : > { %v2607_v47 = vpop.eup %2606  ;;  %v1564_v52 = vadd.f32 1.0, %v2605_v21  ;;  %2624 = vpow2.f32 %v2138_v39  ;;  %v2409_v57 = vpop.f32.mrb[36].mxu1 }
 0x316   : > { %v2609_v22 = vpop.eup %2608  ;;  %v1562_v58 = vadd.f32 1.0, %v2607_v47  ;;  %2626 = vpow2.f32 %v2136_v43  ;;  %v3711_v59 = vadd.f32 %v2409_v57, %v3660_v11  ;;  %v1383_v8 = vpop.f32.mrb[37].mxu1 }
 0x317   : > { %v2611_v23 = vpop.eup %2610  ;;  %2628 = vrcp.f32 %v1564_v52  ;;  %v1565_v5 = vadd.f32 1.0, %v2609_v22  ;;  %v3714_v10 = vadd.f32 %v3660_v11, %v1383_v8  ;;  %v2410_v61 = vpop.f32.mrb[38].mxu1 }
 0x318   : > { %2630 = vrcp.f32 %v1562_v58  ;;  %v1563_v60 = vadd.f32 1.0, %v2611_v23  ;;  %v2141_v7 = vmul.f32 -1.442695, %v3711_v59  ;;  %v3718_v24 = vadd.f32 %v2410_v61, %v3660_v11  ;;  %v1386_v12 = vpop.f32.mrb[39].mxu1 }
 0x319   : > { %v2613_v27 = vpop.eup %2612  ;;  %2632 = vrcp.f32 %v1565_v5  ;;  %v2139_v9 = vmul.f32 -1.442695, %v3714_v10  ;;  %v3722_v63 = vadd.f32 %v3660_v11, %v1386_v12 }
 0x31a   : > { %v2615_v13 = vpop.eup %2614  ;;  %v1656_v31 = vmul.f32 %v2613_v27, %v3663_v29  ;;  %2634 = vrcp.f32 %v1563_v60  ;;  %v2142_v33 = vmul.f32 -1.442695, %v3718_v24 }
 0x31b   : > { %v2617_v36 = vpop.eup %2616  ;;  %v1654_v51 = vmul.f32 %v2615_v13, %v3666_v32  ;;  %2636 = vpow2.f32 %v2141_v7  ;;  %v2140_v53 = vmul.f32 -1.442695, %v3722_v63 }
 0x31c   : > { %v2619_v55 = vpop.eup %2618  ;;  %v2201_v14 = vpack.c.bf16 %v1656_v31, %v1656_v31  ;;  %v1657_v19 = vmul.f32 %v2617_v36, %v3670_v40  ;;  %2638 = vpow2.f32 %v2139_v9 }
 0x31d   : > { %v2621_v28 = vpop.eup %2620  ;;  %v2199_v34 = vpack.c.bf16 %v1654_v51, %v1654_v51  ;;  %v1655_v29 = vmul.f32 %v2619_v55, %v3674_v54  ;;  %2640 = vpow2.f32 %v2142_v33  ;;  %v2413_v38 = vpop.f32.mrb[40].mxu1 }
 0x31e   : > { %v2623_v50 = vpop.eup %2622  ;;  %1817 = vst.msk [vmem:[%s3731_s30 + $0x8] sm:$0xf] %vm1814_vm3, %v2201_v14  ;;  %v2202_v32 = vpack.c.bf16 %v1657_v19, %v1657_v19  ;;  %v1568_v56 = vadd.f32 1.0, %v2621_v28  ;;  %2642 = vpow2.f32 %v2140_v53  ;;  %v3736_v40 = vadd.f32 %v2413_v38, %v3660_v11  ;;  %v1399_v17 = vpop.f32.mrb[41].mxu1 }
 0x31f   : > { %v2625_v20 = vpop.eup %2624  ;;  %1815 = vst.msk [vmem:[%s3731_s30] sm:$0xf] %vm1814_vm3, %v2199_v34  ;;  %v2200_v54 = vpack.c.bf16 %v1655_v29, %v1655_v29  ;;  %v1566_v6 = vadd.f32 1.0, %v2623_v50  ;;  %v3741_v37 = vadd.f32 %v3660_v11, %v1399_v17  ;;  %v2414_v42 = vpop.f32.mrb[42].mxu1 }
 0x320   : > { %v2627_v44 = vpop.eup %2626  ;;  %1818 = vst.msk [vmem:[%s3731_s30 + $0xc] sm:$0xf] %vm1814_vm3, %v2202_v32  ;;  %2644 = vrcp.f32 %v1568_v56  ;;  %v1569_v0 = vadd.f32 1.0, %v2625_v20  ;;  %v2145_v2 = vmul.f32 -1.442695, %v3736_v40  ;;  %v3747_v41 = vadd.f32 %v2414_v42, %v3660_v11  ;;  %v1402_v45 = vpop.f32.mrb[43].mxu1 }
 0x321   : > { %v2629_v46 = vpop.eup %2628  ;;  %1816 = vst.msk [vmem:[%s3731_s30 + $0x4] sm:$0xf] %vm1814_vm3, %v2200_v54  ;;  %2646 = vrcp.f32 %v1566_v6  ;;  %v1567_v1 = vadd.f32 1.0, %v2627_v44  ;;  %v2143_v4 = vmul.f32 -1.442695, %v3741_v37  ;;  %v3753_v18 = vadd.f32 %v3660_v11, %v1402_v45 }
 0x322   : > { %v2631_v49 = vpop.eup %2630  ;;  %v1660_v3 = vmul.f32 %v2629_v46, %v3679_v26  ;;  %2648 = vrcp.f32 %v1569_v0  ;;  %v2146_v39 = vmul.f32 -1.442695, %v3747_v41 }
 0x323   : > { %v2633_v43 = vpop.eup %2632  ;;  %v1658_v21 = vmul.f32 %v2631_v49, %v3682_v30  ;;  %2650 = vrcp.f32 %v1567_v1  ;;  %v2144_v47 = vmul.f32 -1.442695, %v3753_v18 }
 0x324   : > { %v2635_v52 = vpop.eup %2634  ;;  %v2205_v57 = vpack.c.bf16 %v1660_v3, %v1660_v3  ;;  %v1661_v22 = vmul.f32 %v2633_v43, %v3686_v62  ;;  %2652 = vpow2.f32 %v2145_v2 }
 0x325   : > { %v2637_v58 = vpop.eup %2636  ;;  %v2203_v8 = vpack.c.bf16 %v1658_v21, %v1658_v21  ;;  %v1659_v26 = vmul.f32 %v2635_v52, %v3690_v16  ;;  %2654 = vpow2.f32 %v2143_v4  ;;  %v2417_v23 = vpop.f32.mrb[44].mxu1 }
 0x326   : > { %v2639_v5 = vpop.eup %2638  ;;  %1821 = vst.msk [vmem:[%s3731_s30 + $0x18] sm:$0xf] %vm1814_vm3, %v2205_v57  ;;  %v2206_v30 = vpack.c.bf16 %v1661_v22, %v1661_v22  ;;  %v1572_v61 = vadd.f32 1.0, %v2637_v58  ;;  %2656 = vpow2.f32 %v2146_v39  ;;  %v3764_v60 = vadd.f32 %v2417_v23, %v3660_v11  ;;  %v1415_v7 = vpop.f32.mrb[45].mxu1 }
 0x327   : > { %v2641_v62 = vpop.eup %2640  ;;  %1819 = vst.msk [vmem:[%s3731_s30 + $0x10] sm:$0xf] %vm1814_vm3, %v2203_v8  ;;  %v2204_v12 = vpack.c.bf16 %v1659_v26, %v1659_v26  ;;  %v1570_v27 = vadd.f32 1.0, %v2639_v5  ;;  %2658 = vpow2.f32 %v2144_v47  ;;  %v3769_v16 = vadd.f32 %v3660_v11, %v1415_v7  ;;  %v2418_v9 = vpop.f32.mrb[46].mxu1 }
 0x328   : > { %v2643_v13 = vpop.eup %2642  ;;  %1822 = vst.msk [vmem:[%s3731_s30 + $0x1c] sm:$0xf] %vm1814_vm3, %v2206_v30  ;;  %2660 = vrcp.f32 %v1572_v61  ;;  %v1573_v31 = vadd.f32 1.0, %v2641_v62  ;;  %v2149_v33 = vmul.f32 -1.442695, %v3764_v60  ;;  %v3775_v36 = vadd.f32 %v2418_v9, %v3660_v11  ;;  %v1418_v51 = vpop.f32.mrb[47].mxu1 }
 0x329   : > { %1820 = vst.msk [vmem:[%s3731_s30 + $0x14] sm:$0xf] %vm1814_vm3, %v2204_v12  ;;  %2662 = vrcp.f32 %v1570_v27  ;;  %v1571_v53 = vadd.f32 1.0, %v2643_v13  ;;  %v2147_v55 = vmul.f32 -1.442695, %v3769_v16  ;;  %v3781_v14 = vadd.f32 %v3660_v11, %v1418_v51 }
 0x32a   : > { %v2645_v19 = vpop.eup %2644  ;;  %2664 = vrcp.f32 %v1573_v31  ;;  %v2150_v28 = vmul.f32 -1.442695, %v3775_v36 }
 0x32b   : > { %v2647_v34 = vpop.eup %2646  ;;  %v1664_v29 = vmul.f32 %v2645_v19, %v3695_v15  ;;  %2666 = vrcp.f32 %v1571_v53  ;;  %v2148_v38 = vmul.f32 -1.442695, %v3781_v14 }
 0x32c   : > { %v2649_v50 = vpop.eup %2648  ;;  %v1662_v32 = vmul.f32 %v2647_v34, %v3698_v48  ;;  %2668 = vpow2.f32 %v2149_v33 }
 0x32d   : > { %v2651_v56 = vpop.eup %2650  ;;  %v2209_v17 = vpack.c.bf16 %v1664_v29, %v1664_v29  ;;  %v1665_v20 = vmul.f32 %v2649_v50, %v3702_v35  ;;  %2670 = vpow2.f32 %v2147_v55  ;;  %v2421_v54 = vpop.f32.mrb[48].mxu1 }
 0x32e   : > { %v2653_v6 = vpop.eup %2652  ;;  %v2207_v42 = vpack.c.bf16 %v1662_v32, %v1662_v32  ;;  %v1663_v44 = vmul.f32 %v2651_v56, %v3706_v25  ;;  %2672 = vpow2.f32 %v2150_v28  ;;  %v3790_v15 = vadd.f32 %v2421_v54, %v3660_v11  ;;  %v1431_v0 = vpop.f32.mrb[49].mxu1 }
 0x32f   : > { %v2655_v2 = vpop.eup %2654  ;;  %1825 = vst.msk [vmem:[%s3731_s30 + $0x28] sm:$0xf] %vm1814_vm3, %v2209_v17  ;;  %v2210_v48 = vpack.c.bf16 %v1665_v20, %v1665_v20  ;;  %v1576_v45 = vadd.f32 1.0, %v2653_v6  ;;  %2674 = vpow2.f32 %v2148_v38  ;;  %v3795_v35 = vadd.f32 %v3660_v11, %v1431_v0  ;;  %v2422_v46 = vpop.f32.mrb[50].mxu1 }
 0x330   : > { %v2657_v1 = vpop.eup %2656  ;;  %1823 = vst.msk [vmem:[%s3731_s30 + $0x20] sm:$0xf] %vm1814_vm3, %v2207_v42  ;;  %v2208_v25 = vpack.c.bf16 %v1663_v44, %v1663_v44  ;;  %v1574_v4 = vadd.f32 1.0, %v2655_v2  ;;  %v3800_v49 = vadd.f32 %v2422_v46, %v3660_v11  ;;  %v1434_v3 = vpop.f32.mrb[51].mxu1  ;;  %v2153_v21 = vmul.f32 -1.442695, %v3790_v15 }
 0x331   : > { %v2659_v39 = vpop.eup %2658  ;;  %1826 = vst.msk [vmem:[%s3731_s30 + $0x2c] sm:$0xf] %vm1814_vm3, %v2210_v48  ;;  %2676 = vrcp.f32 %v1576_v45  ;;  %v1577_v43 = vadd.f32 1.0, %v2657_v1  ;;  %v3806_v47 = vadd.f32 %v3660_v11, %v1434_v3  ;;  %v2151_v22 = vmul.f32 -1.442695, %v3795_v35 }
 0x332   : > { %v2661_v52 = vpop.eup %2660  ;;  %1824 = vst.msk [vmem:[%s3731_s30 + $0x24] sm:$0xf] %vm1814_vm3, %v2208_v25  ;;  %2678 = vrcp.f32 %v1574_v4  ;;  %v1575_v57 = vadd.f32 1.0, %v2659_v39  ;;  %v2154_v26 = vmul.f32 -1.442695, %v3800_v49 }
 0x333   : > { %v2663_v58 = vpop.eup %2662  ;;  %v1668_v8 = vmul.f32 %v2661_v52, %v3711_v59  ;;  %2680 = vrcp.f32 %v1577_v43  ;;  %v2152_v30 = vmul.f32 -1.442695, %v3806_v47 }
 0x334   : > { %v2665_v23 = vpop.eup %2664  ;;  %v1666_v5 = vmul.f32 %v2663_v58, %v3714_v10  ;;  %2682 = vrcp.f32 %v1575_v57 }
 0x335   : > { %v2667_v61 = vpop.eup %2666  ;;  %v2213_v7 = vpack.c.bf16 %v1668_v8, %v1668_v8  ;;  %v1669_v62 = vmul.f32 %v2665_v23, %v3718_v24  ;;  %2684 = vpow2.f32 %v2153_v21  ;;  %v2425_v12 = vpop.f32.mrb[52].mxu1 }
 0x336   : > { %v2669_v27 = vpop.eup %2668  ;;  %v2211_v9 = vpack.c.bf16 %v1666_v5, %v1666_v5  ;;  %v1667_v59 = vmul.f32 %v2667_v61, %v3722_v63  ;;  %2686 = vpow2.f32 %v2151_v22  ;;  %v3818_v13 = vadd.f32 %v2425_v12, %v3660_v11  ;;  %v1447_v10 = vpop.f32.mrb[53].mxu1 }
 0x337   : > { %v2671_v31 = vpop.eup %2670  ;;  %1829 = vst.msk [vmem:[%s3731_s30 + $0x38] sm:$0xf] %vm1814_vm3, %v2213_v7  ;;  %v2214_v33 = vpack.c.bf16 %v1669_v62, %v1669_v62  ;;  %v1580_v51 = vadd.f32 1.0, %v2669_v27  ;;  %2688 = vpow2.f32 %v2154_v26  ;;  %v3823_v24 = vadd.f32 %v3660_v11, %v1447_v10  ;;  %v2426_v53 = vpop.f32.mrb[54].mxu1 }
 0x338   : > { %v2673_v55 = vpop.eup %2672  ;;  %1827 = vst.msk [vmem:[%s3731_s30 + $0x30] sm:$0xf] %vm1814_vm3, %v2211_v9  ;;  %v2212_v63 = vpack.c.bf16 %v1667_v59, %v1667_v59  ;;  %v1578_v19 = vadd.f32 1.0, %v2671_v31  ;;  %2690 = vpow2.f32 %v2152_v30  ;;  %v1450_v28 = vpop.f32.mrb[55].mxu1  ;;  %v2157_v38 = vmul.f32 -1.442695, %v3818_v13 }
 0x339   : > { %v2675_v34 = vpop.eup %2674  ;;  %1830 = vst.msk [vmem:[%s3731_s30 + $0x3c] sm:$0xf] %vm1814_vm3, %v2214_v33  ;;  %2692 = vrcp.f32 %v1580_v51  ;;  %v1581_v29 = vadd.f32 1.0, %v2673_v55  ;;  %v3831_v50 = vadd.f32 %v2426_v53, %v3660_v11  ;;  %v2155_v56 = vmul.f32 -1.442695, %v3823_v24 }
 0x33a   : > { %1828 = vst.msk [vmem:[%s3731_s30 + $0x34] sm:$0xf] %vm1814_vm3, %v2212_v63  ;;  %2694 = vrcp.f32 %v1578_v19  ;;  %v1579_v32 = vadd.f32 1.0, %v2675_v34  ;;  %v3837_v17 = vadd.f32 %v3660_v11, %v1450_v28 }
 0x33b   : > { %v2677_v20 = vpop.eup %2676  ;;  %2696 = vrcp.f32 %v1581_v29  ;;  %v2158_v54 = vmul.f32 -1.442695, %v3831_v50 }
 0x33c   : > { %v2679_v6 = vpop.eup %2678  ;;  %v1672_v42 = vmul.f32 %v2677_v20, %v3736_v40  ;;  %2698 = vrcp.f32 %v1579_v32  ;;  %v2156_v44 = vmul.f32 -1.442695, %v3837_v17 }
 0x33d   : > { %v2681_v0 = vpop.eup %2680  ;;  %v1670_v2 = vmul.f32 %v2679_v6, %v3741_v37  ;;  %2700 = vpow2.f32 %v2157_v38 }
 0x33e   : > { %v2683_v48 = vpop.eup %2682  ;;  %v2217_v45 = vpack.c.bf16 %v1672_v42, %v1672_v42  ;;  %v1673_v11 = vmul.f32 %v2681_v0, %v3747_v41  ;;  %2702 = vpow2.f32 %v2155_v56 }
 0x33f   : > { %v2685_v46 = vpop.eup %2684  ;;  %v2215_v1 = vpack.c.bf16 %v1670_v2, %v1670_v2  ;;  %v1671_v25 = vmul.f32 %v2683_v48, %v3753_v18  ;;  %2704 = vpow2.f32 %v2158_v54 }
 0x340   : > { %v2687_v40 = vpop.eup %2686  ;;  %1833 = vst.msk [vmem:[%s3731_s30 + $0x48] sm:$0xf] %vm1814_vm3, %v2217_v45  ;;  %v2218_v4 = vpack.c.bf16 %v1673_v11, %v1673_v11  ;;  %v1584_v3 = vadd.f32 1.0, %v2685_v46  ;;  %2706 = vpow2.f32 %v2156_v44 }
 0x341   : > { %v2689_v37 = vpop.eup %2688  ;;  %1831 = vst.msk [vmem:[%s3731_s30 + $0x40] sm:$0xf] %vm1814_vm3, %v2215_v1  ;;  %v2216_v39 = vpack.c.bf16 %v1671_v25, %v1671_v25  ;;  %v1582_v43 = vadd.f32 1.0, %v2687_v40 }
 0x342   : > { %v2691_v41 = vpop.eup %2690  ;;  %1834 = vst.msk [vmem:[%s3731_s30 + $0x4c] sm:$0xf] %vm1814_vm3, %v2218_v4  ;;  %2708 = vrcp.f32 %v1584_v3  ;;  %v1585_v21 = vadd.f32 1.0, %v2689_v37 }
 0x343   : > { %v2693_v52 = vpop.eup %2692  ;;  %1832 = vst.msk [vmem:[%s3731_s30 + $0x44] sm:$0xf] %vm1814_vm3, %v2216_v39  ;;  %2710 = vrcp.f32 %v1582_v43  ;;  %v1583_v18 = vadd.f32 1.0, %v2691_v41 }
 0x344   : > { %v2695_v57 = vpop.eup %2694  ;;  %v1676_v22 = vmul.f32 %v2693_v52, %v3764_v60  ;;  %2712 = vrcp.f32 %v1585_v21 }
 0x345   : > { %v2697_v58 = vpop.eup %2696  ;;  %v1674_v8 = vmul.f32 %v2695_v57, %v3769_v16  ;;  %2714 = vrcp.f32 %v1583_v18 }
 0x346   : > { %v2699_v26 = vpop.eup %2698  ;;  %v2221_v23 = vpack.c.bf16 %v1676_v22, %v1676_v22  ;;  %v1677_v5 = vmul.f32 %v2697_v58, %v3775_v36 }
 0x347   : > { %v2701_v30 = vpop.eup %2700  ;;  %v2219_v61 = vpack.c.bf16 %v1674_v8, %v1674_v8  ;;  %v1675_v7 = vmul.f32 %v2699_v26, %v3781_v14 }
 0x348   : > { %v2703_v62 = vpop.eup %2702  ;;  %1837 = vst.msk [vmem:[%s3731_s30 + $0x58] sm:$0xf] %vm1814_vm3, %v2221_v23  ;;  %v2222_v60 = vpack.c.bf16 %v1677_v5, %v1677_v5  ;;  %v1588_v12 = vadd.f32 1.0, %v2701_v30 }
 0x349   : > { %v2705_v27 = vpop.eup %2704  ;;  %1835 = vst.msk [vmem:[%s3731_s30 + $0x50] sm:$0xf] %vm1814_vm3, %v2219_v61  ;;  %v2220_v16 = vpack.c.bf16 %v1675_v7, %v1675_v7  ;;  %v1586_v9 = vadd.f32 1.0, %v2703_v62 }
 0x34a   : > { %v2707_v59 = vpop.eup %2706  ;;  %1838 = vst.msk [vmem:[%s3731_s30 + $0x5c] sm:$0xf] %vm1814_vm3, %v2222_v60  ;;  %2716 = vrcp.f32 %v1588_v12  ;;  %v1589_v36 = vadd.f32 1.0, %v2705_v27 }
 0x34b   : > { %1836 = vst.msk [vmem:[%s3731_s30 + $0x54] sm:$0xf] %vm1814_vm3, %v2220_v16  ;;  %2718 = vrcp.f32 %v1586_v9  ;;  %v1587_v14 = vadd.f32 1.0, %v2707_v59 }
 0x34c   : > { %v2709_v10 = vpop.eup %2708  ;;  %2720 = vrcp.f32 %v1589_v36 }
 0x34d   : > { %v2711_v31 = vpop.eup %2710  ;;  %v1680_v33 = vmul.f32 %v2709_v10, %v3790_v15  ;;  %2722 = vrcp.f32 %v1587_v14 }
 0x34e   : > { %v2713_v51 = vpop.eup %2712  ;;  %v1678_v53 = vmul.f32 %v2711_v31, %v3795_v35 }
 0x34f   : > { %v2715_v55 = vpop.eup %2714  ;;  %v2225_v63 = vpack.c.bf16 %v1680_v33, %v1680_v33  ;;  %v1681_v19 = vmul.f32 %v2713_v51, %v3800_v49 }
 0x350   : > { %v2223_v28 = vpack.c.bf16 %v1678_v53, %v1678_v53  ;;  %v1679_v34 = vmul.f32 %v2715_v55, %v3806_v47 }
 0x351   : > { %1841 = vst.msk [vmem:[%s3731_s30 + $0x68] sm:$0xf] %vm1814_vm3, %v2225_v63  ;;  %v2226_v29 = vpack.c.bf16 %v1681_v19, %v1681_v19 }
 0x352   : > { %1839 = vst.msk [vmem:[%s3731_s30 + $0x60] sm:$0xf] %vm1814_vm3, %v2223_v28  ;;  %v2224_v15 = vpack.c.bf16 %v1679_v34, %v1679_v34 }
 0x353   : > { %1842 = vst.msk [vmem:[%s3731_s30 + $0x6c] sm:$0xf] %vm1814_vm3, %v2226_v29 }
 0x354   : > { %v2717_v38 = vpop.eup %2716  ;;  %1840 = vst.msk [vmem:[%s3731_s30 + $0x64] sm:$0xf] %vm1814_vm3, %v2224_v15 }
 0x355   : > { %v2719_v35 = vpop.eup %2718  ;;  %v1684_v32 = vmul.f32 %v2717_v38, %v3818_v13 }
 0x356   : > { %v2721_v49 = vpop.eup %2720  ;;  %v1682_v47 = vmul.f32 %v2719_v35, %v3823_v24 }
 0x357   : > { %v2723_v56 = vpop.eup %2722  ;;  %v2229_v20 = vpack.c.bf16 %v1684_v32, %v1684_v32  ;;  %v1685_v54 = vmul.f32 %v2721_v49, %v3831_v50 }
 0x358   : > { %v2227_v6 = vpack.c.bf16 %v1682_v47, %v1682_v47  ;;  %v1683_v42 = vmul.f32 %v2723_v56, %v3837_v17 }
 0x359   : > { %1845 = vst.msk [vmem:[%s3731_s30 + $0x78] sm:$0xf] %vm1814_vm3, %v2229_v20  ;;  %v2230_v44 = vpack.c.bf16 %v1685_v54, %v1685_v54 }
 0x35a   : > { %1843 = vst.msk [vmem:[%s3731_s30 + $0x70] sm:$0xf] %vm1814_vm3, %v2227_v6  ;;  %v2228_v13 = vpack.c.bf16 %v1683_v42, %v1683_v42 }
 0x35b   : > { %1846 = vst.msk [vmem:[%s3731_s30 + $0x7c] sm:$0xf] %vm1814_vm3, %v2230_v44 }
 0x35c   : > { %1844 = vst.msk [vmem:[%s3731_s30 + $0x74] sm:$0xf] %vm1814_vm3, %v2228_v13 }
 0x35d   : > { %2939 = shalt.err (!%p2936_p0)
}
 0x35e   : > { %s2940_s29 = scalar_lea.hbm %s3888_s16, 2048  ;;  %s2944_s14 = scalar_lea.hbm %s4018_s20, 4096 }
 0x35f   : > { %p2941_p8 = scmp.ne.s32.totalorder %s3888_s16, %s2940_s29  ;;  %p2945_p2 = scmp.lt.u32.totalorder %s3888_s16, %s4018_s20 }
 0x360   : > { %p2946_p10 = scmp.lt.u32.totalorder %s2944_s14, %s2940_s29  ;;  %p2948_p7 = scmp.lt.u32.totalorder %s2940_s29, %s3888_s16 }
 0x361   : > { %p2942_p3 = pnand %p2941_p8, %p4019_p6 }
 0x362   : > { %p2947_p5 = por %p2946_p10, %p2945_p2 }
 0x363   : > { %p2943_p11 = pneg %p2942_p3 }
 0x364   : > { %p2949_p4 = por %p2948_p7, %p2947_p5 }
 0x366   : > { %p2950_p13 = pnand %p2949_p4, %p2943_p11 }
 0x368   : > { %2953 = shalt.err (!%p2950_p13)
}
 0x369   : > { %s3033_s5 = smov 64   ;;  %s3034_s11 = smov 4  }
 0x36a   : > { %2451 = dma.vmem_to_hbm [thread:$0]  (%p4019_p6), %s3890_s3, 2048, %s3888_s16, %s1848_s27, %s3033_s5, %s3033_s5, %s3034_s11  }
 0x36b PF: > { %s4020_s23 = sld [smem:[#allocation20_spill]]  ;;  %s4021_s19 = sld [smem:[#allocation23_spill]] }
 0x36c   : > { %s4022_s13 = sld [smem:[#allocation22_spill]] }
 0x371   : > { %s1878_s30 = sand.u32 1, %s4020_s23   ;;  %p4023_p12 = scmp.ne.s32.totalorder %s4021_s19, 0 }
 0x372   : > { %p4024_p1 = scmp.ge.s32.totalorder %s4022_s13, 2  ;;  %s1879_s9 = scalar_lea.sflag [#allocation4], %s1878_s30 }
 0x374   : > { %p2477_p9 = pnand %p4024_p1, %p4023_p12 }
 0x376   : > { %2995 = dma.done.wait (!%p2477_p9), %s1879_s9, 2048  }
 0x377   : > { %2997 = vsyncadd (!%p2477_p9), %s1879_s9, 4294965248  ;;  %s28_s29 = sadd.s32 1, %s4022_s13   ;;  %s4025_s17 = sld [smem:[#allocation21_spill]] }
 0x378   : > { %p25_p0 = scmp.ge.s32.totalorder %s28_s29, 4   ;;  %s4026_s26 = sld [smem:[#allocation26_spill]] }
 0x379   : > { %s4027_s18 = sld [smem:[#allocation24_spill]]  ;;  %s4028_s24 = smov %s3004_s25 }
 0x37a   : > { %s4030_s27 = smov %s3016_s28  ;;  %27 = sbr.rel (!%p25_p0) target bundleno = 15 (0xf), region = 133 }
 0x37d   : > { %s4029_s25 = smov %s4025_s17 }
 0x37f   : > { %s4031_s28 = smov %s4027_s18 }
 0x381   :  { %1884 = vsyncpa [#allocation3], 1 }
 0x382   :  { %1886 = vsyncpa [#allocation3 + $0x1], 1 }
 0x383   :  { %1887 = vsyncpa [#allocation6], 1 }
 0x384   :  { %1889 = vsyncpa [#allocation6 + $0x1], 1 }
 0x385   :  { %1890 = vsyncpa [#allocation9], 1 }
 0x386   :  { %1891 = vsyncpa [#allocation12], 1 }
 0x387   :  { %1892 = vsyncpa [#allocation4], 1 }
 0x388   :  { %1894 = vsyncpa [#allocation4 + $0x1], 1 }

</bundles_post_ra>
